<compile_context>
chip_gen: v7x
topology: tpu7x:2x2x1
jax: 0.10.0
libtpu: 0.0.40
codegen_flags: <defaults>
</compile_context>

<pallas_src>
import jax
import jax.numpy as jnp
from jax.experimental import pallas as pl
from jax.experimental.pallas import tpu as pltpu


def _round_up(v, m):
    return (v + m - 1) // m * m


# ----------------------------------------------------------------------------
# Pallas kernel: fused (im2col matmul conv) [+bias] [+InstanceNorm] [+LReLU]
# and optionally the final 4x4/s2/p0 Conv -> scalar head as an epilogue.
# ----------------------------------------------------------------------------
def _make_conv_kernel(*, use_bias, use_in, use_lrelu, fused_head,
                      eps=1e-5, slope=0.2):
    def kernel(*refs):
        i = 0
        p_ref = refs[i]; i += 1          # [1, M, Kp]   bf16 patches (one image)
        w_ref = refs[i]; i += 1          # [Kp, Cp]     bf16 weights
        b_ref = None
        if use_bias:
            b_ref = refs[i]; i += 1      # [1, Cp] f32
        g_ref = beta_ref = None
        if use_in:
            g_ref = refs[i]; beta_ref = refs[i + 1]; i += 2   # [1, Cp] f32 each
        wh_ref = bh_ref = None
        if fused_head:
            wh_ref = refs[i]; bh_ref = refs[i + 1]; i += 2    # [M, Cp], [1, 1]
        o_ref = refs[i]

        p = p_ref[0]                     # [M, Kp] bf16
        w = w_ref[...]                   # [Kp, Cp] bf16
        # bf16 MXU matmul, f32 accumulation (single MXU pass per 256-K chunk).
        acc = jnp.dot(p, w, preferred_element_type=jnp.float32)   # [M, Cp] f32

        if use_bias:
            acc = acc + b_ref[...]

        if use_in:
            # Single-pass InstanceNorm stats (sum and sum-of-squares).
            m = acc.shape[0]
            inv_m = 1.0 / m
            mean = jnp.sum(acc, axis=0, keepdims=True) * inv_m
            meansq = jnp.sum(acc * acc, axis=0, keepdims=True) * inv_m
            var = jnp.maximum(meansq - mean * mean, 0.0)
            acc = (acc - mean) * jax.lax.rsqrt(var + eps)
            acc = acc * g_ref[...] + beta_ref[...]

        if use_lrelu:
            acc = jnp.where(acc > 0, acc, slope * acc)

        if fused_head:
            # Final Conv(C -> 1, 4x4, s2, p0) on the 4x4 map == one big dot.
            prod = acc * wh_ref[...]                          # [M, Cp] f32
            head = jnp.sum(jnp.sum(prod, axis=1, keepdims=True),
                           axis=0, keepdims=True)             # [1, 1]
            o_ref[0] = head + bh_ref[...]
        else:
            o_ref[0] = acc.astype(o_ref.dtype)                # lane-dense store

    return kernel


# ----------------------------------------------------------------------------
# One critic layer via pallas_call.
# ----------------------------------------------------------------------------
def conv_block(x_nhwc, W, *, b=None, gamma=None, beta=None,
               stride=2, pad=1, lrelu=True, instnorm=False,
               head_w=None, head_b=None, out_dtype=jnp.bfloat16):
    """4x4 conv (+bias) (+InstanceNorm affine) (+LeakyReLU 0.2), optionally
    fused with the final Conv(C -> 1, 4x4, s2, p0) head.

    x_nhwc : [N, H, W, Cin]  (any float dtype; MXU operands are cast to bf16)
    W      : [Cout, Cin, KH, KW]  (PyTorch OIHW layout)
    Returns ([N, OH*OW, Cp] activations, OH, OW, Cout) without a head,
    or [N, 1, 1] (f32) with the fused head.
    """
    N, H, Wd, Cin = x_nhwc.shape
    Cout, Cin_w, KH, KW = W.shape
    assert Cin_w == Cin

    # ---- bf16 tap-stack "im2col" (tap-major feature order), K padded to 128
    xb = x_nhwc.astype(jnp.bfloat16)
    xp = jnp.pad(xb, ((0, 0), (pad, pad), (pad, pad), (0, 0)))
    OH = (H + 2 * pad - KH) // stride + 1
    OW = (Wd + 2 * pad - KW) // stride + 1
    taps = []
    for i in range(KH):
        for j in range(KW):
            taps.append(xp[:, i:i + (OH - 1) * stride + 1:stride,
                           j:j + (OW - 1) * stride + 1:stride, :])
    patches = jnp.stack(taps, axis=3).reshape(N, OH * OW, KH * KW * Cin)
    K = KH * KW * Cin
    Kp = _round_up(K, 128)
    if Kp != K:
        patches = jnp.pad(patches, ((0, 0), (0, 0), (0, Kp - K)))
    M = OH * OW

    # ---- weights: OIHW -> [K, Cout] (tap-major), pad to [Kp, Cp], bf16 ----
    Cp = _round_up(Cout, 128)
    Wm = jnp.transpose(W, (2, 3, 1, 0)).reshape(K, Cout)
    Wm = jnp.pad(Wm, ((0, Kp - K), (0, Cp - Cout))).astype(jnp.bfloat16)

    inputs = [patches, Wm]
    in_specs = [
        pl.BlockSpec((1, M, Kp), lambda n: (n, 0, 0)),
        pl.BlockSpec((Kp, Cp), lambda n: (0, 0)),        # resident across grid
    ]

    use_bias = b is not None
    if use_bias:
        b_arr = jnp.pad(b.astype(jnp.float32), (0, Cp - Cout)).reshape(1, Cp)
        inputs.append(b_arr)
        in_specs.append(pl.BlockSpec((1, Cp), lambda n: (0, 0)))
    if instnorm:
        g_arr = jnp.pad(gamma.astype(jnp.float32), (0, Cp - Cout)).reshape(1, Cp)
        be_arr = jnp.pad(beta.astype(jnp.float32), (0, Cp - Cout)).reshape(1, Cp)
        inputs += [g_arr, be_arr]
        in_specs += [pl.BlockSpec((1, Cp), lambda n: (0, 0)),
                     pl.BlockSpec((1, Cp), lambda n: (0, 0))]

    fused_head = head_w is not None
    if fused_head:
        # head_w: [1, Cout, 4, 4] applied to this layer's OHxOW output with
        # stride 2 / pad 0 -> 1x1 output; requires OH == OW == 4.
        _, chc, khh, kwh = head_w.shape
        assert chc == Cout and khh == OH and kwh == OW, \
            "fused head requires the last block's output map to be 4x4"
        wh = jnp.transpose(head_w[0], (1, 2, 0)).reshape(M, Cout)
        wh = jnp.pad(wh.astype(jnp.float32), ((0, 0), (0, Cp - Cout)))
        bh = head_b.astype(jnp.float32).reshape(1, 1)
        inputs += [wh, bh]
        in_specs += [pl.BlockSpec((M, Cp), lambda n: (0, 0)),
                     pl.BlockSpec((1, 1), lambda n: (0, 0))]

    kernel = _make_conv_kernel(use_bias=use_bias, use_in=instnorm,
                               use_lrelu=lrelu, fused_head=fused_head)

    if fused_head:
        out_shape = jax.ShapeDtypeStruct((N, 1, 1), jnp.float32)
        out_spec = pl.BlockSpec((1, 1, 1), lambda n: (n, 0, 0))
    else:
        out_shape = jax.ShapeDtypeStruct((N, M, Cp), out_dtype)
        out_spec = pl.BlockSpec((1, M, Cp), lambda n: (n, 0, 0))

    out = pl.pallas_call(
        kernel,
        out_shape=out_shape,
        grid=(N,),
        in_specs=in_specs,
        out_specs=out_spec,
        compiler_params=pltpu.CompilerParams(
            dimension_semantics=("parallel",),
            vmem_limit_bytes=48 * 1024 * 1024),
    )(*inputs)

    if fused_head:
        return out
    return out, OH, OW, Cout


# ----------------------------------------------------------------------------
# Discriminator: parameters + forward
# ----------------------------------------------------------------------------
def init_discriminator_params(key, img_channels, features_dim):
    ks = jax.random.split(key, 16)

    def conv_w(k, cout, cin):
        fan_in = cin * 16
        return jax.random.normal(k, (cout, cin, 4, 4), jnp.float32) / jnp.sqrt(fan_in)

    params = {}
    params["w0"] = conv_w(ks[0], features_dim, img_channels)
    params["b0"] = 0.01 * jax.random.normal(ks[1], (features_dim,), jnp.float32)

    blocks = []
    cin = features_dim
    for i in range(3):
        cout = features_dim * (2 ** (i + 1))
        w = conv_w(ks[2 + 3 * i], cout, cin)
        g = 1.0 + 0.1 * jax.random.normal(ks[3 + 3 * i], (cout,), jnp.float32)
        bb = 0.1 * jax.random.normal(ks[4 + 3 * i], (cout,), jnp.float32)
        blocks.append((w, g, bb))
        cin = cout
    params["blocks"] = blocks

    params["w_last"] = conv_w(ks[11], 1, features_dim * 8)
    params["b_last"] = 0.01 * jax.random.normal(ks[12], (1,), jnp.float32)
    return params


def discriminator_forward(x_nchw, params):
    """x_nchw: [N, C, 64, 64] float32  ->  [N, 1, 1, 1] float32."""
    N = x_nchw.shape[0]
    x = jnp.transpose(x_nchw, (0, 2, 3, 1))            # single NCHW -> NHWC

    # Conv(img_ch -> F, 4x4, s2, p1) + bias + LeakyReLU(0.2)
    y, OH, OW, C = conv_block(x, params["w0"], b=params["b0"],
                              stride=2, pad=1, lrelu=True, instnorm=False)
    x = y[:, :, :C].reshape(N, OH, OW, C)

    # First two blocks: Conv(no bias) + InstanceNorm(affine) + LeakyReLU(0.2)
    for (w, g, bb) in params["blocks"][:-1]:
        y, OH, OW, C = conv_block(x, w, gamma=g, beta=bb,
                                  stride=2, pad=1, lrelu=True, instnorm=True)
        x = y[:, :, :C].reshape(N, OH, OW, C)

    # Last block fused with the final Conv(8F -> 1, 4x4, s2, p0) head whenever
    # the last feature map is 4x4 (i.e. 64x64 inputs); otherwise fall back to
    # a separate (general) conv_block for the head.
    w4, g4, b4 = params["blocks"][-1]
    OH4 = (x.shape[1] + 2 - 4) // 2 + 1
    if OH4 == 4:
        out = conv_block(x, w4, gamma=g4, beta=b4, stride=2, pad=1,
                         lrelu=True, instnorm=True,
                         head_w=params["w_last"], head_b=params["b_last"])
        return out.reshape(N, 1, 1, 1)
    else:
        y, OH, OW, C = conv_block(x, w4, gamma=g4, beta=b4,
                                  stride=2, pad=1, lrelu=True, instnorm=True)
        x = y[:, :, :C].reshape(N, OH, OW, C)
        y, OH, OW, C = conv_block(x, params["w_last"], b=params["b_last"],
                                  stride=2, pad=0, lrelu=False, instnorm=False)
        out = y[:, :, :C].reshape(N, OH, OW, C)
        return jnp.transpose(out, (0, 3, 1, 2))


# ----------------------------------------------------------------------------
# Pure-JAX references (mirror the PyTorch module) for correctness checks.
# bf16_matmul=True matches the kernel's precision policy (bf16 MXU operands,
# f32 accumulation, f32 norm/activation math, f32 final head).
# ----------------------------------------------------------------------------
def _ref_forward(x, params, *, bf16_matmul):
    def conv(v, W, b, stride, pad, cast):
        if cast:
            v = v.astype(jnp.bfloat16)
            W = W.astype(jnp.bfloat16)
        out = jax.lax.conv_general_dilated(
            v, W, (stride, stride), ((pad, pad), (pad, pad)),
            dimension_numbers=("NCHW", "OIHW", "NCHW"),
            preferred_element_type=jnp.float32,
            precision=jax.lax.Precision.HIGHEST)
        if b is not None:
            out = out + b.reshape(1, -1, 1, 1)
        return out

    def lrelu(v):
        return jnp.where(v > 0, v, 0.2 * v)

    def inorm(v, g, bb, eps=1e-5):
        m = jnp.mean(v, axis=(2, 3), keepdims=True)
        var = jnp.mean(jnp.square(v - m), axis=(2, 3), keepdims=True)
        v = (v - m) / jnp.sqrt(var + eps)
        return v * g.reshape(1, -1, 1, 1) + bb.reshape(1, -1, 1, 1)

    v = lrelu(conv(x, params["w0"], params["b0"], 2, 1, bf16_matmul))
    for (w, g, bb) in params["blocks"]:
        v = lrelu(inorm(conv(v, w, None, 2, 1, bf16_matmul), g, bb))
    # Fused head in the kernel works on f32 activations and f32 head weights.
    return conv(v, params["w_last"], params["b_last"], 2, 0, False)


# ----------------------------------------------------------------------------
if __name__ == "__main__":
    key = jax.random.PRNGKey(0)
    k_x, k_p = jax.random.split(key)

    # Spatial must be 64 so the final 4x4/s2/p0 conv sees a 4x4 map
    # (64 -> 32 -> 16 -> 8 -> 4 -> 1).  Batch / feature dims kept small.
    N, IMG_CH, FEATURES, HW = 2, 3, 8, 64
    x = jax.random.normal(k_x, (N, IMG_CH, HW, HW), jnp.float32)
    params = init_discriminator_params(k_p, IMG_CH, FEATURES)

    fwd = jax.jit(discriminator_forward)
    out = jax.block_until_ready(fwd(x, params))
    assert out.shape == (N, 1, 1, 1), out.shape

    # Tight check against a reference using the same bf16-MXU / f32-accumulate
    # precision policy (validates conv / IN / LReLU / head semantics, weight
    # layout, and channel/K padding).
    ref_bf16 = jax.block_until_ready(_ref_forward(x, params, bf16_matmul=True))
    assert jnp.allclose(out, ref_bf16, atol=2e-3, rtol=2e-3), \
        float(jnp.max(jnp.abs(out - ref_bf16)))

    # Loose sanity check against the full-f32 (Precision.HIGHEST) reference:
    # the only difference is the intentional bf16 matmul policy.
    ref_f32 = jax.block_until_ready(_ref_forward(x, params, bf16_matmul=False))
    max_diff = float(jnp.max(jnp.abs(out - ref_f32)))
    assert max_diff < 0.25 * (1.0 + float(jnp.max(jnp.abs(ref_f32)))), max_diff

    print("KERNEL_OK")
</pallas_src>

<mosaic_0001>
module attributes {stable_mosaic.version = 11 : i64} {
  func.func @kernel(%arg0: i32, %arg1: memref<1x1024x128xbf16, #tpu.memory_space<vmem>>, %arg2: memref<128x128xbf16, #tpu.memory_space<vmem>>, %arg3: memref<1x128xf32, #tpu.memory_space<vmem>>, %arg4: memref<1x1024x128xbf16, #tpu.memory_space<vmem>>) attributes {dimension_semantics = [#tpu.dimension_semantics<parallel>], iteration_bounds = array<i64: 2>, scalar_prefetch = 0 : i64, scratch_operands = 0 : i64, tpu.core_type = #tpu.core_type<tc>, window_params = [{transform_indices = @transform_0, window_bounds = array<i64: 1, 1024, 128>}, {pipeline_mode = #tpu.pipeline_mode<synchronous>, transform_indices = @transform_1, window_bounds = array<i64: 128, 128>}, {pipeline_mode = #tpu.pipeline_mode<synchronous>, transform_indices = @transform_2, window_bounds = array<i64: 1, 128>}, {transform_indices = @transform_3, window_bounds = array<i64: 1, 1024, 128>}]} {
    %c0 = arith.constant 0 : index
    %c0_0 = arith.constant 0 : index
    %c0_1 = arith.constant 0 : index
    %0 = vector.load %arg1[%c0, %c0_0, %c0_1] : memref<1x1024x128xbf16, #tpu.memory_space<vmem>>, vector<1x1024x128xbf16>
    %1 = vector.shape_cast %0 : vector<1x1024x128xbf16> to vector<1024x128xbf16>
    %c0_2 = arith.constant 0 : index
    %c0_3 = arith.constant 0 : index
    %2 = vector.load %arg2[%c0_2, %c0_3] : memref<128x128xbf16, #tpu.memory_space<vmem>>, vector<128x128xbf16>
    %cst = arith.constant dense<0.000000e+00> : vector<1024x128xf32>
    %3 = tpu.matmul %1, %2, %cst {dimension_numbers = #tpu.dot_dimension_numbers<[1], [0], [0], [1], [0, 0, 1, 1], [], []>} : vector<1024x128xbf16>, vector<128x128xbf16>, vector<1024x128xf32> -> vector<1024x128xf32>
    %c0_4 = arith.constant 0 : index
    %c0_5 = arith.constant 0 : index
    %4 = vector.load %arg3[%c0_4, %c0_5] : memref<1x128xf32, #tpu.memory_space<vmem>>, vector<1x128xf32>
    %5 = vector.broadcast %4 : vector<1x128xf32> to vector<1024x128xf32>
    %6 = arith.addf %3, %5 : vector<1024x128xf32>
    %cst_6 = arith.constant 0.000000e+00 : f32
    %7 = vector.broadcast %cst_6 : f32 to vector<1024x128xf32>
    %8 = arith.cmpf ogt, %6, %7 : vector<1024x128xf32>
    %cst_7 = arith.constant 2.000000e-01 : f32
    %9 = vector.broadcast %cst_7 : f32 to vector<1024x128xf32>
    %10 = arith.mulf %9, %6 : vector<1024x128xf32>
    %11 = arith.select %8, %6, %10 : vector<1024x128xi1>, vector<1024x128xf32>
    %12 = arith.truncf %11 : vector<1024x128xf32> to vector<1024x128xbf16>
    %c0_8 = arith.constant 0 : index
    %c0_9 = arith.constant 0 : index
    %c0_10 = arith.constant 0 : index
    %13 = vector.load %arg4[%c0_8, %c0_9, %c0_10] : memref<1x1024x128xbf16, #tpu.memory_space<vmem>>, vector<1x1024x128xbf16>
    %14 = vector.shape_cast %13 : vector<1x1024x128xbf16> to vector<1024x128xbf16>
    %15 = vector.shape_cast %12 : vector<1024x128xbf16> to vector<1x1024x128xbf16>
    tpu.vector_store %arg4[%c0_8, %c0_9, %c0_10], %15 {strides = array<i32>} : memref<1x1024x128xbf16, #tpu.memory_space<vmem>>, vector<1x1024x128xbf16>,
    return
  }
  func.func @transform_0(%arg0: i32) -> (i32, i32, i32) {
    %c0_i32 = arith.constant 0 : i32
    %c0_i32_0 = arith.constant 0 : i32
    %c0_i32_1 = arith.constant 0 : i32
    return %arg0, %c0_i32, %c0_i32_0 : i32, i32, i32
  }
  func.func @transform_1(%arg0: i32) -> (i32, i32) {
    %c0_i32 = arith.constant 0 : i32
    %c0_i32_0 = arith.constant 0 : i32
    %c0_i32_1 = arith.constant 0 : i32
    return %c0_i32, %c0_i32_0 : i32, i32
  }
  func.func @transform_2(%arg0: i32) -> (i32, i32) {
    %c0_i32 = arith.constant 0 : i32
    %c0_i32_0 = arith.constant 0 : i32
    %c0_i32_1 = arith.constant 0 : i32
    return %c0_i32, %c0_i32_0 : i32, i32
  }
  func.func @transform_3(%arg0: i32) -> (i32, i32, i32) {
    %c0_i32 = arith.constant 0 : i32
    %c0_i32_0 = arith.constant 0 : i32
    %c0_i32_1 = arith.constant 0 : i32
    return %arg0, %c0_i32, %c0_i32_0 : i32, i32, i32
  }
}

module attributes {stable_mosaic.version = 11 : i64} {
  func.func @kernel(%arg0: i32, %arg1: memref<1x256x128xbf16, #tpu.memory_space<vmem>>, %arg2: memref<128x128xbf16, #tpu.memory_space<vmem>>, %arg3: memref<1x128xf32, #tpu.memory_space<vmem>>, %arg4: memref<1x128xf32, #tpu.memory_space<vmem>>, %arg5: memref<1x256x128xbf16, #tpu.memory_space<vmem>>) attributes {dimension_semantics = [#tpu.dimension_semantics<parallel>], iteration_bounds = array<i64: 2>, scalar_prefetch = 0 : i64, scratch_operands = 0 : i64, tpu.core_type = #tpu.core_type<tc>, window_params = [{transform_indices = @transform_0, window_bounds = array<i64: 1, 256, 128>}, {pipeline_mode = #tpu.pipeline_mode<synchronous>, transform_indices = @transform_1, window_bounds = array<i64: 128, 128>}, {pipeline_mode = #tpu.pipeline_mode<synchronous>, transform_indices = @transform_2, window_bounds = array<i64: 1, 128>}, {pipeline_mode = #tpu.pipeline_mode<synchronous>, transform_indices = @transform_3, window_bounds = array<i64: 1, 128>}, {transform_indices = @transform_4, window_bounds = array<i64: 1, 256, 128>}]} {
    %c0 = arith.constant 0 : index
    %c0_0 = arith.constant 0 : index
    %c0_1 = arith.constant 0 : index
    %0 = vector.load %arg1[%c0, %c0_0, %c0_1] : memref<1x256x128xbf16, #tpu.memory_space<vmem>>, vector<1x256x128xbf16>
    %1 = vector.shape_cast %0 : vector<1x256x128xbf16> to vector<256x128xbf16>
    %c0_2 = arith.constant 0 : index
    %c0_3 = arith.constant 0 : index
    %2 = vector.load %arg2[%c0_2, %c0_3] : memref<128x128xbf16, #tpu.memory_space<vmem>>, vector<128x128xbf16>
    %cst = arith.constant dense<0.000000e+00> : vector<256x128xf32>
    %3 = tpu.matmul %1, %2, %cst {dimension_numbers = #tpu.dot_dimension_numbers<[1], [0], [0], [1], [0, 0, 1, 1], [], []>} : vector<256x128xbf16>, vector<128x128xbf16>, vector<256x128xf32> -> vector<256x128xf32>
    %cst_4 = arith.constant dense<0.000000e+00> : vector<128xf32>
    %4 = vector.multi_reduction <add>, %3, %cst_4 [0] : vector<256x128xf32> to vector<128xf32>
    %5 = vector.shape_cast %4 : vector<128xf32> to vector<1x128xf32>
    %cst_5 = arith.constant 3.906250e-03 : f32
    %6 = vector.broadcast %cst_5 : f32 to vector<1x128xf32>
    %7 = arith.mulf %5, %6 : vector<1x128xf32>
    %8 = arith.mulf %3, %3 : vector<256x128xf32>
    %cst_6 = arith.constant dense<0.000000e+00> : vector<128xf32>
    %9 = vector.multi_reduction <add>, %8, %cst_6 [0] : vector<256x128xf32> to vector<128xf32>
    %10 = vector.shape_cast %9 : vector<128xf32> to vector<1x128xf32>
    %cst_7 = arith.constant 3.906250e-03 : f32
    %11 = vector.broadcast %cst_7 : f32 to vector<1x128xf32>
    %12 = arith.mulf %10, %11 : vector<1x128xf32>
    %13 = arith.mulf %7, %7 : vector<1x128xf32>
    %14 = arith.subf %12, %13 : vector<1x128xf32>
    %cst_8 = arith.constant 0.000000e+00 : f32
    %15 = vector.broadcast %cst_8 : f32 to vector<1x128xf32>
    %16 = arith.maximumf %14, %15 : vector<1x128xf32>
    %17 = vector.broadcast %7 : vector<1x128xf32> to vector<256x128xf32>
    %18 = arith.subf %3, %17 : vector<256x128xf32>
    %cst_9 = arith.constant 9.99999974E-6 : f32
    %19 = vector.broadcast %cst_9 : f32 to vector<1x128xf32>
    %20 = arith.addf %16, %19 : vector<1x128xf32>
    %21 = math.rsqrt %20 : vector<1x128xf32>
    %22 = vector.broadcast %21 : vector<1x128xf32> to vector<256x128xf32>
    %23 = arith.mulf %18, %22 : vector<256x128xf32>
    %c0_10 = arith.constant 0 : index
    %c0_11 = arith.constant 0 : index
    %24 = vector.load %arg3[%c0_10, %c0_11] : memref<1x128xf32, #tpu.memory_space<vmem>>, vector<1x128xf32>
    %25 = vector.broadcast %24 : vector<1x128xf32> to vector<256x128xf32>
    %26 = arith.mulf %23, %25 : vector<256x128xf32>
    %c0_12 = arith.constant 0 : index
    %c0_13 = arith.constant 0 : index
    %27 = vector.load %arg4[%c0_12, %c0_13] : memref<1x128xf32, #tpu.memory_space<vmem>>, vector<1x128xf32>
    %28 = vector.broadcast %27 : vector<1x128xf32> to vector<256x128xf32>
    %29 = arith.addf %26, %28 : vector<256x128xf32>
    %cst_14 = arith.constant 0.000000e+00 : f32
    %30 = vector.broadcast %cst_14 : f32 to vector<256x128xf32>
    %31 = arith.cmpf ogt, %29, %30 : vector<256x128xf32>
    %cst_15 = arith.constant 2.000000e-01 : f32
    %32 = vector.broadcast %cst_15 : f32 to vector<256x128xf32>
    %33 = arith.mulf %32, %29 : vector<256x128xf32>
    %34 = arith.select %31, %29, %33 : vector<256x128xi1>, vector<256x128xf32>
    %35 = arith.truncf %34 : vector<256x128xf32> to vector<256x128xbf16>
    %c0_16 = arith.constant 0 : index
    %c0_17 = arith.constant 0 : index
    %c0_18 = arith.constant 0 : index
    %36 = vector.load %arg5[%c0_16, %c0_17, %c0_18] : memref<1x256x128xbf16, #tpu.memory_space<vmem>>, vector<1x256x128xbf16>
    %37 = vector.shape_cast %36 : vector<1x256x128xbf16> to vector<256x128xbf16>
    %38 = vector.shape_cast %35 : vector<256x128xbf16> to vector<1x256x128xbf16>
    tpu.vector_store %arg5[%c0_16, %c0_17, %c0_18], %38 {strides = array<i32>} : memref<1x256x128xbf16, #tpu.memory_space<vmem>>, vector<1x256x128xbf16>,
    return
  }
  func.func @transform_0(%arg0: i32) -> (i32, i32, i32) {
    %c0_i32 = arith.constant 0 : i32
    %c0_i32_0 = arith.constant 0 : i32
    %c0_i32_1 = arith.constant 0 : i32
    return %arg0, %c0_i32, %c0_i32_0 : i32, i32, i32
  }
  func.func @transform_1(%arg0: i32) -> (i32, i32) {
    %c0_i32 = arith.constant 0 : i32
    %c0_i32_0 = arith.constant 0 : i32
    %c0_i32_1 = arith.constant 0 : i32
    return %c0_i32, %c0_i32_0 : i32, i32
  }
  func.func @transform_2(%arg0: i32) -> (i32, i32) {
    %c0_i32 = arith.constant 0 : i32
    %c0_i32_0 = arith.constant 0 : i32
    %c0_i32_1 = arith.constant 0 : i32
    return %c0_i32, %c0_i32_0 : i32, i32
  }
  func.func @transform_3(%arg0: i32) -> (i32, i32) {
    %c0_i32 = arith.constant 0 : i32
    %c0_i32_0 = arith.constant 0 : i32
    %c0_i32_1 = arith.constant 0 : i32
    return %c0_i32, %c0_i32_0 : i32, i32
  }
  func.func @transform_4(%arg0: i32) -> (i32, i32, i32) {
    %c0_i32 = arith.constant 0 : i32
    %c0_i32_0 = arith.constant 0 : i32
    %c0_i32_1 = arith.constant 0 : i32
    return %arg0, %c0_i32, %c0_i32_0 : i32, i32, i32
  }
}

module attributes {stable_mosaic.version = 11 : i64} {
  func.func @kernel(%arg0: i32, %arg1: memref<1x64x256xbf16, #tpu.memory_space<vmem>>, %arg2: memref<256x128xbf16, #tpu.memory_space<vmem>>, %arg3: memref<1x128xf32, #tpu.memory_space<vmem>>, %arg4: memref<1x128xf32, #tpu.memory_space<vmem>>, %arg5: memref<1x64x128xbf16, #tpu.memory_space<vmem>>) attributes {dimension_semantics = [#tpu.dimension_semantics<parallel>], iteration_bounds = array<i64: 2>, scalar_prefetch = 0 : i64, scratch_operands = 0 : i64, tpu.core_type = #tpu.core_type<tc>, window_params = [{transform_indices = @transform_0, window_bounds = array<i64: 1, 64, 256>}, {pipeline_mode = #tpu.pipeline_mode<synchronous>, transform_indices = @transform_1, window_bounds = array<i64: 256, 128>}, {pipeline_mode = #tpu.pipeline_mode<synchronous>, transform_indices = @transform_2, window_bounds = array<i64: 1, 128>}, {pipeline_mode = #tpu.pipeline_mode<synchronous>, transform_indices = @transform_3, window_bounds = array<i64: 1, 128>}, {transform_indices = @transform_4, window_bounds = array<i64: 1, 64, 128>}]} {
    %c0 = arith.constant 0 : index
    %c0_0 = arith.constant 0 : index
    %c0_1 = arith.constant 0 : index
    %0 = vector.load %arg1[%c0, %c0_0, %c0_1] : memref<1x64x256xbf16, #tpu.memory_space<vmem>>, vector<1x64x256xbf16>
    %1 = vector.shape_cast %0 : vector<1x64x256xbf16> to vector<64x256xbf16>
    %c0_2 = arith.constant 0 : index
    %c0_3 = arith.constant 0 : index
    %2 = vector.load %arg2[%c0_2, %c0_3] : memref<256x128xbf16, #tpu.memory_space<vmem>>, vector<256x128xbf16>
    %cst = arith.constant dense<0.000000e+00> : vector<64x128xf32>
    %3 = tpu.matmul %1, %2, %cst {dimension_numbers = #tpu.dot_dimension_numbers<[1], [0], [0], [1], [0, 0, 1, 1], [], []>} : vector<64x256xbf16>, vector<256x128xbf16>, vector<64x128xf32> -> vector<64x128xf32>
    %cst_4 = arith.constant dense<0.000000e+00> : vector<128xf32>
    %4 = vector.multi_reduction <add>, %3, %cst_4 [0] : vector<64x128xf32> to vector<128xf32>
    %5 = vector.shape_cast %4 : vector<128xf32> to vector<1x128xf32>
    %cst_5 = arith.constant 1.562500e-02 : f32
    %6 = vector.broadcast %cst_5 : f32 to vector<1x128xf32>
    %7 = arith.mulf %5, %6 : vector<1x128xf32>
    %8 = arith.mulf %3, %3 : vector<64x128xf32>
    %cst_6 = arith.constant dense<0.000000e+00> : vector<128xf32>
    %9 = vector.multi_reduction <add>, %8, %cst_6 [0] : vector<64x128xf32> to vector<128xf32>
    %10 = vector.shape_cast %9 : vector<128xf32> to vector<1x128xf32>
    %cst_7 = arith.constant 1.562500e-02 : f32
    %11 = vector.broadcast %cst_7 : f32 to vector<1x128xf32>
    %12 = arith.mulf %10, %11 : vector<1x128xf32>
    %13 = arith.mulf %7, %7 : vector<1x128xf32>
    %14 = arith.subf %12, %13 : vector<1x128xf32>
    %cst_8 = arith.constant 0.000000e+00 : f32
    %15 = vector.broadcast %cst_8 : f32 to vector<1x128xf32>
    %16 = arith.maximumf %14, %15 : vector<1x128xf32>
    %17 = vector.broadcast %7 : vector<1x128xf32> to vector<64x128xf32>
    %18 = arith.subf %3, %17 : vector<64x128xf32>
    %cst_9 = arith.constant 9.99999974E-6 : f32
    %19 = vector.broadcast %cst_9 : f32 to vector<1x128xf32>
    %20 = arith.addf %16, %19 : vector<1x128xf32>
    %21 = math.rsqrt %20 : vector<1x128xf32>
    %22 = vector.broadcast %21 : vector<1x128xf32> to vector<64x128xf32>
    %23 = arith.mulf %18, %22 : vector<64x128xf32>
    %c0_10 = arith.constant 0 : index
    %c0_11 = arith.constant 0 : index
    %24 = vector.load %arg3[%c0_10, %c0_11] : memref<1x128xf32, #tpu.memory_space<vmem>>, vector<1x128xf32>
    %25 = vector.broadcast %24 : vector<1x128xf32> to vector<64x128xf32>
    %26 = arith.mulf %23, %25 : vector<64x128xf32>
    %c0_12 = arith.constant 0 : index
    %c0_13 = arith.constant 0 : index
    %27 = vector.load %arg4[%c0_12, %c0_13] : memref<1x128xf32, #tpu.memory_space<vmem>>, vector<1x128xf32>
    %28 = vector.broadcast %27 : vector<1x128xf32> to vector<64x128xf32>
    %29 = arith.addf %26, %28 : vector<64x128xf32>
    %cst_14 = arith.constant 0.000000e+00 : f32
    %30 = vector.broadcast %cst_14 : f32 to vector<64x128xf32>
    %31 = arith.cmpf ogt, %29, %30 : vector<64x128xf32>
    %cst_15 = arith.constant 2.000000e-01 : f32
    %32 = vector.broadcast %cst_15 : f32 to vector<64x128xf32>
    %33 = arith.mulf %32, %29 : vector<64x128xf32>
    %34 = arith.select %31, %29, %33 : vector<64x128xi1>, vector<64x128xf32>
    %35 = arith.truncf %34 : vector<64x128xf32> to vector<64x128xbf16>
    %c0_16 = arith.constant 0 : index
    %c0_17 = arith.constant 0 : index
    %c0_18 = arith.constant 0 : index
    %36 = vector.load %arg5[%c0_16, %c0_17, %c0_18] : memref<1x64x128xbf16, #tpu.memory_space<vmem>>, vector<1x64x128xbf16>
    %37 = vector.shape_cast %36 : vector<1x64x128xbf16> to vector<64x128xbf16>
    %38 = vector.shape_cast %35 : vector<64x128xbf16> to vector<1x64x128xbf16>
    tpu.vector_store %arg5[%c0_16, %c0_17, %c0_18], %38 {strides = array<i32>} : memref<1x64x128xbf16, #tpu.memory_space<vmem>>, vector<1x64x128xbf16>,
    return
  }
  func.func @transform_0(%arg0: i32) -> (i32, i32, i32) {
    %c0_i32 = arith.constant 0 : i32
    %c0_i32_0 = arith.constant 0 : i32
    %c0_i32_1 = arith.constant 0 : i32
    return %arg0, %c0_i32, %c0_i32_0 : i32, i32, i32
  }
  func.func @transform_1(%arg0: i32) -> (i32, i32) {
    %c0_i32 = arith.constant 0 : i32
    %c0_i32_0 = arith.constant 0 : i32
    %c0_i32_1 = arith.constant 0 : i32
    return %c0_i32, %c0_i32_0 : i32, i32
  }
  func.func @transform_2(%arg0: i32) -> (i32, i32) {
    %c0_i32 = arith.constant 0 : i32
    %c0_i32_0 = arith.constant 0 : i32
    %c0_i32_1 = arith.constant 0 : i32
    return %c0_i32, %c0_i32_0 : i32, i32
  }
  func.func @transform_3(%arg0: i32) -> (i32, i32) {
    %c0_i32 = arith.constant 0 : i32
    %c0_i32_0 = arith.constant 0 : i32
    %c0_i32_1 = arith.constant 0 : i32
    return %c0_i32, %c0_i32_0 : i32, i32
  }
  func.func @transform_4(%arg0: i32) -> (i32, i32, i32) {
    %c0_i32 = arith.constant 0 : i32
    %c0_i32_0 = arith.constant 0 : i32
    %c0_i32_1 = arith.constant 0 : i32
    return %arg0, %c0_i32, %c0_i32_0 : i32, i32, i32
  }
}

module attributes {stable_mosaic.version = 11 : i64} {
  func.func @kernel(%arg0: i32, %arg1: memref<1x16x512xbf16, #tpu.memory_space<vmem>>, %arg2: memref<512x128xbf16, #tpu.memory_space<vmem>>, %arg3: memref<1x128xf32, #tpu.memory_space<vmem>>, %arg4: memref<1x128xf32, #tpu.memory_space<vmem>>, %arg5: memref<16x128xf32, #tpu.memory_space<vmem>>, %arg6: memref<1x1xf32, #tpu.memory_space<vmem>>, %arg7: memref<1x1x1xf32, #tpu.memory_space<vmem>>) attributes {dimension_semantics = [#tpu.dimension_semantics<parallel>], iteration_bounds = array<i64: 2>, scalar_prefetch = 0 : i64, scratch_operands = 0 : i64, tpu.core_type = #tpu.core_type<tc>, window_params = [{transform_indices = @transform_0, window_bounds = array<i64: 1, 16, 512>}, {pipeline_mode = #tpu.pipeline_mode<synchronous>, transform_indices = @transform_1, window_bounds = array<i64: 512, 128>}, {pipeline_mode = #tpu.pipeline_mode<synchronous>, transform_indices = @transform_2, window_bounds = array<i64: 1, 128>}, {pipeline_mode = #tpu.pipeline_mode<synchronous>, transform_indices = @transform_3, window_bounds = array<i64: 1, 128>}, {pipeline_mode = #tpu.pipeline_mode<synchronous>, transform_indices = @transform_4, window_bounds = array<i64: 16, 128>}, {pipeline_mode = #tpu.pipeline_mode<synchronous>, transform_indices = @transform_5, window_bounds = array<i64: 1, 1>}, {transform_indices = @transform_6, window_bounds = array<i64: 1, 1, 1>}]} {
    %c0 = arith.constant 0 : index
    %c0_0 = arith.constant 0 : index
    %c0_1 = arith.constant 0 : index
    %0 = vector.load %arg1[%c0, %c0_0, %c0_1] : memref<1x16x512xbf16, #tpu.memory_space<vmem>>, vector<1x16x512xbf16>
    %1 = vector.shape_cast %0 : vector<1x16x512xbf16> to vector<16x512xbf16>
    %c0_2 = arith.constant 0 : index
    %c0_3 = arith.constant 0 : index
    %2 = vector.load %arg2[%c0_2, %c0_3] : memref<512x128xbf16, #tpu.memory_space<vmem>>, vector<512x128xbf16>
    %cst = arith.constant dense<0.000000e+00> : vector<16x128xf32>
    %3 = tpu.matmul %1, %2, %cst {dimension_numbers = #tpu.dot_dimension_numbers<[1], [0], [0], [1], [0, 0, 1, 1], [], []>} : vector<16x512xbf16>, vector<512x128xbf16>, vector<16x128xf32> -> vector<16x128xf32>
    %cst_4 = arith.constant dense<0.000000e+00> : vector<128xf32>
    %4 = vector.multi_reduction <add>, %3, %cst_4 [0] : vector<16x128xf32> to vector<128xf32>
    %5 = vector.shape_cast %4 : vector<128xf32> to vector<1x128xf32>
    %cst_5 = arith.constant 6.250000e-02 : f32
    %6 = vector.broadcast %cst_5 : f32 to vector<1x128xf32>
    %7 = arith.mulf %5, %6 : vector<1x128xf32>
    %8 = arith.mulf %3, %3 : vector<16x128xf32>
    %cst_6 = arith.constant dense<0.000000e+00> : vector<128xf32>
    %9 = vector.multi_reduction <add>, %8, %cst_6 [0] : vector<16x128xf32> to vector<128xf32>
    %10 = vector.shape_cast %9 : vector<128xf32> to vector<1x128xf32>
    %cst_7 = arith.constant 6.250000e-02 : f32
    %11 = vector.broadcast %cst_7 : f32 to vector<1x128xf32>
    %12 = arith.mulf %10, %11 : vector<1x128xf32>
    %13 = arith.mulf %7, %7 : vector<1x128xf32>
    %14 = arith.subf %12, %13 : vector<1x128xf32>
    %cst_8 = arith.constant 0.000000e+00 : f32
    %15 = vector.broadcast %cst_8 : f32 to vector<1x128xf32>
    %16 = arith.maximumf %14, %15 : vector<1x128xf32>
    %17 = vector.broadcast %7 : vector<1x128xf32> to vector<16x128xf32>
    %18 = arith.subf %3, %17 : vector<16x128xf32>
    %cst_9 = arith.constant 9.99999974E-6 : f32
    %19 = vector.broadcast %cst_9 : f32 to vector<1x128xf32>
    %20 = arith.addf %16, %19 : vector<1x128xf32>
    %21 = math.rsqrt %20 : vector<1x128xf32>
    %22 = vector.broadcast %21 : vector<1x128xf32> to vector<16x128xf32>
    %23 = arith.mulf %18, %22 : vector<16x128xf32>
    %c0_10 = arith.constant 0 : index
    %c0_11 = arith.constant 0 : index
    %24 = vector.load %arg3[%c0_10, %c0_11] : memref<1x128xf32, #tpu.memory_space<vmem>>, vector<1x128xf32>
    %25 = vector.broadcast %24 : vector<1x128xf32> to vector<16x128xf32>
    %26 = arith.mulf %23, %25 : vector<16x128xf32>
    %c0_12 = arith.constant 0 : index
    %c0_13 = arith.constant 0 : index
    %27 = vector.load %arg4[%c0_12, %c0_13] : memref<1x128xf32, #tpu.memory_space<vmem>>, vector<1x128xf32>
    %28 = vector.broadcast %27 : vector<1x128xf32> to vector<16x128xf32>
    %29 = arith.addf %26, %28 : vector<16x128xf32>
    %cst_14 = arith.constant 0.000000e+00 : f32
    %30 = vector.broadcast %cst_14 : f32 to vector<16x128xf32>
    %31 = arith.cmpf ogt, %29, %30 : vector<16x128xf32>
    %cst_15 = arith.constant 2.000000e-01 : f32
    %32 = vector.broadcast %cst_15 : f32 to vector<16x128xf32>
    %33 = arith.mulf %32, %29 : vector<16x128xf32>
    %34 = arith.select %31, %29, %33 : vector<16x128xi1>, vector<16x128xf32>
    %c0_16 = arith.constant 0 : index
    %c0_17 = arith.constant 0 : index
    %35 = vector.load %arg5[%c0_16, %c0_17] : memref<16x128xf32, #tpu.memory_space<vmem>>, vector<16x128xf32>
    %36 = arith.mulf %34, %35 : vector<16x128xf32>
    %cst_18 = arith.constant dense<0.000000e+00> : vector<16xf32>
    %37 = vector.multi_reduction <add>, %36, %cst_18 [1] : vector<16x128xf32> to vector<16xf32>
    %38 = vector.shape_cast %37 : vector<16xf32> to vector<16x1xf32>
    %cst_19 = arith.constant dense<0.000000e+00> : vector<1xf32>
    %39 = vector.multi_reduction <add>, %38, %cst_19 [0] : vector<16x1xf32> to vector<1xf32>
    %40 = vector.shape_cast %39 : vector<1xf32> to vector<1x1xf32>
    %c0_20 = arith.constant 0 : index
    %c0_21 = arith.constant 0 : index
    %41 = vector.load %arg6[%c0_20, %c0_21] : memref<1x1xf32, #tpu.memory_space<vmem>>, vector<1x1xf32>
    %42 = arith.addf %40, %41 : vector<1x1xf32>
    %c0_22 = arith.constant 0 : index
    %c0_23 = arith.constant 0 : index
    %c0_24 = arith.constant 0 : index
    %43 = vector.load %arg7[%c0_22, %c0_23, %c0_24] : memref<1x1x1xf32, #tpu.memory_space<vmem>>, vector<1x1x1xf32>
    %44 = vector.shape_cast %43 : vector<1x1x1xf32> to vector<1x1xf32>
    %45 = vector.shape_cast %42 : vector<1x1xf32> to vector<1x1x1xf32>
    tpu.vector_store %arg7[%c0_22, %c0_23, %c0_24], %45 {strides = array<i32>} : memref<1x1x1xf32, #tpu.memory_space<vmem>>, vector<1x1x1xf32>,
    return
  }
  func.func @transform_0(%arg0: i32) -> (i32, i32, i32) {
    %c0_i32 = arith.constant 0 : i32
    %c0_i32_0 = arith.constant 0 : i32
    %c0_i32_1 = arith.constant 0 : i32
    return %arg0, %c0_i32, %c0_i32_0 : i32, i32, i32
  }
  func.func @transform_1(%arg0: i32) -> (i32, i32) {
    %c0_i32 = arith.constant 0 : i32
    %c0_i32_0 = arith.constant 0 : i32
    %c0_i32_1 = arith.constant 0 : i32
    return %c0_i32, %c0_i32_0 : i32, i32
  }
  func.func @transform_2(%arg0: i32) -> (i32, i32) {
    %c0_i32 = arith.constant 0 : i32
    %c0_i32_0 = arith.constant 0 : i32
    %c0_i32_1 = arith.constant 0 : i32
    return %c0_i32, %c0_i32_0 : i32, i32
  }
  func.func @transform_3(%arg0: i32) -> (i32, i32) {
    %c0_i32 = arith.constant 0 : i32
    %c0_i32_0 = arith.constant 0 : i32
    %c0_i32_1 = arith.constant 0 : i32
    return %c0_i32, %c0_i32_0 : i32, i32
  }
  func.func @transform_4(%arg0: i32) -> (i32, i32) {
    %c0_i32 = arith.constant 0 : i32
    %c0_i32_0 = arith.constant 0 : i32
    %c0_i32_1 = arith.constant 0 : i32
    return %c0_i32, %c0_i32_0 : i32, i32
  }
  func.func @transform_5(%arg0: i32) -> (i32, i32) {
    %c0_i32 = arith.constant 0 : i32
    %c0_i32_0 = arith.constant 0 : i32
    %c0_i32_1 = arith.constant 0 : i32
    return %c0_i32, %c0_i32_0 : i32, i32
  }
  func.func @transform_6(%arg0: i32) -> (i32, i32, i32) {
    %c0_i32 = arith.constant 0 : i32
    %c0_i32_0 = arith.constant 0 : i32
    %c0_i32_1 = arith.constant 0 : i32
    return %arg0, %c0_i32, %c0_i32_0 : i32, i32, i32
  }
}

</mosaic_0001>

<bundles_post_ra>
// kernel: discriminator_forward.4
= control target key start
LH: loop header
LB: loop body
LE: loop exit
PB: predicated region body
PF: predicated region fallthrough
CT: control target
= control target key end

     0   :  { %s3445_s12 = smov 0   ;;  %s3898_s0 = inlined_call_operand.vmem [shape: bf16[2,1024,128], index: 0, kind: input, shape index: {}]   ;;  %s3899_s1 = inlined_call_operand.vmem [shape: bf16[128,128], index: 1, kind: input, shape index: {}]   ;;  %s3900_s2 = inlined_call_operand.vmem [shape: f32[1,128], index: 2, kind: input, shape index: {}]   ;;  %s3901_s3 = inlined_call_operand.vmem [shape: bf16[2,1024,128], index: 3, kind: output, shape index: {}]  }
   0x1 LB: > { %s2379_s13 = sadd.s32 4294967295, %s3423_s12   ;;  %p2383_p0 = scmp.ge.s32.totalorder %s3423_s12, 1  ;;  %s3423_s12 = sphi %s3445_s12, %s13_s12  }
   0x2   : > { %p137_p1 = scmp.lt.s32.totalorder %s3423_s12, 3 }
   0x4   : > { %p138_p2 = pnand %p2383_p0, %p137_p1 }
   0x5   : > { %v3344_v0 = vld [vmem:[%s3899_s1] sm:$0xff] (!%p138_p2)   ;;  %p161_p3 = scmp.lt.s32.totalorder (!%p138_p2), %s2379_s13, 1  ;;  %v3345_v1 = vld [vmem:[%s3899_s1 + $0x8] sm:$0xff] (!%p138_p2)   ;;  %v3346_v2 = vld [vmem:[%s3899_s1 + $0x10] sm:$0xff] (!%p138_p2)  }
   0x6   : > { %141 = sbr.rel (%p138_p2) target bundleno = 399 (0x18f), region = 32  ;;  %3176 = vmatprep.subr.bf16.mxu0 (!%p138_p2), %v3344_v0  ;;  %3320 = vmatprep.subr.bf16.mxu1 (!%p138_p2), %v3344_v0  ;;  %v3347_v3 = vld [vmem:[%s3899_s1 + $0x18] sm:$0xff] (!%p138_p2)   ;;  %v3348_v6 = vld [vmem:[%s3899_s1 + $0x20] sm:$0xff] (!%p138_p2)   ;;  %v3349_v7 = vld [vmem:[%s3899_s1 + $0x28] sm:$0xff] (!%p138_p2)  }
   0x7   : > { %3177 = vmatpush3.bf16.msra.mxu0 (!%p138_p2), %v3344_v0  ;;  %3328 = vmatpush3.bf16.msra.mxu1 (!%p138_p2), %v3344_v0  ;;  %v3350_v8 = vld [vmem:[%s3899_s1 + $0x30] sm:$0xff] (!%p138_p2)   ;;  %v3351_v9 = vld [vmem:[%s3899_s1 + $0x38] sm:$0xff] (!%p138_p2)  }
   0x8   : > { %3178 = vmatprep.subr.bf16.mxu0 (!%p138_p2), %v3345_v1  ;;  %3321 = vmatprep.subr.bf16.mxu1 (!%p138_p2), %v3345_v1 }
   0xb   : > { %3179 = vmatpush3.bf16.msra.mxu0 (!%p138_p2), %v3345_v1  ;;  %3329 = vmatpush3.bf16.msra.mxu1 (!%p138_p2), %v3345_v1 }
   0xc   : > { %3180 = vmatprep.subr.bf16.mxu0 (!%p138_p2), %v3346_v2  ;;  %3322 = vmatprep.subr.bf16.mxu1 (!%p138_p2), %v3346_v2 }
   0xd   : > { %s3903_s13 = smov (!%p161_p3, %s2379_s13), 1 }
   0xe   : > { %s2591_s20 = sshll.u32 %s3903_s13, 9 }
   0xf   : > { %s3470_s23 = scalar_lea.vmem %s3898_s0, %s2591_s20  ;;  %3181 = vmatpush3.bf16.msra.mxu0 %v3346_v2  ;;  %3330 = vmatpush3.bf16.msra.mxu1 %v3346_v2  ;;  %s3571_s11 = scalar_lea.vmem %s3901_s3, %s2591_s20 }
  0x10   : > { %v3352_v4 = vld [vmem:[%s3470_s23] sm:$0xff]   ;;  %3182 = vmatprep.subr.bf16.mxu0 %v3347_v3  ;;  %3323 = vmatprep.subr.bf16.mxu1 %v3347_v3  ;;  %v3354_v10 = vld [vmem:[%s3470_s23 + $0x8] sm:$0xff]   ;;  %v3356_v12 = vld [vmem:[%s3470_s23 + $0x10] sm:$0xff]  }
  0x11   : > { %v3353_v5 = vld [vmem:[%s3470_s23 + $0x100] sm:$0xff]   ;;  %3192 = vmatprep.mubr.bf16.mxu0 %v3352_v4  ;;  %v3355_v11 = vld [vmem:[%s3470_s23 + $0x108] sm:$0xff]   ;;  %v3357_v13 = vld [vmem:[%s3470_s23 + $0x110] sm:$0xff]  }
  0x12   : > { %3256 = vmatprep.mubr.bf16.mxu1 %v3353_v5  ;;  %v3358_v14 = vld [vmem:[%s3470_s23 + $0x18] sm:$0xff]   ;;  %v3360_v16 = vld [vmem:[%s3470_s23 + $0x20] sm:$0xff]   ;;  %v3362_v18 = vld [vmem:[%s3470_s23 + $0x28] sm:$0xff]  }
  0x13   : > { %3183 = vmatpush3.bf16.msra.mxu0 %v3347_v3  ;;  %3331 = vmatpush3.bf16.msra.mxu1 %v3347_v3  ;;  %v3359_v15 = vld [vmem:[%s3470_s23 + $0x118] sm:$0xff]   ;;  %v3361_v17 = vld [vmem:[%s3470_s23 + $0x120] sm:$0xff]   ;;  %v3363_v19 = vld [vmem:[%s3470_s23 + $0x128] sm:$0xff]  }
  0x14   : > { %3184 = vmatprep.subr.bf16.mxu0 %v3348_v6  ;;  %3324 = vmatprep.subr.bf16.mxu1 %v3348_v6  ;;  %v3364_v20 = vld [vmem:[%s3470_s23 + $0x30] sm:$0xff]   ;;  %v3366_v22 = vld [vmem:[%s3470_s23 + $0x38] sm:$0xff]   ;;  %v3368_v24 = vld [vmem:[%s3470_s23 + $0x40] sm:$0xff]  }
  0x15   : > { %v3365_v21 = vld [vmem:[%s3470_s23 + $0x130] sm:$0xff]   ;;  %v3367_v23 = vld [vmem:[%s3470_s23 + $0x138] sm:$0xff]   ;;  %v3369_v25 = vld [vmem:[%s3470_s23 + $0x140] sm:$0xff]  }
  0x16   : > { %v3370_v26 = vld [vmem:[%s3470_s23 + $0x48] sm:$0xff]   ;;  %v3372_v28 = vld [vmem:[%s3470_s23 + $0x50] sm:$0xff]   ;;  %v3374_v30 = vld [vmem:[%s3470_s23 + $0x58] sm:$0xff]  }
  0x17   : > { %3185 = vmatpush3.bf16.msra.mxu0 %v3348_v6  ;;  %3332 = vmatpush3.bf16.msra.mxu1 %v3348_v6  ;;  %v3371_v27 = vld [vmem:[%s3470_s23 + $0x148] sm:$0xff]   ;;  %v3373_v29 = vld [vmem:[%s3470_s23 + $0x150] sm:$0xff]   ;;  %v3375_v31 = vld [vmem:[%s3470_s23 + $0x158] sm:$0xff]  }
  0x18   : > { %3186 = vmatprep.subr.bf16.mxu0 %v3349_v7  ;;  %3325 = vmatprep.subr.bf16.mxu1 %v3349_v7  ;;  %v3376_v32 = vld [vmem:[%s3470_s23 + $0x60] sm:$0xff]   ;;  %v3378_v34 = vld [vmem:[%s3470_s23 + $0x68] sm:$0xff]   ;;  %v3380_v36 = vld [vmem:[%s3470_s23 + $0x70] sm:$0xff]  }
  0x19   : > { %v3377_v33 = vld [vmem:[%s3470_s23 + $0x160] sm:$0xff]   ;;  %v3379_v35 = vld [vmem:[%s3470_s23 + $0x168] sm:$0xff]   ;;  %v3381_v37 = vld [vmem:[%s3470_s23 + $0x170] sm:$0xff]  }
  0x1a   : > { %v3382_v38 = vld [vmem:[%s3470_s23 + $0x78] sm:$0xff]   ;;  %v3384_v40 = vld [vmem:[%s3470_s23 + $0x80] sm:$0xff]   ;;  %v3386_v42 = vld [vmem:[%s3470_s23 + $0x88] sm:$0xff]  }
  0x1b   : > { %3187 = vmatpush3.bf16.msra.mxu0 %v3349_v7  ;;  %3333 = vmatpush3.bf16.msra.mxu1 %v3349_v7  ;;  %v3383_v39 = vld [vmem:[%s3470_s23 + $0x178] sm:$0xff]   ;;  %v3385_v41 = vld [vmem:[%s3470_s23 + $0x180] sm:$0xff]   ;;  %v3387_v43 = vld [vmem:[%s3470_s23 + $0x188] sm:$0xff]  }
  0x1c   : > { %3188 = vmatprep.subr.bf16.mxu0 %v3350_v8  ;;  %3326 = vmatprep.subr.bf16.mxu1 %v3350_v8  ;;  %v3388_v44 = vld [vmem:[%s3470_s23 + $0x90] sm:$0xff]   ;;  %v3390_v46 = vld [vmem:[%s3470_s23 + $0x98] sm:$0xff]   ;;  %v3392_v48 = vld [vmem:[%s3470_s23 + $0xa0] sm:$0xff]  }
  0x1d   : > { %v3389_v45 = vld [vmem:[%s3470_s23 + $0x190] sm:$0xff]   ;;  %v3391_v47 = vld [vmem:[%s3470_s23 + $0x198] sm:$0xff]   ;;  %v3393_v49 = vld [vmem:[%s3470_s23 + $0x1a0] sm:$0xff]  }
  0x1e   : > { %v3394_v50 = vld [vmem:[%s3470_s23 + $0xa8] sm:$0xff]   ;;  %v3396_v52 = vld [vmem:[%s3470_s23 + $0xb0] sm:$0xff]   ;;  %v3398_v54 = vld [vmem:[%s3470_s23 + $0xb8] sm:$0xff]  }
  0x1f   : > { %3189 = vmatpush3.bf16.msra.mxu0 %v3350_v8  ;;  %3334 = vmatpush3.bf16.msra.mxu1 %v3350_v8  ;;  %v3395_v51 = vld [vmem:[%s3470_s23 + $0x1a8] sm:$0xff]   ;;  %v3397_v53 = vld [vmem:[%s3470_s23 + $0x1b0] sm:$0xff]   ;;  %v3399_v55 = vld [vmem:[%s3470_s23 + $0x1b8] sm:$0xff]  }
  0x20   : > { %3190 = vmatprep.subr.bf16.mxu0 %v3351_v9  ;;  %3327 = vmatprep.subr.bf16.mxu1 %v3351_v9  ;;  %v3400_v56 = vld [vmem:[%s3470_s23 + $0xc0] sm:$0xff]   ;;  %v3402_v58 = vld [vmem:[%s3470_s23 + $0xc8] sm:$0xff]   ;;  %v3404_v60 = vld [vmem:[%s3470_s23 + $0xd0] sm:$0xff]  }
  0x21   : > { %v3401_v57 = vld [vmem:[%s3470_s23 + $0x1c0] sm:$0xff]   ;;  %v3403_v59 = vld [vmem:[%s3470_s23 + $0x1c8] sm:$0xff]   ;;  %v3405_v61 = vld [vmem:[%s3470_s23 + $0x1d0] sm:$0xff]  }
  0x22   : > { %v3406_v62 = vld [vmem:[%s3470_s23 + $0xd8] sm:$0xff]   ;;  %v3408_v0 = vld [vmem:[%s3470_s23 + $0xe0] sm:$0xff]   ;;  %v3410_v2 = vld [vmem:[%s3470_s23 + $0xe8] sm:$0xff]  }
  0x23   : > { %3191 = vmatpush3.bf16.msra.mxu0 %v3351_v9  ;;  %3335 = vmatpush3.bf16.msra.mxu1 %v3351_v9  ;;  %v3407_v63 = vld [vmem:[%s3470_s23 + $0x1d8] sm:$0xff]   ;;  %v3409_v1 = vld [vmem:[%s3470_s23 + $0x1e0] sm:$0xff]   ;;  %v3411_v3 = vld [vmem:[%s3470_s23 + $0x1e8] sm:$0xff]  }
  0x24   : > { %v3412_v4 = vld [vmem:[%s3470_s23 + $0xf0] sm:$0xff]   ;;  %v3414_v6 = vld [vmem:[%s3470_s23 + $0xf8] sm:$0xff]   ;;  %v3554_v8 = vld [vmem:[%s3900_s2] ss:$0 sm:$0xff] }
  0x25   : > { %v3413_v5 = vld [vmem:[%s3470_s23 + $0x1f0] sm:$0xff]   ;;  %v3415_v7 = vld [vmem:[%s3470_s23 + $0x1f8] sm:$0xff]  }
  0x26   : > { %3193 = vmatmul.mubr.bf16.vlgmr.msra.gmra.mrb[0].mxu0 %v3354_v10  ;;  %3257 = vmatmul.mubr.bf16.vlgmr.msra.gmra.mrb[0].mxu1 %v3355_v11 }
  0x27   : > { %3196 = vmatprep.mubr.bf16.mxu0 %v3356_v12  ;;  %3260 = vmatprep.mubr.bf16.mxu1 %v3357_v13 }
  0x2e   : > { %3197 = vmatmul.mubr.bf16.gmra.mrb[4].mxu0 %v3358_v14  ;;  %3261 = vmatmul.mubr.bf16.gmra.mrb[4].mxu1 %v3359_v15 }
  0x2f   : > { %3200 = vmatprep.mubr.bf16.mxu0 %v3360_v16  ;;  %3264 = vmatprep.mubr.bf16.mxu1 %v3361_v17 }
  0x36   : > { %3201 = vmatmul.mubr.bf16.gmra.mrb[8].mxu0 %v3362_v18  ;;  %3265 = vmatmul.mubr.bf16.gmra.mrb[8].mxu1 %v3363_v19 }
  0x37   : > { %3204 = vmatprep.mubr.bf16.mxu0 %v3364_v20  ;;  %3268 = vmatprep.mubr.bf16.mxu1 %v3365_v21 }
  0x3e   : > { %3205 = vmatmul.mubr.bf16.gmra.mrb[12].mxu0 %v3366_v22  ;;  %3269 = vmatmul.mubr.bf16.gmra.mrb[12].mxu1 %v3367_v23 }
  0x3f   : > { %3208 = vmatprep.mubr.bf16.mxu0 %v3368_v24  ;;  %3272 = vmatprep.mubr.bf16.mxu1 %v3369_v25 }
  0x46   : > { %3209 = vmatmul.mubr.bf16.gmra.mrb[16].mxu0 %v3370_v26  ;;  %3273 = vmatmul.mubr.bf16.gmra.mrb[16].mxu1 %v3371_v27 }
  0x47   : > { %3212 = vmatprep.mubr.bf16.mxu0 %v3372_v28  ;;  %3276 = vmatprep.mubr.bf16.mxu1 %v3373_v29 }
  0x4e   : > { %3213 = vmatmul.mubr.bf16.gmra.mrb[20].mxu0 %v3374_v30  ;;  %3277 = vmatmul.mubr.bf16.gmra.mrb[20].mxu1 %v3375_v31 }
  0x4f   : > { %3216 = vmatprep.mubr.bf16.mxu0 %v3376_v32  ;;  %3280 = vmatprep.mubr.bf16.mxu1 %v3377_v33 }
  0x56   : > { %3217 = vmatmul.mubr.bf16.gmra.mrb[24].mxu0 %v3378_v34  ;;  %3281 = vmatmul.mubr.bf16.gmra.mrb[24].mxu1 %v3379_v35 }
  0x57   : > { %3220 = vmatprep.mubr.bf16.mxu0 %v3380_v36  ;;  %3284 = vmatprep.mubr.bf16.mxu1 %v3381_v37 }
  0x5e   : > { %3221 = vmatmul.mubr.bf16.gmra.mrb[28].mxu0 %v3382_v38  ;;  %3285 = vmatmul.mubr.bf16.gmra.mrb[28].mxu1 %v3383_v39 }
  0x5f   : > { %3224 = vmatprep.mubr.bf16.mxu0 %v3384_v40  ;;  %3288 = vmatprep.mubr.bf16.mxu1 %v3385_v41 }
  0x66   : > { %3225 = vmatmul.mubr.bf16.gmra.mrb[32].mxu0 %v3386_v42  ;;  %3289 = vmatmul.mubr.bf16.gmra.mrb[32].mxu1 %v3387_v43 }
  0x67   : > { %3228 = vmatprep.mubr.bf16.mxu0 %v3388_v44  ;;  %3292 = vmatprep.mubr.bf16.mxu1 %v3389_v45 }
  0x6e   : > { %3229 = vmatmul.mubr.bf16.gmra.mrb[36].mxu0 %v3390_v46  ;;  %3293 = vmatmul.mubr.bf16.gmra.mrb[36].mxu1 %v3391_v47 }
  0x6f   : > { %3232 = vmatprep.mubr.bf16.mxu0 %v3392_v48  ;;  %3296 = vmatprep.mubr.bf16.mxu1 %v3393_v49 }
  0x76   : > { %3233 = vmatmul.mubr.bf16.gmra.mrb[40].mxu0 %v3394_v50  ;;  %3297 = vmatmul.mubr.bf16.gmra.mrb[40].mxu1 %v3395_v51 }
  0x77   : > { %3236 = vmatprep.mubr.bf16.mxu0 %v3396_v52  ;;  %3300 = vmatprep.mubr.bf16.mxu1 %v3397_v53 }
  0x7e   : > { %3237 = vmatmul.mubr.bf16.gmra.mrb[44].mxu0 %v3398_v54  ;;  %3301 = vmatmul.mubr.bf16.gmra.mrb[44].mxu1 %v3399_v55 }
  0x7f   : > { %3240 = vmatprep.mubr.bf16.mxu0 %v3400_v56  ;;  %3304 = vmatprep.mubr.bf16.mxu1 %v3401_v57 }
  0x86   : > { %3241 = vmatmul.mubr.bf16.gmra.mrb[48].mxu0 %v3402_v58  ;;  %3305 = vmatmul.mubr.bf16.gmra.mrb[48].mxu1 %v3403_v59 }
  0x87   : > { %3244 = vmatprep.mubr.bf16.mxu0 %v3404_v60  ;;  %3308 = vmatprep.mubr.bf16.mxu1 %v3405_v61 }
  0x8e   : > { %3245 = vmatmul.mubr.bf16.gmra.mrb[52].mxu0 %v3406_v62  ;;  %3309 = vmatmul.mubr.bf16.gmra.mrb[52].mxu1 %v3407_v63 }
  0x8f   : > { %3248 = vmatprep.mubr.bf16.mxu0 %v3408_v0  ;;  %3312 = vmatprep.mubr.bf16.mxu1 %v3409_v1 }
  0x96   : > { %3249 = vmatmul.mubr.bf16.gmra.mrb[56].mxu0 %v3410_v2  ;;  %3313 = vmatmul.mubr.bf16.gmra.mrb[56].mxu1 %v3411_v3 }
  0x97   : > { %3252 = vmatprep.mubr.bf16.mxu0 %v3412_v4  ;;  %3316 = vmatprep.mubr.bf16.mxu1 %v3413_v5 }
  0x9e   : > { %3253 = vmatmul.mubr.bf16.gmra.mrb[60].mxu0 %v3414_v6  ;;  %3317 = vmatmul.mubr.bf16.gmra.mrb[60].mxu1 %v3415_v7 }
  0xf9   : > { %v3194_v9 = vpop.f32.mrb[0].mxu0  ;;  %v3258_v10 = vpop.f32.mrb[0].mxu1 }
  0xfa   : > { %v798_v11 = vadd.f32 %v3194_v9, %v3554_v8  ;;  %v1054_v12 = vadd.f32 %v3258_v10, %v3554_v8  ;;  %v789_v13 = vpop.f32.mrb[1].mxu0  ;;  %v1045_v14 = vpop.f32.mrb[1].mxu1 }
  0xfb   : > { %v790_v15 = vadd.f32 %v3554_v8, %v789_v13  ;;  %v1046_v16 = vadd.f32 %v3554_v8, %v1045_v14  ;;  %v3195_v17 = vpop.f32.mrb[2].mxu0  ;;  %v3259_v18 = vpop.f32.mrb[2].mxu1 }
  0xfc   : > { %vm1302_vm0 = vcmp.gt.f32.partialorder %v798_v11, 0.0  ;;  %v1430_v19 = vmul.f32 0.2, %v798_v11  ;;  %vm1366_vm1 = vcmp.gt.f32.partialorder %v1054_v12, 0.0  ;;  %v1494_v20 = vmul.f32 0.2, %v1054_v12 }
  0xfd   : > { %vm1300_vm2 = vcmp.gt.f32.partialorder %v790_v15, 0.0  ;;  %v1428_v21 = vmul.f32 0.2, %v790_v15  ;;  %vm1364_vm3 = vcmp.gt.f32.partialorder %v1046_v16, 0.0  ;;  %v1492_v22 = vmul.f32 0.2, %v1046_v16 }
  0xfe   : > { %v801_v23 = vadd.f32 %v3195_v17, %v3554_v8  ;;  %v1057_v24 = vadd.f32 %v3259_v18, %v3554_v8  ;;  %v792_v25 = vpop.f32.mrb[3].mxu0  ;;  %v1048_v26 = vpop.f32.mrb[3].mxu1  ;;  %v1558_v27 = vsel %vm1302_vm0, %v798_v11, %v1430_v19  ;;  %v1622_v28 = vsel %vm1366_vm1, %v1054_v12, %v1494_v20 }
  0xff   : > { %v793_v29 = vadd.f32 %v3554_v8, %v792_v25  ;;  %v1049_v30 = vadd.f32 %v3554_v8, %v1048_v26  ;;  %v1556_v35 = vsel %vm1300_vm2, %v790_v15, %v1428_v21  ;;  %v1620_v36 = vsel %vm1364_vm3, %v1046_v16, %v1492_v22 }
 0x100   : > { %vm1303_vm4 = vcmp.gt.f32.partialorder %v801_v23, 0.0  ;;  %v1431_v31 = vmul.f32 0.2, %v801_v23  ;;  %vm1367_vm5 = vcmp.gt.f32.partialorder %v1057_v24, 0.0  ;;  %v1495_v32 = vmul.f32 0.2, %v1057_v24 }
 0x101   : > { %vm1301_vm6 = vcmp.gt.f32.partialorder %v793_v29, 0.0  ;;  %v1429_v33 = vmul.f32 0.2, %v793_v29  ;;  %vm1365_vm7 = vcmp.gt.f32.partialorder %v1049_v30, 0.0  ;;  %v1493_v34 = vmul.f32 0.2, %v1049_v30 }
 0x102   : > { %v1559_v37 = vsel %vm1303_vm4, %v801_v23, %v1431_v31  ;;  %v1623_v38 = vsel %vm1367_vm5, %v1057_v24, %v1495_v32  ;;  %v3198_v39 = vpop.f32.mrb[4].mxu0  ;;  %v3262_v40 = vpop.f32.mrb[4].mxu1 }
 0x103   : > { %v2729_v41 = vpack.c.bf16 %v1559_v37, %v1558_v27  ;;  %v2889_v42 = vpack.c.bf16 %v1623_v38, %v1622_v28  ;;  %v1557_v43 = vsel %vm1301_vm6, %v793_v29, %v1429_v33  ;;  %v1621_v44 = vsel %vm1365_vm7, %v1049_v30, %v1493_v34  ;;  %v805_v45 = vpop.f32.mrb[5].mxu0  ;;  %v1061_v46 = vpop.f32.mrb[5].mxu1 }
 0x104   : > { %v2724_v47 = vpack.c.bf16 %v1557_v43, %v1556_v35  ;;  %v2884_v48 = vpack.c.bf16 %v1621_v44, %v1620_v36  ;;  %v814_v49 = vadd.f32 %v3198_v39, %v3554_v8  ;;  %v1070_v50 = vadd.f32 %v3262_v40, %v3554_v8  ;;  %v3199_v51 = vpop.f32.mrb[6].mxu0  ;;  %v3263_v52 = vpop.f32.mrb[6].mxu1 }
 0x105   : > { %3041 = vst [vmem:[%s3571_s11 + $0x8] sm:$0xff] %v2729_v41   ;;  %3073 = vst [vmem:[%s3571_s11 + $0x108] sm:$0xff] %v2889_v42   ;;  %v806_v53 = vadd.f32 %v3554_v8, %v805_v45  ;;  %v1062_v54 = vadd.f32 %v3554_v8, %v1061_v46  ;;  %v817_v55 = vadd.f32 %v3199_v51, %v3554_v8  ;;  %v808_v57 = vpop.f32.mrb[7].mxu0  ;;  %v1064_v58 = vpop.f32.mrb[7].mxu1 }
 0x106   : > { %v1073_v56 = vadd.f32 %v3263_v52, %v3554_v8  ;;  %2725 = vst [vmem:[%s3571_s11] sm:$0xff] %v2724_v47   ;;  %3072 = vst [vmem:[%s3571_s11 + $0x100] sm:$0xff] %v2884_v48   ;;  %vm1306_vm8 = vcmp.gt.f32.partialorder %v814_v49, 0.0  ;;  %v1434_v59 = vmul.f32 0.2, %v814_v49  ;;  %vm1370_vm9 = vcmp.gt.f32.partialorder %v1070_v50, 0.0 }
 0x107   : > { %v1498_v60 = vmul.f32 0.2, %v1070_v50  ;;  %vm1304_vm10 = vcmp.gt.f32.partialorder %v806_v53, 0.0  ;;  %v1432_v61 = vmul.f32 0.2, %v806_v53  ;;  %vm1368_vm11 = vcmp.gt.f32.partialorder %v1062_v54, 0.0 }
 0x108   : > { %v1496_v62 = vmul.f32 0.2, %v1062_v54  ;;  %v1562_v63 = vsel %vm1306_vm8, %v814_v49, %v1434_v59  ;;  %vm1307_vm12 = vcmp.gt.f32.partialorder %v817_v55, 0.0  ;;  %v1435_v1 = vmul.f32 0.2, %v817_v55 }
 0x109   : > { %v1626_v0 = vsel %vm1370_vm9, %v1070_v50, %v1498_v60  ;;  %v1560_v2 = vsel %vm1304_vm10, %v806_v53, %v1432_v61  ;;  %vm1371_vm13 = vcmp.gt.f32.partialorder %v1073_v56, 0.0  ;;  %v1499_v4 = vmul.f32 0.2, %v1073_v56  ;;  %v3202_v5 = vpop.f32.mrb[8].mxu0  ;;  %v3266_v6 = vpop.f32.mrb[8].mxu1 }
 0x10a   : > { %v1624_v3 = vsel %vm1368_vm11, %v1062_v54, %v1496_v62  ;;  %v1563_v7 = vsel %vm1307_vm12, %v817_v55, %v1435_v1  ;;  %v809_v9 = vadd.f32 %v3554_v8, %v808_v57  ;;  %v1065_v10 = vadd.f32 %v3554_v8, %v1064_v58  ;;  %v821_v12 = vpop.f32.mrb[9].mxu0  ;;  %v1077_v13 = vpop.f32.mrb[9].mxu1 }
 0x10b   : > { %v830_v11 = vadd.f32 %v3202_v5, %v3554_v8  ;;  %v2739_v14 = vpack.c.bf16 %v1563_v7, %v1562_v63  ;;  %v1627_v15 = vsel %vm1371_vm13, %v1073_v56, %v1499_v4  ;;  %v1086_v16 = vadd.f32 %v3266_v6, %v3554_v8  ;;  %v3203_v18 = vpop.f32.mrb[10].mxu0  ;;  %v3267_v19 = vpop.f32.mrb[10].mxu1 }
 0x10c   : > { %v822_v17 = vadd.f32 %v3554_v8, %v821_v12  ;;  %v2899_v20 = vpack.c.bf16 %v1627_v15, %v1626_v0  ;;  %vm1305_vm14 = vcmp.gt.f32.partialorder %v809_v9, 0.0  ;;  %v1433_v21 = vmul.f32 0.2, %v809_v9  ;;  %v824_v22 = vpop.f32.mrb[11].mxu0  ;;  %v1080_v23 = vpop.f32.mrb[11].mxu1 }
 0x10d   : > { %vm1369_vm15 = vcmp.gt.f32.partialorder %v1065_v10, 0.0  ;;  %3043 = vst [vmem:[%s3571_s11 + $0x18] sm:$0xff] %v2739_v14   ;;  %v1497_v24 = vmul.f32 0.2, %v1065_v10  ;;  %vm1310_vm0 = vcmp.gt.f32.partialorder %v830_v11, 0.0  ;;  %vm1374_vm1 = vcmp.gt.f32.partialorder %v1086_v16, 0.0 }
 0x10e   : > { %v1438_v25 = vmul.f32 0.2, %v830_v11  ;;  %3075 = vst [vmem:[%s3571_s11 + $0x118] sm:$0xff] %v2899_v20   ;;  %v1561_v26 = vsel %vm1305_vm14, %v809_v9, %v1433_v21  ;;  %v1502_v27 = vmul.f32 0.2, %v1086_v16  ;;  %vm1308_vm2 = vcmp.gt.f32.partialorder %v822_v17, 0.0 }
 0x10f   : > { %v1436_v28 = vmul.f32 0.2, %v822_v17  ;;  %v2734_v29 = vpack.c.bf16 %v1561_v26, %v1560_v2  ;;  %v1625_v30 = vsel %vm1369_vm15, %v1065_v10, %v1497_v24  ;;  %v1078_v32 = vadd.f32 %v3554_v8, %v1077_v13 }
 0x110   : > { %v1566_v31 = vsel %vm1310_vm0, %v830_v11, %v1438_v25  ;;  %v2894_v33 = vpack.c.bf16 %v1625_v30, %v1624_v3  ;;  %v1630_v34 = vsel %vm1374_vm1, %v1086_v16, %v1502_v27  ;;  %v833_v36 = vadd.f32 %v3203_v18, %v3554_v8 }
 0x111   : > { %v1564_v35 = vsel %vm1308_vm2, %v822_v17, %v1436_v28  ;;  %3042 = vst [vmem:[%s3571_s11 + $0x10] sm:$0xff] %v2734_v29   ;;  %vm1372_vm3 = vcmp.gt.f32.partialorder %v1078_v32, 0.0  ;;  %v1500_v37 = vmul.f32 0.2, %v1078_v32  ;;  %v1089_v38 = vadd.f32 %v3267_v19, %v3554_v8  ;;  %v3206_v40 = vpop.f32.mrb[12].mxu0  ;;  %v3270_v41 = vpop.f32.mrb[12].mxu1 }
 0x112   : > { %v825_v39 = vadd.f32 %v3554_v8, %v824_v22  ;;  %3074 = vst [vmem:[%s3571_s11 + $0x110] sm:$0xff] %v2894_v33   ;;  %vm1311_vm4 = vcmp.gt.f32.partialorder %v833_v36, 0.0  ;;  %v1439_v42 = vmul.f32 0.2, %v833_v36  ;;  %v1081_v43 = vadd.f32 %v3554_v8, %v1080_v23  ;;  %v837_v45 = vpop.f32.mrb[13].mxu0  ;;  %v1093_v46 = vpop.f32.mrb[13].mxu1 }
 0x113   : > { %v846_v44 = vadd.f32 %v3206_v40, %v3554_v8  ;;  %v1628_v47 = vsel %vm1372_vm3, %v1078_v32, %v1500_v37  ;;  %vm1375_vm5 = vcmp.gt.f32.partialorder %v1089_v38, 0.0  ;;  %v1503_v48 = vmul.f32 0.2, %v1089_v38  ;;  %v3207_v49 = vpop.f32.mrb[14].mxu0  ;;  %v3271_v50 = vpop.f32.mrb[14].mxu1 }
 0x114   : > { %vm1309_vm6 = vcmp.gt.f32.partialorder %v825_v39, 0.0  ;;  %v1567_v51 = vsel %vm1311_vm4, %v833_v36, %v1439_v42  ;;  %v1437_v52 = vmul.f32 0.2, %v825_v39  ;;  %vm1373_vm7 = vcmp.gt.f32.partialorder %v1081_v43, 0.0  ;;  %v840_v54 = vpop.f32.mrb[15].mxu0  ;;  %v1096_v58 = vpop.f32.mrb[15].mxu1 }
 0x115   : > { %v1501_v53 = vmul.f32 0.2, %v1081_v43  ;;  %v2749_v55 = vpack.c.bf16 %v1567_v51, %v1566_v31  ;;  %v1631_v56 = vsel %vm1375_vm5, %v1089_v38, %v1503_v48  ;;  %vm1314_vm8 = vcmp.gt.f32.partialorder %v846_v44, 0.0 }
 0x116   : > { %v1442_v57 = vmul.f32 0.2, %v846_v44  ;;  %v2909_v59 = vpack.c.bf16 %v1631_v56, %v1630_v34  ;;  %v1565_v60 = vsel %vm1309_vm6, %v825_v39, %v1437_v52  ;;  %v1102_v62 = vadd.f32 %v3270_v41, %v3554_v8 }
 0x117   : > { %v1629_v61 = vsel %vm1373_vm7, %v1081_v43, %v1501_v53  ;;  %3045 = vst [vmem:[%s3571_s11 + $0x28] sm:$0xff] %v2749_v55   ;;  %v2744_v63 = vpack.c.bf16 %v1565_v60, %v1564_v35  ;;  %v838_v2 = vadd.f32 %v3554_v8, %v837_v45  ;;  %v1094_v4 = vadd.f32 %v3554_v8, %v1093_v46 }
 0x118   : > { %v2904_v0 = vpack.c.bf16 %v1629_v61, %v1628_v47  ;;  %v1570_v1 = vsel %vm1314_vm8, %v846_v44, %v1442_v57  ;;  %3077 = vst [vmem:[%s3571_s11 + $0x128] sm:$0xff] %v2909_v59   ;;  %vm1378_vm9 = vcmp.gt.f32.partialorder %v1102_v62, 0.0  ;;  %v1506_v3 = vmul.f32 0.2, %v1102_v62 }
 0x119   : > { %v849_v5 = vadd.f32 %v3207_v49, %v3554_v8  ;;  %3044 = vst [vmem:[%s3571_s11 + $0x20] sm:$0xff] %v2744_v63   ;;  %vm1312_vm10 = vcmp.gt.f32.partialorder %v838_v2, 0.0  ;;  %v1440_v6 = vmul.f32 0.2, %v838_v2  ;;  %v1105_v7 = vadd.f32 %v3271_v50, %v3554_v8  ;;  %v3210_v10 = vpop.f32.mrb[16].mxu0  ;;  %v3274_v11 = vpop.f32.mrb[16].mxu1 }
 0x11a   : > { %3076 = vst [vmem:[%s3571_s11 + $0x120] sm:$0xff] %v2904_v0   ;;  %v841_v9 = vadd.f32 %v3554_v8, %v840_v54  ;;  %v1634_v12 = vsel %vm1378_vm9, %v1102_v62, %v1506_v3  ;;  %vm1376_vm11 = vcmp.gt.f32.partialorder %v1094_v4, 0.0  ;;  %v1504_v13 = vmul.f32 0.2, %v1094_v4  ;;  %v853_v14 = vpop.f32.mrb[17].mxu0  ;;  %v1109_v15 = vpop.f32.mrb[17].mxu1 }
 0x11b   : > { %vm1315_vm12 = vcmp.gt.f32.partialorder %v849_v5, 0.0  ;;  %v1568_v16 = vsel %vm1312_vm10, %v838_v2, %v1440_v6  ;;  %v1443_v17 = vmul.f32 0.2, %v849_v5  ;;  %vm1379_vm13 = vcmp.gt.f32.partialorder %v1105_v7, 0.0  ;;  %v3211_v19 = vpop.f32.mrb[18].mxu0  ;;  %v3275_v23 = vpop.f32.mrb[18].mxu1 }
 0x11c   : > { %v1507_v18 = vmul.f32 0.2, %v1105_v7  ;;  %v1632_v20 = vsel %vm1376_vm11, %v1094_v4, %v1504_v13  ;;  %vm1313_vm14 = vcmp.gt.f32.partialorder %v841_v9, 0.0  ;;  %v1441_v21 = vmul.f32 0.2, %v841_v9  ;;  %v856_v24 = vpop.f32.mrb[19].mxu0 }
 0x11d   : > { %v1097_v22 = vadd.f32 %v3554_v8, %v1096_v58  ;;  %v1571_v25 = vsel %vm1315_vm12, %v849_v5, %v1443_v17  ;;  %v862_v27 = vadd.f32 %v3210_v10, %v3554_v8  ;;  %v1118_v28 = vadd.f32 %v3274_v11, %v3554_v8  ;;  %v1112_v29 = vpop.f32.mrb[19].mxu1 }
 0x11e   : > { %v1635_v26 = vsel %vm1379_vm13, %v1105_v7, %v1507_v18  ;;  %v2759_v30 = vpack.c.bf16 %v1571_v25, %v1570_v1  ;;  %v1569_v32 = vsel %vm1313_vm14, %v841_v9, %v1441_v21  ;;  %v854_v37 = vadd.f32 %v3554_v8, %v853_v14 }
 0x11f   : > { %v2919_v31 = vpack.c.bf16 %v1635_v26, %v1634_v12  ;;  %vm1377_vm15 = vcmp.gt.f32.partialorder %v1097_v22, 0.0  ;;  %v2754_v33 = vpack.c.bf16 %v1569_v32, %v1568_v16  ;;  %v1505_v34 = vmul.f32 0.2, %v1097_v22 }
 0x120   : > { %vm1318_vm0 = vcmp.gt.f32.partialorder %v862_v27, 0.0  ;;  %v1446_v35 = vmul.f32 0.2, %v862_v27  ;;  %3047 = vst [vmem:[%s3571_s11 + $0x38] sm:$0xff] %v2759_v30   ;;  %vm1382_vm1 = vcmp.gt.f32.partialorder %v1118_v28, 0.0  ;;  %v1110_v38 = vadd.f32 %v3554_v8, %v1109_v15 }
 0x121   : > { %3079 = vst [vmem:[%s3571_s11 + $0x138] sm:$0xff] %v2919_v31   ;;  %v1510_v36 = vmul.f32 0.2, %v1118_v28  ;;  %3046 = vst [vmem:[%s3571_s11 + $0x30] sm:$0xff] %v2754_v33   ;;  %v1633_v39 = vsel %vm1377_vm15, %v1097_v22, %v1505_v34  ;;  %v865_v41 = vadd.f32 %v3211_v19, %v3554_v8  ;;  %v1121_v42 = vadd.f32 %v3275_v23, %v3554_v8  ;;  %v3214_v43 = vpop.f32.mrb[20].mxu0  ;;  %v3278_v44 = vpop.f32.mrb[20].mxu1 }
 0x122   : > { %v1574_v40 = vsel %vm1318_vm0, %v862_v27, %v1446_v35  ;;  %v2914_v45 = vpack.c.bf16 %v1633_v39, %v1632_v20  ;;  %vm1316_vm2 = vcmp.gt.f32.partialorder %v854_v37, 0.0  ;;  %v1444_v47 = vmul.f32 0.2, %v854_v37  ;;  %v869_v48 = vpop.f32.mrb[21].mxu0  ;;  %v1125_v49 = vpop.f32.mrb[21].mxu1 }
 0x123   : > { %v1638_v46 = vsel %vm1382_vm1, %v1118_v28, %v1510_v36  ;;  %vm1380_vm3 = vcmp.gt.f32.partialorder %v1110_v38, 0.0  ;;  %v1508_v50 = vmul.f32 0.2, %v1110_v38  ;;  %vm1319_vm4 = vcmp.gt.f32.partialorder %v865_v41, 0.0  ;;  %v3215_v55 = vpop.f32.mrb[22].mxu0  ;;  %v3279_v56 = vpop.f32.mrb[22].mxu1 }
 0x124   : > { %v1447_v51 = vmul.f32 0.2, %v865_v41  ;;  %3078 = vst [vmem:[%s3571_s11 + $0x130] sm:$0xff] %v2914_v45   ;;  %v1572_v52 = vsel %vm1316_vm2, %v854_v37, %v1444_v47  ;;  %vm1383_vm5 = vcmp.gt.f32.partialorder %v1121_v42, 0.0  ;;  %v1511_v53 = vmul.f32 0.2, %v1121_v42 }
 0x125   : > { %v857_v54 = vadd.f32 %v3554_v8, %v856_v24  ;;  %v1636_v57 = vsel %vm1380_vm3, %v1110_v38, %v1508_v50  ;;  %v1113_v59 = vadd.f32 %v3554_v8, %v1112_v29  ;;  %v878_v60 = vadd.f32 %v3214_v43, %v3554_v8  ;;  %v872_v61 = vpop.f32.mrb[23].mxu0  ;;  %v1128_v62 = vpop.f32.mrb[23].mxu1 }
 0x126   : > { %v1575_v58 = vsel %vm1319_vm4, %v865_v41, %v1447_v51  ;;  %v1639_v0 = vsel %vm1383_vm5, %v1121_v42, %v1511_v53  ;;  %v1134_v6 = vadd.f32 %v3278_v44, %v3554_v8  ;;  %v870_v7 = vadd.f32 %v3554_v8, %v869_v48 }
 0x127   : > { %v2769_v63 = vpack.c.bf16 %v1575_v58, %v1574_v40  ;;  %vm1317_vm6 = vcmp.gt.f32.partialorder %v857_v54, 0.0  ;;  %v1445_v1 = vmul.f32 0.2, %v857_v54  ;;  %v2929_v2 = vpack.c.bf16 %v1639_v0, %v1638_v46 }
 0x128   : > { %vm1381_vm7 = vcmp.gt.f32.partialorder %v1113_v59, 0.0  ;;  %v1509_v3 = vmul.f32 0.2, %v1113_v59  ;;  %vm1322_vm8 = vcmp.gt.f32.partialorder %v878_v60, 0.0  ;;  %v1450_v5 = vmul.f32 0.2, %v878_v60 }
 0x129   : > { %3049 = vst [vmem:[%s3571_s11 + $0x48] sm:$0xff] %v2769_v63   ;;  %v1573_v4 = vsel %vm1317_vm6, %v857_v54, %v1445_v1  ;;  %3081 = vst [vmem:[%s3571_s11 + $0x148] sm:$0xff] %v2929_v2   ;;  %v1126_v11 = vadd.f32 %v3554_v8, %v1125_v49  ;;  %v881_v12 = vadd.f32 %v3215_v55, %v3554_v8  ;;  %v3218_v13 = vpop.f32.mrb[24].mxu0  ;;  %v3282_v14 = vpop.f32.mrb[24].mxu1  ;;  %vm1386_vm9 = vcmp.gt.f32.partialorder %v1134_v6, 0.0 }
 0x12a   : > { %v2764_v9 = vpack.c.bf16 %v1573_v4, %v1572_v52  ;;  %v1637_v10 = vsel %vm1381_vm7, %v1113_v59, %v1509_v3  ;;  %v1578_v16 = vsel %vm1322_vm8, %v878_v60, %v1450_v5  ;;  %v1514_v17 = vmul.f32 0.2, %v1134_v6  ;;  %v885_v18 = vpop.f32.mrb[25].mxu0  ;;  %v1141_v19 = vpop.f32.mrb[25].mxu1 }
 0x12b   : > { %v2924_v15 = vpack.c.bf16 %v1637_v10, %v1636_v57  ;;  %vm1320_vm10 = vcmp.gt.f32.partialorder %v870_v7, 0.0  ;;  %v1448_v20 = vmul.f32 0.2, %v870_v7  ;;  %vm1384_vm11 = vcmp.gt.f32.partialorder %v1126_v11, 0.0  ;;  %v3219_v25 = vpop.f32.mrb[26].mxu0  ;;  %v3283_v26 = vpop.f32.mrb[26].mxu1 }
 0x12c   : > { %3048 = vst [vmem:[%s3571_s11 + $0x40] sm:$0xff] %v2764_v9   ;;  %v1512_v21 = vmul.f32 0.2, %v1126_v11  ;;  %v1642_v22 = vsel %vm1386_vm9, %v1134_v6, %v1514_v17  ;;  %vm1323_vm12 = vcmp.gt.f32.partialorder %v881_v12, 0.0  ;;  %v1451_v23 = vmul.f32 0.2, %v881_v12 }
 0x12d   : > { %3080 = vst [vmem:[%s3571_s11 + $0x140] sm:$0xff] %v2924_v15   ;;  %v1137_v24 = vadd.f32 %v3279_v56, %v3554_v8  ;;  %v1576_v27 = vsel %vm1320_vm10, %v870_v7, %v1448_v20  ;;  %v873_v29 = vadd.f32 %v3554_v8, %v872_v61  ;;  %v1129_v30 = vadd.f32 %v3554_v8, %v1128_v62  ;;  %v888_v31 = vpop.f32.mrb[27].mxu0  ;;  %v1144_v32 = vpop.f32.mrb[27].mxu1 }
 0x12e   : > { %v1640_v28 = vsel %vm1384_vm11, %v1126_v11, %v1512_v21  ;;  %v1579_v33 = vsel %vm1323_vm12, %v881_v12, %v1451_v23  ;;  %v894_v35 = vadd.f32 %v3218_v13, %v3554_v8  ;;  %v1150_v43 = vadd.f32 %v3282_v14, %v3554_v8 }
 0x12f   : > { %vm1387_vm13 = vcmp.gt.f32.partialorder %v1137_v24, 0.0  ;;  %v1515_v34 = vmul.f32 0.2, %v1137_v24  ;;  %v2779_v36 = vpack.c.bf16 %v1579_v33, %v1578_v16  ;;  %vm1321_vm14 = vcmp.gt.f32.partialorder %v873_v29, 0.0 }
 0x130   : > { %v1449_v37 = vmul.f32 0.2, %v873_v29  ;;  %vm1385_vm15 = vcmp.gt.f32.partialorder %v1129_v30, 0.0  ;;  %v1513_v39 = vmul.f32 0.2, %v1129_v30  ;;  %vm1326_vm0 = vcmp.gt.f32.partialorder %v894_v35, 0.0 }
 0x131   : > { %v1643_v38 = vsel %vm1387_vm13, %v1137_v24, %v1515_v34  ;;  %v1454_v40 = vmul.f32 0.2, %v894_v35  ;;  %3051 = vst [vmem:[%s3571_s11 + $0x58] sm:$0xff] %v2779_v36   ;;  %v886_v44 = vadd.f32 %v3554_v8, %v885_v18  ;;  %v3222_v45 = vpop.f32.mrb[28].mxu0  ;;  %v3286_v46 = vpop.f32.mrb[28].mxu1  ;;  %v1142_v50 = vadd.f32 %v3554_v8, %v1141_v19 }
 0x132   : > { %v2939_v41 = vpack.c.bf16 %v1643_v38, %v1642_v22  ;;  %v1577_v42 = vsel %vm1321_vm14, %v873_v29, %v1449_v37  ;;  %v1641_v48 = vsel %vm1385_vm15, %v1129_v30, %v1513_v39  ;;  %v901_v51 = vpop.f32.mrb[29].mxu0  ;;  %v1157_v52 = vpop.f32.mrb[29].mxu1  ;;  %vm1390_vm1 = vcmp.gt.f32.partialorder %v1150_v43, 0.0 }
 0x133   : > { %v2774_v47 = vpack.c.bf16 %v1577_v42, %v1576_v27  ;;  %v1582_v49 = vsel %vm1326_vm0, %v894_v35, %v1454_v40  ;;  %v2934_v53 = vpack.c.bf16 %v1641_v48, %v1640_v28  ;;  %v1518_v54 = vmul.f32 0.2, %v1150_v43  ;;  %v3223_v55 = vpop.f32.mrb[30].mxu0  ;;  %v3287_v56 = vpop.f32.mrb[30].mxu1 }
 0x134   : > { %3083 = vst [vmem:[%s3571_s11 + $0x158] sm:$0xff] %v2939_v41   ;;  %vm1324_vm2 = vcmp.gt.f32.partialorder %v886_v44, 0.0  ;;  %v1452_v57 = vmul.f32 0.2, %v886_v44  ;;  %vm1388_vm3 = vcmp.gt.f32.partialorder %v1142_v50, 0.0  ;;  %v897_v59 = vadd.f32 %v3219_v25, %v3554_v8  ;;  %v904_v60 = vpop.f32.mrb[31].mxu0 }
 0x135   : > { %3050 = vst [vmem:[%s3571_s11 + $0x50] sm:$0xff] %v2774_v47   ;;  %v1516_v58 = vmul.f32 0.2, %v1142_v50  ;;  %3082 = vst [vmem:[%s3571_s11 + $0x150] sm:$0xff] %v2934_v53   ;;  %v1646_v61 = vsel %vm1390_vm1, %v1150_v43, %v1518_v54  ;;  %v1153_v62 = vadd.f32 %v3283_v26, %v3554_v8  ;;  %v889_v63 = vadd.f32 %v3554_v8, %v888_v31  ;;  %v1160_v1 = vpop.f32.mrb[31].mxu1 }
 0x136   : > { %v1145_v0 = vadd.f32 %v3554_v8, %v1144_v32  ;;  %v1580_v2 = vsel %vm1324_vm2, %v886_v44, %v1452_v57  ;;  %vm1327_vm4 = vcmp.gt.f32.partialorder %v897_v59, 0.0  ;;  %v1455_v4 = vmul.f32 0.2, %v897_v59 }
 0x137   : > { %v1644_v3 = vsel %vm1388_vm3, %v1142_v50, %v1516_v58  ;;  %vm1391_vm5 = vcmp.gt.f32.partialorder %v1153_v62, 0.0  ;;  %v1519_v5 = vmul.f32 0.2, %v1153_v62  ;;  %vm1325_vm6 = vcmp.gt.f32.partialorder %v889_v63, 0.0 }
 0x138   : > { %v1453_v6 = vmul.f32 0.2, %v889_v63  ;;  %v1583_v7 = vsel %vm1327_vm4, %v897_v59, %v1455_v4  ;;  %vm1389_vm7 = vcmp.gt.f32.partialorder %v1145_v0, 0.0  ;;  %v1517_v9 = vmul.f32 0.2, %v1145_v0 }
 0x139   : > { %v910_v10 = vadd.f32 %v3222_v45, %v3554_v8  ;;  %v2789_v11 = vpack.c.bf16 %v1583_v7, %v1582_v49  ;;  %v1647_v12 = vsel %vm1391_vm5, %v1153_v62, %v1519_v5  ;;  %v1166_v14 = vadd.f32 %v3286_v46, %v3554_v8  ;;  %v3226_v15 = vpop.f32.mrb[32].mxu0  ;;  %v3290_v16 = vpop.f32.mrb[32].mxu1 }
 0x13a   : > { %v1581_v13 = vsel %vm1325_vm6, %v889_v63, %v1453_v6  ;;  %v2949_v17 = vpack.c.bf16 %v1647_v12, %v1646_v61  ;;  %v1645_v19 = vsel %vm1389_vm7, %v1145_v0, %v1517_v9  ;;  %v917_v20 = vpop.f32.mrb[33].mxu0  ;;  %v1173_v21 = vpop.f32.mrb[33].mxu1  ;;  %v902_v26 = vadd.f32 %v3554_v8, %v901_v51 }
 0x13b   : > { %v2784_v18 = vpack.c.bf16 %v1581_v13, %v1580_v2  ;;  %vm1330_vm8 = vcmp.gt.f32.partialorder %v910_v10, 0.0  ;;  %3053 = vst [vmem:[%s3571_s11 + $0x68] sm:$0xff] %v2789_v11   ;;  %v2944_v22 = vpack.c.bf16 %v1645_v19, %v1644_v3  ;;  %v1458_v23 = vmul.f32 0.2, %v910_v10  ;;  %v3227_v25 = vpop.f32.mrb[34].mxu0  ;;  %v3291_v30 = vpop.f32.mrb[34].mxu1 }
 0x13c   : > { %vm1394_vm9 = vcmp.gt.f32.partialorder %v1166_v14, 0.0  ;;  %v1522_v24 = vmul.f32 0.2, %v1166_v14  ;;  %3085 = vst [vmem:[%s3571_s11 + $0x168] sm:$0xff] %v2949_v17   ;;  %v1158_v27 = vadd.f32 %v3554_v8, %v1157_v52  ;;  %v913_v28 = vadd.f32 %v3223_v55, %v3554_v8  ;;  %v920_v31 = vpop.f32.mrb[35].mxu0  ;;  %v1176_v36 = vpop.f32.mrb[35].mxu1 }
 0x13d   : > { %3052 = vst [vmem:[%s3571_s11 + $0x60] sm:$0xff] %v2784_v18   ;;  %v1169_v29 = vadd.f32 %v3287_v56, %v3554_v8  ;;  %3084 = vst [vmem:[%s3571_s11 + $0x160] sm:$0xff] %v2944_v22   ;;  %v1586_v32 = vsel %vm1330_vm8, %v910_v10, %v1458_v23  ;;  %v905_v34 = vadd.f32 %v3554_v8, %v904_v60  ;;  %vm1328_vm10 = vcmp.gt.f32.partialorder %v902_v26, 0.0 }
 0x13e   : > { %v1650_v33 = vsel %vm1394_vm9, %v1166_v14, %v1522_v24  ;;  %v1161_v35 = vadd.f32 %v3554_v8, %v1160_v1  ;;  %v1456_v37 = vmul.f32 0.2, %v902_v26  ;;  %vm1392_vm11 = vcmp.gt.f32.partialorder %v1158_v27, 0.0 }
 0x13f   : > { %v1520_v38 = vmul.f32 0.2, %v1158_v27  ;;  %vm1331_vm12 = vcmp.gt.f32.partialorder %v913_v28, 0.0  ;;  %v1459_v39 = vmul.f32 0.2, %v913_v28  ;;  %vm1395_vm13 = vcmp.gt.f32.partialorder %v1169_v29, 0.0 }
 0x140   : > { %v1523_v40 = vmul.f32 0.2, %v1169_v29  ;;  %v1584_v41 = vsel %vm1328_vm10, %v902_v26, %v1456_v37  ;;  %vm1329_vm14 = vcmp.gt.f32.partialorder %v905_v34, 0.0  ;;  %v1457_v43 = vmul.f32 0.2, %v905_v34 }
 0x141   : > { %v1648_v42 = vsel %vm1392_vm11, %v1158_v27, %v1520_v38  ;;  %v1587_v44 = vsel %vm1331_vm12, %v913_v28, %v1459_v39  ;;  %vm1393_vm15 = vcmp.gt.f32.partialorder %v1161_v35, 0.0  ;;  %v1521_v46 = vmul.f32 0.2, %v1161_v35  ;;  %v3230_v47 = vpop.f32.mrb[36].mxu0  ;;  %v3294_v48 = vpop.f32.mrb[36].mxu1 }
 0x142   : > { %v1651_v45 = vsel %vm1395_vm13, %v1169_v29, %v1523_v40  ;;  %v2799_v49 = vpack.c.bf16 %v1587_v44, %v1586_v32  ;;  %v1585_v51 = vsel %vm1329_vm14, %v905_v34, %v1457_v43  ;;  %v926_v52 = vadd.f32 %v3226_v15, %v3554_v8  ;;  %v3659_v53 = vpop.f32.mrb[37].mxu0  ;;  %v3661_v54 = vpop.f32.mrb[37].mxu1 }
 0x143   : > { %v2959_v50 = vpack.c.bf16 %v1651_v45, %v1650_v33  ;;  %v2794_v55 = vpack.c.bf16 %v1585_v51, %v1584_v41  ;;  %v1649_v56 = vsel %vm1393_vm15, %v1161_v35, %v1521_v46  ;;  %v1182_v57 = vadd.f32 %v3290_v16, %v3554_v8  ;;  %v3231_v59 = vpop.f32.mrb[38].mxu0  ;;  %v3295_v60 = vpop.f32.mrb[38].mxu1 }
 0x144   : > { %v918_v58 = vadd.f32 %v3554_v8, %v917_v20  ;;  %3055 = vst [vmem:[%s3571_s11 + $0x78] sm:$0xff] %v2799_v49   ;;  %v2954_v61 = vpack.c.bf16 %v1649_v56, %v1648_v42  ;;  %vm1334_vm0 = vcmp.gt.f32.partialorder %v926_v52, 0.0  ;;  %v1462_v62 = vmul.f32 0.2, %v926_v52  ;;  %v936_v0 = vpop.f32.mrb[39].mxu0  ;;  %v1192_v1 = vpop.f32.mrb[39].mxu1 }
 0x145   : > { %3087 = vst [vmem:[%s3571_s11 + $0x178] sm:$0xff] %v2959_v50   ;;  %v1174_v63 = vadd.f32 %v3554_v8, %v1173_v21  ;;  %3054 = vst [vmem:[%s3571_s11 + $0x70] sm:$0xff] %v2794_v55   ;;  %vm1398_vm1 = vcmp.gt.f32.partialorder %v1182_v57, 0.0  ;;  %v1526_v2 = vmul.f32 0.2, %v1182_v57  ;;  %v929_v6 = vadd.f32 %v3227_v25, %v3554_v8 }
 0x146   : > { %vm1332_vm2 = vcmp.gt.f32.partialorder %v918_v58, 0.0  ;;  %v1460_v3 = vmul.f32 0.2, %v918_v58  ;;  %3086 = vst [vmem:[%s3571_s11 + $0x170] sm:$0xff] %v2954_v61   ;;  %v1590_v4 = vsel %vm1334_vm0, %v926_v52, %v1462_v62  ;;  %v1185_v10 = vadd.f32 %v3291_v30, %v3554_v8 }
 0x147   : > { %vm1396_vm3 = vcmp.gt.f32.partialorder %v1174_v63, 0.0  ;;  %v1524_v5 = vmul.f32 0.2, %v1174_v63  ;;  %v1654_v7 = vsel %vm1398_vm1, %v1182_v57, %v1526_v2  ;;  %v921_v11 = vadd.f32 %v3554_v8, %v920_v31 }
 0x148   : > { %v1588_v9 = vsel %vm1332_vm2, %v918_v58, %v1460_v3  ;;  %vm1335_vm4 = vcmp.gt.f32.partialorder %v929_v6, 0.0  ;;  %v1463_v13 = vmul.f32 0.2, %v929_v6  ;;  %v1177_v14 = vadd.f32 %v3554_v8, %v1176_v36 }
 0x149   : > { %v1652_v12 = vsel %vm1396_vm3, %v1174_v63, %v1524_v5  ;;  %vm1399_vm5 = vcmp.gt.f32.partialorder %v1185_v10, 0.0  ;;  %v1527_v15 = vmul.f32 0.2, %v1185_v10  ;;  %vm1333_vm6 = vcmp.gt.f32.partialorder %v921_v11, 0.0  ;;  %v3234_v20 = vpop.f32.mrb[40].mxu0  ;;  %v3298_v21 = vpop.f32.mrb[40].mxu1 }
 0x14a   : > { %v1461_v16 = vmul.f32 0.2, %v921_v11  ;;  %v1591_v17 = vsel %vm1335_vm4, %v929_v6, %v1463_v13  ;;  %vm1397_vm7 = vcmp.gt.f32.partialorder %v1177_v14, 0.0  ;;  %v1525_v18 = vmul.f32 0.2, %v1177_v14  ;;  %v949_v26 = vpop.f32.mrb[41].mxu0 }
 0x14b   : > { %v942_v19 = vadd.f32 %v3230_v47, %v3554_v8  ;;  %v2809_v22 = vpack.c.bf16 %v1591_v17, %v1590_v4  ;;  %v1655_v23 = vsel %vm1399_vm5, %v1185_v10, %v1527_v15  ;;  %v1198_v25 = vadd.f32 %v3294_v48, %v3554_v8  ;;  %v1205_v27 = vpop.f32.mrb[41].mxu1  ;;  %v3676_v31 = vpop.f32.mrb[42].mxu0 }
 0x14c   : > { %v1589_v24 = vsel %vm1333_vm6, %v921_v11, %v1461_v16  ;;  %v2969_v28 = vpack.c.bf16 %v1655_v23, %v1654_v7  ;;  %v1653_v30 = vsel %vm1397_vm7, %v1177_v14, %v1525_v18  ;;  %v3678_v32 = vpop.f32.mrb[42].mxu1  ;;  %v3681_v36 = vpop.f32.mrb[43].mxu0  ;;  %v934_v37 = vadd.f32 %v3554_v8, %v3659_v53 }
 0x14d   : > { %v2804_v29 = vpack.c.bf16 %v1589_v24, %v1588_v9  ;;  %vm1338_vm8 = vcmp.gt.f32.partialorder %v942_v19, 0.0  ;;  %3057 = vst [vmem:[%s3571_s11 + $0x88] sm:$0xff] %v2809_v22   ;;  %v2964_v33 = vpack.c.bf16 %v1653_v30, %v1652_v12  ;;  %v1466_v34 = vmul.f32 0.2, %v942_v19  ;;  %v3691_v41 = vpop.f32.mrb[43].mxu1 }
 0x14e   : > { %vm1402_vm9 = vcmp.gt.f32.partialorder %v1198_v25, 0.0  ;;  %v1530_v35 = vmul.f32 0.2, %v1198_v25  ;;  %3089 = vst [vmem:[%s3571_s11 + $0x188] sm:$0xff] %v2969_v28   ;;  %v1190_v38 = vadd.f32 %v3554_v8, %v3661_v54  ;;  %v945_v39 = vadd.f32 %v3231_v59, %v3554_v8 }
 0x14f   : > { %3056 = vst [vmem:[%s3571_s11 + $0x80] sm:$0xff] %v2804_v29   ;;  %v1201_v40 = vadd.f32 %v3295_v60, %v3554_v8  ;;  %3088 = vst [vmem:[%s3571_s11 + $0x180] sm:$0xff] %v2964_v33   ;;  %v1594_v42 = vsel %vm1338_vm8, %v942_v19, %v1466_v34  ;;  %v937_v44 = vadd.f32 %v3554_v8, %v936_v0  ;;  %vm1336_vm10 = vcmp.gt.f32.partialorder %v934_v37, 0.0  ;;  %v3722_v19 = vld [vmem:[%s3900_s2] ss:$0 sm:$0xff] }
 0x150   : > { %v1658_v43 = vsel %vm1402_vm9, %v1198_v25, %v1530_v35  ;;  %v1193_v45 = vadd.f32 %v3554_v8, %v1192_v1  ;;  %v1464_v46 = vmul.f32 0.2, %v934_v37  ;;  %vm1400_vm11 = vcmp.gt.f32.partialorder %v1190_v38, 0.0 }
 0x151   : > { %v1528_v47 = vmul.f32 0.2, %v1190_v38  ;;  %vm1339_vm12 = vcmp.gt.f32.partialorder %v945_v39, 0.0  ;;  %v1467_v48 = vmul.f32 0.2, %v945_v39  ;;  %vm1403_vm13 = vcmp.gt.f32.partialorder %v1201_v40, 0.0 }
 0x152   : > { %v1531_v49 = vmul.f32 0.2, %v1201_v40  ;;  %v1592_v50 = vsel %vm1336_vm10, %v934_v37, %v1464_v46  ;;  %vm1337_vm14 = vcmp.gt.f32.partialorder %v937_v44, 0.0  ;;  %v1465_v52 = vmul.f32 0.2, %v937_v44  ;;  %v3238_v53 = vpop.f32.mrb[44].mxu0 }
 0x153   : > { %v1656_v51 = vsel %vm1400_vm11, %v1190_v38, %v1528_v47  ;;  %v3302_v54 = vpop.f32.mrb[44].mxu1  ;;  %v1595_v55 = vsel %vm1339_vm12, %v945_v39, %v1467_v48  ;;  %vm1401_vm15 = vcmp.gt.f32.partialorder %v1193_v45, 0.0  ;;  %v1529_v57 = vmul.f32 0.2, %v1193_v45  ;;  %v3697_v58 = vpop.f32.mrb[45].mxu0 }
 0x154   : > { %v1659_v56 = vsel %vm1403_vm13, %v1201_v40, %v1531_v49  ;;  %v3699_v59 = vpop.f32.mrb[45].mxu1  ;;  %v2819_v60 = vpack.c.bf16 %v1595_v55, %v1594_v42  ;;  %v1593_v62 = vsel %vm1337_vm14, %v937_v44, %v1465_v52  ;;  %v958_v63 = vadd.f32 %v3234_v20, %v3554_v8  ;;  %v3702_v0 = vpop.f32.mrb[46].mxu0 }
 0x155   : > { %v2979_v61 = vpack.c.bf16 %v1659_v56, %v1658_v43  ;;  %v3704_v1 = vpop.f32.mrb[46].mxu1  ;;  %v2814_v2 = vpack.c.bf16 %v1593_v62, %v1592_v50  ;;  %v1657_v3 = vsel %vm1401_vm15, %v1193_v45, %v1529_v57  ;;  %v1214_v4 = vadd.f32 %v3298_v21, %v3554_v8  ;;  %v3708_v6 = vpop.f32.mrb[47].mxu0 }
 0x156   : > { %v950_v5 = vadd.f32 %v3554_v8, %v949_v26  ;;  %v3710_v7 = vpop.f32.mrb[47].mxu1  ;;  %3059 = vst [vmem:[%s3571_s11 + $0x98] sm:$0xff] %v2819_v60   ;;  %v2974_v9 = vpack.c.bf16 %v1657_v3, %v1656_v51  ;;  %vm1342_vm0 = vcmp.gt.f32.partialorder %v958_v63, 0.0  ;;  %v1470_v10 = vmul.f32 0.2, %v958_v63 }
 0x157   : > { %3091 = vst [vmem:[%s3571_s11 + $0x198] sm:$0xff] %v2979_v61   ;;  %v1206_v11 = vadd.f32 %v3554_v8, %v1205_v27  ;;  %3058 = vst [vmem:[%s3571_s11 + $0x90] sm:$0xff] %v2814_v2   ;;  %vm1406_vm1 = vcmp.gt.f32.partialorder %v1214_v4, 0.0  ;;  %v1534_v12 = vmul.f32 0.2, %v1214_v4  ;;  %v961_v16 = vadd.f32 %v3676_v31, %v3554_v8 }
 0x158   : > { %vm1340_vm2 = vcmp.gt.f32.partialorder %v950_v5, 0.0  ;;  %v1468_v13 = vmul.f32 0.2, %v950_v5  ;;  %3090 = vst [vmem:[%s3571_s11 + $0x190] sm:$0xff] %v2974_v9   ;;  %v1598_v14 = vsel %vm1342_vm0, %v958_v63, %v1470_v10  ;;  %v1217_v20 = vadd.f32 %v3722_v19, %v3678_v32 }
 0x159   : > { %vm1404_vm3 = vcmp.gt.f32.partialorder %v1206_v11, 0.0  ;;  %v1532_v15 = vmul.f32 0.2, %v1206_v11  ;;  %v1662_v17 = vsel %vm1406_vm1, %v1214_v4, %v1534_v12  ;;  %v953_v21 = vadd.f32 %v3722_v19, %v3681_v36  ;;  %v3728_v22 = vpop.f32.mrb[48].mxu0  ;;  %v3730_v23 = vpop.f32.mrb[48].mxu1 }
 0x15a   : > { %v1596_v18 = vsel %vm1340_vm2, %v950_v5, %v1468_v13  ;;  %vm1343_vm4 = vcmp.gt.f32.partialorder %v961_v16, 0.0  ;;  %v1471_v8 = vmul.f32 0.2, %v961_v16  ;;  %v1209_v25 = vadd.f32 %v3722_v19, %v3691_v41  ;;  %v3734_v26 = vpop.f32.mrb[49].mxu0  ;;  %v3736_v27 = vpop.f32.mrb[49].mxu1 }
 0x15b   : > { %v1660_v24 = vsel %vm1404_vm3, %v1206_v11, %v1532_v15  ;;  %vm1407_vm5 = vcmp.gt.f32.partialorder %v1217_v20, 0.0  ;;  %v1535_v28 = vmul.f32 0.2, %v1217_v20  ;;  %vm1341_vm6 = vcmp.gt.f32.partialorder %v953_v21, 0.0  ;;  %v3739_v33 = vpop.f32.mrb[50].mxu0  ;;  %v3741_v34 = vpop.f32.mrb[50].mxu1 }
 0x15c   : > { %v1469_v29 = vmul.f32 0.2, %v953_v21  ;;  %v1599_v30 = vsel %vm1343_vm4, %v961_v16, %v1471_v8  ;;  %vm1405_vm7 = vcmp.gt.f32.partialorder %v1209_v25, 0.0  ;;  %v1533_v31 = vmul.f32 0.2, %v1209_v25  ;;  %v3744_v39 = vpop.f32.mrb[51].mxu0 }
 0x15d   : > { %v974_v32 = vadd.f32 %v3722_v19, %v3238_v53  ;;  %v2829_v35 = vpack.c.bf16 %v1599_v30, %v1598_v14  ;;  %v1663_v36 = vsel %vm1407_vm5, %v1217_v20, %v1535_v28  ;;  %v1230_v38 = vadd.f32 %v3722_v19, %v3302_v54  ;;  %v3746_v40 = vpop.f32.mrb[51].mxu1 }
 0x15e   : > { %v1597_v37 = vsel %vm1341_vm6, %v953_v21, %v1469_v29  ;;  %v2989_v41 = vpack.c.bf16 %v1663_v36, %v1662_v17  ;;  %v1661_v43 = vsel %vm1405_vm7, %v1209_v25, %v1533_v31  ;;  %v966_v47 = vadd.f32 %v3722_v19, %v3697_v58 }
 0x15f   : > { %v2824_v42 = vpack.c.bf16 %v1597_v37, %v1596_v18  ;;  %vm1346_vm8 = vcmp.gt.f32.partialorder %v974_v32, 0.0  ;;  %3061 = vst [vmem:[%s3571_s11 + $0xa8] sm:$0xff] %v2829_v35   ;;  %v2984_v44 = vpack.c.bf16 %v1661_v43, %v1660_v24  ;;  %v1474_v45 = vmul.f32 0.2, %v974_v32 }
 0x160   : > { %vm1410_vm9 = vcmp.gt.f32.partialorder %v1230_v38, 0.0  ;;  %v1538_v46 = vmul.f32 0.2, %v1230_v38  ;;  %3093 = vst [vmem:[%s3571_s11 + $0x1a8] sm:$0xff] %v2989_v41   ;;  %v1222_v48 = vadd.f32 %v3722_v19, %v3699_v59  ;;  %v977_v49 = vadd.f32 %v3722_v19, %v3702_v0 }
 0x161   : > { %3060 = vst [vmem:[%s3571_s11 + $0xa0] sm:$0xff] %v2824_v42   ;;  %v1233_v50 = vadd.f32 %v3722_v19, %v3704_v1  ;;  %3092 = vst [vmem:[%s3571_s11 + $0x1a0] sm:$0xff] %v2984_v44   ;;  %v1602_v51 = vsel %vm1346_vm8, %v974_v32, %v1474_v45  ;;  %v969_v53 = vadd.f32 %v3722_v19, %v3708_v6  ;;  %v3764_v55 = vpop.f32.mrb[52].mxu0  ;;  %v3766_v56 = vpop.f32.mrb[52].mxu1  ;;  %vm1344_vm10 = vcmp.gt.f32.partialorder %v966_v47, 0.0 }
 0x162   : > { %v1666_v52 = vsel %vm1410_vm9, %v1230_v38, %v1538_v46  ;;  %v1225_v54 = vadd.f32 %v3722_v19, %v3710_v7  ;;  %v1472_v57 = vmul.f32 0.2, %v966_v47  ;;  %vm1408_vm11 = vcmp.gt.f32.partialorder %v1222_v48, 0.0  ;;  %v3768_v0 = vpop.f32.mrb[53].mxu0  ;;  %v3770_v1 = vpop.f32.mrb[53].mxu1 }
 0x163   : > { %v1536_v58 = vmul.f32 0.2, %v1222_v48  ;;  %vm1347_vm12 = vcmp.gt.f32.partialorder %v977_v49, 0.0  ;;  %v1475_v59 = vmul.f32 0.2, %v977_v49  ;;  %vm1411_vm13 = vcmp.gt.f32.partialorder %v1233_v50, 0.0 }
 0x164   : > { %v1539_v60 = vmul.f32 0.2, %v1233_v50  ;;  %v1600_v61 = vsel %vm1344_vm10, %v966_v47, %v1472_v57  ;;  %vm1345_vm14 = vcmp.gt.f32.partialorder %v969_v53, 0.0  ;;  %v1473_v63 = vmul.f32 0.2, %v969_v53  ;;  %v3772_v5 = vpop.f32.mrb[54].mxu0 }
 0x165   : > { %v1664_v62 = vsel %vm1408_vm11, %v1222_v48, %v1536_v58  ;;  %v1603_v2 = vsel %vm1347_vm12, %v977_v49, %v1475_v59  ;;  %vm1409_vm15 = vcmp.gt.f32.partialorder %v1225_v54, 0.0  ;;  %v1537_v4 = vmul.f32 0.2, %v1225_v54  ;;  %v3774_v6 = vpop.f32.mrb[54].mxu1  ;;  %v3778_v12 = vpop.f32.mrb[55].mxu0 }
 0x166   : > { %v1667_v3 = vsel %vm1411_vm13, %v1233_v50, %v1539_v60  ;;  %v2839_v7 = vpack.c.bf16 %v1603_v2, %v1602_v51  ;;  %v1601_v10 = vsel %vm1345_vm14, %v969_v53, %v1473_v63  ;;  %v990_v11 = vadd.f32 %v3722_v19, %v3728_v22  ;;  %v3780_v13 = vpop.f32.mrb[55].mxu1 }
 0x167   : > { %v2999_v9 = vpack.c.bf16 %v1667_v3, %v1666_v52  ;;  %v2834_v14 = vpack.c.bf16 %v1601_v10, %v1600_v61  ;;  %v1665_v15 = vsel %vm1409_vm15, %v1225_v54, %v1537_v4  ;;  %v1246_v16 = vadd.f32 %v3722_v19, %v3730_v23 }
 0x168   : > { %v982_v17 = vadd.f32 %v3722_v19, %v3734_v26  ;;  %3063 = vst [vmem:[%s3571_s11 + $0xb8] sm:$0xff] %v2839_v7   ;;  %v2994_v18 = vpack.c.bf16 %v1665_v15, %v1664_v62  ;;  %vm1350_vm0 = vcmp.gt.f32.partialorder %v990_v11, 0.0  ;;  %v1478_v20 = vmul.f32 0.2, %v990_v11 }
 0x169   : > { %3095 = vst [vmem:[%s3571_s11 + $0x1b8] sm:$0xff] %v2999_v9   ;;  %v1238_v21 = vadd.f32 %v3722_v19, %v3736_v27  ;;  %3062 = vst [vmem:[%s3571_s11 + $0xb0] sm:$0xff] %v2834_v14   ;;  %vm1414_vm1 = vcmp.gt.f32.partialorder %v1246_v16, 0.0  ;;  %v1542_v22 = vmul.f32 0.2, %v1246_v16  ;;  %v993_v25 = vadd.f32 %v3722_v19, %v3739_v33  ;;  %v3794_v26 = vpop.f32.mrb[56].mxu0 }
 0x16a   : > { %vm1348_vm2 = vcmp.gt.f32.partialorder %v982_v17, 0.0  ;;  %v1476_v24 = vmul.f32 0.2, %v982_v17  ;;  %3094 = vst [vmem:[%s3571_s11 + $0x1b0] sm:$0xff] %v2994_v18   ;;  %v1606_v8 = vsel %vm1350_vm0, %v990_v11, %v1478_v20  ;;  %v3796_v28 = vpop.f32.mrb[56].mxu1  ;;  %v1249_v27 = vadd.f32 %v3722_v19, %v3741_v34  ;;  %v3802_v32 = vpop.f32.mrb[57].mxu0 }
 0x16b   : > { %vm1412_vm3 = vcmp.gt.f32.partialorder %v1238_v21, 0.0  ;;  %v1540_v23 = vmul.f32 0.2, %v1238_v21  ;;  %v1670_v29 = vsel %vm1414_vm1, %v1246_v16, %v1542_v22  ;;  %v985_v31 = vadd.f32 %v3722_v19, %v3744_v39  ;;  %v3804_v35 = vpop.f32.mrb[57].mxu1  ;;  %v3808_v38 = vpop.f32.mrb[58].mxu0 }
 0x16c   : > { %v1604_v30 = vsel %vm1348_vm2, %v982_v17, %v1476_v24  ;;  %vm1351_vm4 = vcmp.gt.f32.partialorder %v993_v25, 0.0  ;;  %v1479_v37 = vmul.f32 0.2, %v993_v25  ;;  %v1241_v33 = vadd.f32 %v3722_v19, %v3746_v40  ;;  %v3810_v41 = vpop.f32.mrb[58].mxu1  ;;  %v3814_v45 = vpop.f32.mrb[59].mxu0 }
 0x16d   : > { %v1668_v36 = vsel %vm1412_vm3, %v1238_v21, %v1540_v23  ;;  %vm1415_vm5 = vcmp.gt.f32.partialorder %v1249_v27, 0.0  ;;  %v1543_v42 = vmul.f32 0.2, %v1249_v27  ;;  %vm1349_vm6 = vcmp.gt.f32.partialorder %v985_v31, 0.0  ;;  %v3816_v46 = vpop.f32.mrb[59].mxu1 }
 0x16e   : > { %v1477_v34 = vmul.f32 0.2, %v985_v31  ;;  %v1607_v39 = vsel %vm1351_vm4, %v993_v25, %v1479_v37  ;;  %vm1413_vm7 = vcmp.gt.f32.partialorder %v1241_v33, 0.0  ;;  %v1541_v43 = vmul.f32 0.2, %v1241_v33 }
 0x16f   : > { %v1006_v44 = vadd.f32 %v3722_v19, %v3764_v55  ;;  %v2849_v40 = vpack.c.bf16 %v1607_v39, %v1606_v8  ;;  %v1671_v47 = vsel %vm1415_vm5, %v1249_v27, %v1543_v42  ;;  %v1262_v49 = vadd.f32 %v3722_v19, %v3766_v56 }
 0x170   : > { %v1605_v48 = vsel %vm1349_vm6, %v985_v31, %v1477_v34  ;;  %v3009_v50 = vpack.c.bf16 %v1671_v47, %v1670_v29  ;;  %v1669_v52 = vsel %vm1413_vm7, %v1241_v33, %v1541_v43  ;;  %v998_v58 = vadd.f32 %v3722_v19, %v3768_v0 }
 0x171   : > { %v2844_v51 = vpack.c.bf16 %v1605_v48, %v1604_v30  ;;  %vm1354_vm8 = vcmp.gt.f32.partialorder %v1006_v44, 0.0  ;;  %3065 = vst [vmem:[%s3571_s11 + $0xc8] sm:$0xff] %v2849_v40   ;;  %v3004_v53 = vpack.c.bf16 %v1669_v52, %v1668_v36  ;;  %v1482_v54 = vmul.f32 0.2, %v1006_v44  ;;  %v3821_v57 = vpop.f32.mrb[60].mxu0  ;;  %v3833_v61 = vpop.f32.mrb[60].mxu1 }
 0x172   : > { %vm1418_vm9 = vcmp.gt.f32.partialorder %v1262_v49, 0.0  ;;  %v1546_v55 = vmul.f32 0.2, %v1262_v49  ;;  %3097 = vst [vmem:[%s3571_s11 + $0x1c8] sm:$0xff] %v3009_v50   ;;  %v1254_v56 = vadd.f32 %v3722_v19, %v3770_v1  ;;  %v1009_v59 = vadd.f32 %v3722_v19, %v3772_v5  ;;  %v3835_v62 = vpop.f32.mrb[61].mxu0  ;;  %v3843_v3 = vpop.f32.mrb[61].mxu1 }
 0x173   : > { %3064 = vst [vmem:[%s3571_s11 + $0xc0] sm:$0xff] %v2844_v51   ;;  %v1265_v60 = vadd.f32 %v3722_v19, %v3774_v6  ;;  %3096 = vst [vmem:[%s3571_s11 + $0x1c0] sm:$0xff] %v3004_v53   ;;  %v1610_v63 = vsel %vm1354_vm8, %v1006_v44, %v1482_v54  ;;  %v1001_v0 = vadd.f32 %v3722_v19, %v3778_v12  ;;  %v3845_v4 = vpop.f32.mrb[62].mxu0  ;;  %vm1352_vm10 = vcmp.gt.f32.partialorder %v998_v58, 0.0  ;;  %v3847_v12 = vpop.f32.mrb[62].mxu1 }
 0x174   : > { %v1674_v2 = vsel %vm1418_vm9, %v1262_v49, %v1546_v55  ;;  %v1257_v1 = vadd.f32 %v3722_v19, %v3780_v13  ;;  %v1480_v5 = vmul.f32 0.2, %v998_v58  ;;  %vm1416_vm11 = vcmp.gt.f32.partialorder %v1254_v56, 0.0  ;;  %v3849_v13 = vpop.f32.mrb[63].mxu0  ;;  %v1288_v18 = vpop.f32.mrb[63].mxu1 }
 0x175   : > { %v1544_v6 = vmul.f32 0.2, %v1254_v56  ;;  %vm1355_vm12 = vcmp.gt.f32.partialorder %v1009_v59, 0.0  ;;  %v1483_v7 = vmul.f32 0.2, %v1009_v59  ;;  %vm1419_vm13 = vcmp.gt.f32.partialorder %v1265_v60, 0.0 }
 0x176   : > { %v1547_v9 = vmul.f32 0.2, %v1265_v60  ;;  %v1608_v10 = vsel %vm1352_vm10, %v998_v58, %v1480_v5  ;;  %vm1353_vm14 = vcmp.gt.f32.partialorder %v1001_v0, 0.0  ;;  %v1481_v14 = vmul.f32 0.2, %v1001_v0 }
 0x177   : > { %v1672_v11 = vsel %vm1416_vm11, %v1254_v56, %v1544_v6  ;;  %v1611_v15 = vsel %vm1355_vm12, %v1009_v59, %v1483_v7  ;;  %vm1417_vm15 = vcmp.gt.f32.partialorder %v1257_v1, 0.0  ;;  %v1545_v17 = vmul.f32 0.2, %v1257_v1 }
 0x178   : > { %v1675_v16 = vsel %vm1419_vm13, %v1265_v60, %v1547_v9  ;;  %v2859_v20 = vpack.c.bf16 %v1611_v15, %v1610_v63  ;;  %v1609_v22 = vsel %vm1353_vm14, %v1001_v0, %v1481_v14  ;;  %v1022_v24 = vadd.f32 %v3722_v19, %v3794_v26 }
 0x179   : > { %v3019_v21 = vpack.c.bf16 %v1675_v16, %v1674_v2  ;;  %v2854_v8 = vpack.c.bf16 %v1609_v22, %v1608_v10  ;;  %v1673_v23 = vsel %vm1417_vm15, %v1257_v1, %v1545_v17  ;;  %v1278_v25 = vadd.f32 %v3722_v19, %v3796_v28 }
 0x17a   : > { %v1014_v29 = vadd.f32 %v3722_v19, %v3802_v32  ;;  %3067 = vst [vmem:[%s3571_s11 + $0xd8] sm:$0xff] %v2859_v20   ;;  %v3014_v30 = vpack.c.bf16 %v1673_v23, %v1672_v11  ;;  %vm1358_vm0 = vcmp.gt.f32.partialorder %v1022_v24, 0.0  ;;  %v1486_v27 = vmul.f32 0.2, %v1022_v24 }
 0x17b   : > { %3099 = vst [vmem:[%s3571_s11 + $0x1d8] sm:$0xff] %v3019_v21   ;;  %v1270_v31 = vadd.f32 %v3722_v19, %v3804_v35  ;;  %3066 = vst [vmem:[%s3571_s11 + $0xd0] sm:$0xff] %v2854_v8   ;;  %vm1422_vm1 = vcmp.gt.f32.partialorder %v1278_v25, 0.0  ;;  %v1550_v26 = vmul.f32 0.2, %v1278_v25  ;;  %v1025_v28 = vadd.f32 %v3722_v19, %v3808_v38 }
 0x17c   : > { %vm1356_vm2 = vcmp.gt.f32.partialorder %v1014_v29, 0.0  ;;  %v1484_v36 = vmul.f32 0.2, %v1014_v29  ;;  %3098 = vst [vmem:[%s3571_s11 + $0x1d0] sm:$0xff] %v3014_v30   ;;  %v1614_v37 = vsel %vm1358_vm0, %v1022_v24, %v1486_v27  ;;  %v1281_v42 = vadd.f32 %v3722_v19, %v3810_v41 }
 0x17d   : > { %vm1420_vm3 = vcmp.gt.f32.partialorder %v1270_v31, 0.0  ;;  %v1678_v32 = vsel %vm1422_vm1, %v1278_v25, %v1550_v26  ;;  %v1548_v33 = vmul.f32 0.2, %v1270_v31  ;;  %v1017_v34 = vadd.f32 %v3722_v19, %v3814_v45 }
 0x17e   : > { %v1612_v35 = vsel %vm1356_vm2, %v1014_v29, %v1484_v36  ;;  %vm1359_vm4 = vcmp.gt.f32.partialorder %v1025_v28, 0.0  ;;  %v1487_v39 = vmul.f32 0.2, %v1025_v28  ;;  %v1273_v43 = vadd.f32 %v3722_v19, %v3816_v46 }
 0x17f   : > { %vm1423_vm5 = vcmp.gt.f32.partialorder %v1281_v42, 0.0  ;;  %v1551_v44 = vmul.f32 0.2, %v1281_v42  ;;  %vm1357_vm6 = vcmp.gt.f32.partialorder %v1017_v34, 0.0  ;;  %v1485_v40 = vmul.f32 0.2, %v1017_v34 }
 0x180   : > { %v1615_v38 = vsel %vm1359_vm4, %v1025_v28, %v1487_v39  ;;  %vm1421_vm7 = vcmp.gt.f32.partialorder %v1273_v43, 0.0  ;;  %v1549_v47 = vmul.f32 0.2, %v1273_v43  ;;  %v1038_v41 = vadd.f32 %v3722_v19, %v3821_v57 }
 0x181   : > { %v2869_v45 = vpack.c.bf16 %v1615_v38, %v1614_v37  ;;  %v1679_v48 = vsel %vm1423_vm5, %v1281_v42, %v1551_v44  ;;  %v1613_v49 = vsel %vm1357_vm6, %v1017_v34, %v1485_v40  ;;  %v1294_v50 = vadd.f32 %v3722_v19, %v3833_v61 }
 0x182   : > { %v1676_v46 = vsel %vm1420_vm3, %v1270_v31, %v1548_v33  ;;  %v3029_v51 = vpack.c.bf16 %v1679_v48, %v1678_v32  ;;  %v2864_v52 = vpack.c.bf16 %v1613_v49, %v1612_v35  ;;  %v1677_v53 = vsel %vm1421_vm7, %v1273_v43, %v1549_v47 }
 0x183   : > { %3069 = vst [vmem:[%s3571_s11 + $0xe8] sm:$0xff] %v2869_v45   ;;  %v3024_v54 = vpack.c.bf16 %v1677_v53, %v1676_v46  ;;  %vm1362_vm8 = vcmp.gt.f32.partialorder %v1038_v41, 0.0  ;;  %v1490_v55 = vmul.f32 0.2, %v1038_v41  ;;  %v1554_v58 = vmul.f32 0.2, %v1294_v50 }
 0x184   : > { %3101 = vst [vmem:[%s3571_s11 + $0x1e8] sm:$0xff] %v3029_v51   ;;  %3068 = vst [vmem:[%s3571_s11 + $0xe0] sm:$0xff] %v2864_v52   ;;  %v1030_v57 = vadd.f32 %v3722_v19, %v3835_v62  ;;  %v1286_v56 = vadd.f32 %v3722_v19, %v3843_v3  ;;  %v1041_v59 = vadd.f32 %v3722_v19, %v3845_v4  ;;  %vm1426_vm9 = vcmp.gt.f32.partialorder %v1294_v50, 0.0 }
 0x185   : > { %v1297_v60 = vadd.f32 %v3722_v19, %v3847_v12  ;;  %3100 = vst [vmem:[%s3571_s11 + $0x1e0] sm:$0xff] %v3024_v54   ;;  %v1033_v61 = vadd.f32 %v3722_v19, %v3849_v13  ;;  %v1289_v63 = vadd.f32 %v3722_v19, %v1288_v18  ;;  %v1618_v2 = vsel %vm1362_vm8, %v1038_v41, %v1490_v55 }
 0x186   : > { %vm1360_vm10 = vcmp.gt.f32.partialorder %v1030_v57, 0.0  ;;  %v1488_v0 = vmul.f32 0.2, %v1030_v57  ;;  %v1552_v62 = vmul.f32 0.2, %v1286_v56  ;;  %vm1363_vm11 = vcmp.gt.f32.partialorder %v1041_v59, 0.0 }
 0x187   : > { %v1491_v1 = vmul.f32 0.2, %v1041_v59  ;;  %vm1427_vm12 = vcmp.gt.f32.partialorder %v1297_v60, 0.0  ;;  %v1555_v3 = vmul.f32 0.2, %v1297_v60  ;;  %v1682_v4 = vsel %vm1426_vm9, %v1294_v50, %v1554_v58 }
 0x188   : > { %vm1424_vm13 = vcmp.gt.f32.partialorder %v1286_v56, 0.0  ;;  %vm1361_vm14 = vcmp.gt.f32.partialorder %v1033_v61, 0.0  ;;  %v1489_v5 = vmul.f32 0.2, %v1033_v61  ;;  %vm1425_vm15 = vcmp.gt.f32.partialorder %v1289_v63, 0.0 }
 0x189   : > { %v1619_v6 = vsel %vm1363_vm11, %v1041_v59, %v1491_v1  ;;  %v1683_v7 = vsel %vm1427_vm12, %v1297_v60, %v1555_v3  ;;  %v1553_v19 = vmul.f32 0.2, %v1289_v63  ;;  %v1616_v9 = vsel %vm1360_vm10, %v1030_v57, %v1488_v0 }
 0x18a   : > { %v2879_v10 = vpack.c.bf16 %v1619_v6, %v1618_v2  ;;  %v3039_v11 = vpack.c.bf16 %v1683_v7, %v1682_v4  ;;  %v1617_v14 = vsel %vm1361_vm14, %v1033_v61, %v1489_v5  ;;  %v1680_v12 = vsel %vm1424_vm13, %v1286_v56, %v1552_v62 }
 0x18b   : > { %v2874_v13 = vpack.c.bf16 %v1617_v14, %v1616_v9  ;;  %v1681_v15 = vsel %vm1425_vm15, %v1289_v63, %v1553_v19 }
 0x18c   : > { %3071 = vst [vmem:[%s3571_s11 + $0xf8] sm:$0xff] %v2879_v10   ;;  %3103 = vst [vmem:[%s3571_s11 + $0x1f8] sm:$0xff] %v3039_v11   ;;  %v3034_v16 = vpack.c.bf16 %v1681_v15, %v1680_v12 }
 0x18d   : > { %3070 = vst [vmem:[%s3571_s11 + $0xf0] sm:$0xff] %v2874_v13  }
 0x18e   : > { %3102 = vst [vmem:[%s3571_s11 + $0x1f0] sm:$0xff] %v3034_v16  }
 0x18f PF: > { %s13_s12 = sadd.s32 1, %s3423_s12  }
 0x190   : > { %p10_p4 = scmp.ge.s32.totalorder %s13_s12, 4  }
 0x192   :  { %12 = sbr.rel (!%p10_p4) target bundleno = 1 (0x1), region = 62 }

// kernel: discriminator_forward.5
= control target key start
LH: loop header
LB: loop body
LE: loop exit
PB: predicated region body
PF: predicated region fallthrough
CT: control target
= control target key end

     0   :  { %s1471_s15 = smov 0   ;;  %s2019_s0 = inlined_call_operand.vmem [shape: bf16[2,256,128], index: 0, kind: input, shape index: {}]   ;;  %s2020_s1 = inlined_call_operand.vmem [shape: bf16[128,128], index: 1, kind: input, shape index: {}]   ;;  %s2021_s2 = inlined_call_operand.vmem [shape: f32[1,128], index: 2, kind: input, shape index: {}]   ;;  %s2022_s3 = inlined_call_operand.vmem [shape: f32[1,128], index: 3, kind: input, shape index: {}]   ;;  %s2023_s4 = inlined_call_operand.vmem [shape: bf16[2,256,128], index: 4, kind: output, shape index: {}]  }
   0x1 LB: > { %s1118_s16 = sadd.s32 4294967295, %s1444_s15   ;;  %p1122_p0 = scmp.ge.s32.totalorder %s1444_s15, 1  ;;  %s1444_s15 = sphi %s1471_s15, %s14_s15  }
   0x2   : > { %p162_p1 = scmp.lt.s32.totalorder %s1444_s15, 3 }
   0x4   : > { %p163_p2 = pnand %p1122_p0, %p162_p1 }
   0x5   : > { %v1412_v0 = vld [vmem:[%s2020_s1] sm:$0xff] (!%p163_p2)   ;;  %p188_p3 = scmp.lt.s32.totalorder (!%p163_p2), %s1118_s16, 1  ;;  %v1413_v1 = vld [vmem:[%s2020_s1 + $0x8] sm:$0xff] (!%p163_p2)   ;;  %v1414_v2 = vld [vmem:[%s2020_s1 + $0x10] sm:$0xff] (!%p163_p2)  }
   0x6   : > { %166 = sbr.rel (%p163_p2) target bundleno = 409 (0x199), region = 36  ;;  %1340 = vmatprep.subr.bf16.mxu0 (!%p163_p2), %v1412_v0  ;;  %1388 = vmatprep.subr.bf16.mxu1 (!%p163_p2), %v1412_v0  ;;  %v1415_v3 = vld [vmem:[%s2020_s1 + $0x18] sm:$0xff] (!%p163_p2)   ;;  %v1416_v5 = vld [vmem:[%s2020_s1 + $0x20] sm:$0xff] (!%p163_p2)   ;;  %v1417_v6 = vld [vmem:[%s2020_s1 + $0x28] sm:$0xff] (!%p163_p2)  }
   0x7   : > { %1341 = vmatpush3.bf16.msra.mxu0 (!%p163_p2), %v1412_v0  ;;  %1396 = vmatpush3.bf16.msra.mxu1 (!%p163_p2), %v1412_v0  ;;  %v1418_v8 = vld [vmem:[%s2020_s1 + $0x30] sm:$0xff] (!%p163_p2)   ;;  %v1419_v9 = vld [vmem:[%s2020_s1 + $0x38] sm:$0xff] (!%p163_p2)  }
   0x8   : > { %1342 = vmatprep.subr.bf16.mxu0 (!%p163_p2), %v1413_v1  ;;  %1389 = vmatprep.subr.bf16.mxu1 (!%p163_p2), %v1413_v1 }
   0xb   : > { %1343 = vmatpush3.bf16.msra.mxu0 (!%p163_p2), %v1413_v1  ;;  %1397 = vmatpush3.bf16.msra.mxu1 (!%p163_p2), %v1413_v1 }
   0xc   : > { %1344 = vmatprep.subr.bf16.mxu0 (!%p163_p2), %v1414_v2  ;;  %1390 = vmatprep.subr.bf16.mxu1 (!%p163_p2), %v1414_v2 }
   0xd   : > { %s2039_s16 = smov (!%p188_p3, %s1118_s16), 1 }
   0xe   : > { %s1187_s23 = sshll.u32 %s2039_s16, 7 }
   0xf   : > { %s1496_s26 = scalar_lea.vmem %s2019_s0, %s1187_s23  ;;  %1345 = vmatpush3.bf16.msra.mxu0 %v1414_v2  ;;  %1398 = vmatpush3.bf16.msra.mxu1 %v1414_v2  ;;  %s1978_s19 = scalar_lea.vmem %s2023_s4, %s1187_s23 }
  0x10   : > { %v1420_v4 = vld [vmem:[%s1496_s26] sm:$0xff]   ;;  %1346 = vmatprep.subr.bf16.mxu0 %v1415_v3  ;;  %1391 = vmatprep.subr.bf16.mxu1 %v1415_v3  ;;  %v1421_v10 = vld [vmem:[%s1496_s26 + $0x8] sm:$0xff]   ;;  %v1422_v12 = vld [vmem:[%s1496_s26 + $0x10] sm:$0xff]  }
  0x11   : > { %1356 = vmatprep.mubr.bf16.mxu0 %v1420_v4  ;;  %v1428_v7 = vld [vmem:[%s1496_s26 + $0x40] sm:$0xff]   ;;  %v1429_v11 = vld [vmem:[%s1496_s26 + $0x48] sm:$0xff]   ;;  %v1430_v13 = vld [vmem:[%s1496_s26 + $0x50] sm:$0xff]  }
  0x12   : > { %1372 = vmatprep.mubr.bf16.mxu1 %v1428_v7  ;;  %v1423_v14 = vld [vmem:[%s1496_s26 + $0x18] sm:$0xff]   ;;  %v1424_v16 = vld [vmem:[%s1496_s26 + $0x20] sm:$0xff]   ;;  %v1425_v18 = vld [vmem:[%s1496_s26 + $0x28] sm:$0xff]  }
  0x13   : > { %1347 = vmatpush3.bf16.msra.mxu0 %v1415_v3  ;;  %1399 = vmatpush3.bf16.msra.mxu1 %v1415_v3  ;;  %v1431_v15 = vld [vmem:[%s1496_s26 + $0x58] sm:$0xff]   ;;  %v1432_v17 = vld [vmem:[%s1496_s26 + $0x60] sm:$0xff]   ;;  %v1433_v19 = vld [vmem:[%s1496_s26 + $0x68] sm:$0xff]  }
  0x14   : > { %1348 = vmatprep.subr.bf16.mxu0 %v1416_v5  ;;  %1392 = vmatprep.subr.bf16.mxu1 %v1416_v5  ;;  %v1426_v20 = vld [vmem:[%s1496_s26 + $0x30] sm:$0xff]   ;;  %v1427_v22 = vld [vmem:[%s1496_s26 + $0x38] sm:$0xff]  }
  0x15   : > { %v1434_v21 = vld [vmem:[%s1496_s26 + $0x70] sm:$0xff]   ;;  %v1435_v23 = vld [vmem:[%s1496_s26 + $0x78] sm:$0xff]  }
  0x17   : > { %1349 = vmatpush3.bf16.msra.mxu0 %v1416_v5  ;;  %1400 = vmatpush3.bf16.msra.mxu1 %v1416_v5 }
  0x18   : > { %1350 = vmatprep.subr.bf16.mxu0 %v1417_v6  ;;  %1393 = vmatprep.subr.bf16.mxu1 %v1417_v6 }
  0x1b   : > { %1351 = vmatpush3.bf16.msra.mxu0 %v1417_v6  ;;  %1401 = vmatpush3.bf16.msra.mxu1 %v1417_v6 }
  0x1c   : > { %1352 = vmatprep.subr.bf16.mxu0 %v1418_v8  ;;  %1394 = vmatprep.subr.bf16.mxu1 %v1418_v8 }
  0x1f   : > { %1353 = vmatpush3.bf16.msra.mxu0 %v1418_v8  ;;  %1402 = vmatpush3.bf16.msra.mxu1 %v1418_v8 }
  0x20   : > { %1354 = vmatprep.subr.bf16.mxu0 %v1419_v9  ;;  %1395 = vmatprep.subr.bf16.mxu1 %v1419_v9 }
  0x23   : > { %1355 = vmatpush3.bf16.msra.mxu0 %v1419_v9  ;;  %1403 = vmatpush3.bf16.msra.mxu1 %v1419_v9 }
  0x26   : > { %1357 = vmatmul.mubr.bf16.vlgmr.msra.gmra.mrb[0].mxu0 %v1421_v10  ;;  %1373 = vmatmul.mubr.bf16.vlgmr.msra.gmra.mrb[0].mxu1 %v1429_v11 }
  0x27   : > { %1360 = vmatprep.mubr.bf16.mxu0 %v1422_v12  ;;  %1376 = vmatprep.mubr.bf16.mxu1 %v1430_v13 }
  0x2e   : > { %1361 = vmatmul.mubr.bf16.gmra.mrb[4].mxu0 %v1423_v14  ;;  %1377 = vmatmul.mubr.bf16.gmra.mrb[4].mxu1 %v1431_v15 }
  0x2f   : > { %1364 = vmatprep.mubr.bf16.mxu0 %v1424_v16  ;;  %1380 = vmatprep.mubr.bf16.mxu1 %v1432_v17 }
  0x36   : > { %1365 = vmatmul.mubr.bf16.gmra.mrb[8].mxu0 %v1425_v18  ;;  %1381 = vmatmul.mubr.bf16.gmra.mrb[8].mxu1 %v1433_v19 }
  0x37   : > { %1368 = vmatprep.mubr.bf16.mxu0 %v1426_v20  ;;  %1384 = vmatprep.mubr.bf16.mxu1 %v1434_v21 }
  0x3e   : > { %1369 = vmatmul.mubr.bf16.gmra.mrb[12].mxu0 %v1427_v22  ;;  %1385 = vmatmul.mubr.bf16.gmra.mrb[12].mxu1 %v1435_v23 }
  0xf9   : > { %v1529_v24 = vpop.f32.mrb[0].mxu0  ;;  %v1531_v25 = vpop.f32.mrb[0].mxu1 }
  0xfa   : > { %v1533_v26 = vpop.f32.mrb[1].mxu0  ;;  %v1535_v27 = vpop.f32.mrb[1].mxu1  ;;  %v592_v35 = vmul.f32 %v1529_v24, %v1529_v24 }
  0xfb   : > { %v1537_v28 = vpop.f32.mrb[2].mxu0  ;;  %v1539_v29 = vpop.f32.mrb[2].mxu1  ;;  %v590_v32 = vmul.f32 %v1533_v26, %v1533_v26 }
  0xfc   : > { %v1541_v30 = vpop.f32.mrb[3].mxu0  ;;  %v1543_v31 = vpop.f32.mrb[3].mxu1  ;;  %v593_v38 = vmul.f32 %v1537_v28, %v1537_v28 }
  0xfd   : > { %v552_v33 = vadd.f32 %v1541_v30, %v1533_v26  ;;  %v591_v34 = vmul.f32 %v1541_v30, %v1541_v30 }
  0xff   : > { %v553_v36 = vadd.f32 %v1529_v24, %v552_v33  ;;  %v622_v37 = vadd.f32 %v591_v34, %v590_v32 }
 0x101   : > { %v623_v39 = vadd.f32 %v622_v37, %v592_v35  ;;  %v1556_v40 = vpop.f32.mrb[4].mxu0  ;;  %v554_v41 = vadd.f32 %v1537_v28, %v553_v36  ;;  %v1559_v42 = vpop.f32.mrb[4].mxu1 }
 0x102   : > { %v1561_v43 = vpop.f32.mrb[5].mxu0  ;;  %v1563_v44 = vpop.f32.mrb[5].mxu1  ;;  %v596_v55 = vmul.f32 %v1556_v40, %v1556_v40 }
 0x103   : > { %v555_v45 = vadd.f32 %v554_v41, %v1561_v43  ;;  %v594_v46 = vmul.f32 %v1561_v43, %v1561_v43  ;;  %v624_v47 = vadd.f32 %v623_v39, %v593_v38  ;;  %v1568_v48 = vpop.f32.mrb[6].mxu0  ;;  %v1570_v49 = vpop.f32.mrb[6].mxu1 }
 0x104   : > { %v1572_v50 = vpop.f32.mrb[7].mxu0  ;;  %v1574_v51 = vpop.f32.mrb[7].mxu1  ;;  %v597_v58 = vmul.f32 %v1568_v48, %v1568_v48 }
 0x105   : > { %v625_v52 = vadd.f32 %v624_v47, %v594_v46  ;;  %v556_v53 = vadd.f32 %v555_v45, %v1572_v50  ;;  %v595_v54 = vmul.f32 %v1572_v50, %v1572_v50 }
 0x107   : > { %v557_v56 = vadd.f32 %v1556_v40, %v556_v53  ;;  %v626_v57 = vadd.f32 %v625_v52, %v595_v54  ;;  %v606_v53 = vmul.f32 %v1535_v27, %v1535_v27 }
 0x109   : > { %v627_v59 = vadd.f32 %v626_v57, %v596_v55  ;;  %v1584_v60 = vpop.f32.mrb[8].mxu0  ;;  %v558_v61 = vadd.f32 %v1568_v48, %v557_v56  ;;  %v1587_v62 = vpop.f32.mrb[8].mxu1 }
 0x10a   : > { %v1589_v63 = vpop.f32.mrb[9].mxu0  ;;  %v1591_v0 = vpop.f32.mrb[9].mxu1  ;;  %v600_v11 = vmul.f32 %v1584_v60, %v1584_v60 }
 0x10b   : > { %v559_v1 = vadd.f32 %v558_v61, %v1589_v63  ;;  %v598_v2 = vmul.f32 %v1589_v63, %v1589_v63  ;;  %v628_v3 = vadd.f32 %v627_v59, %v597_v58  ;;  %v1596_v4 = vpop.f32.mrb[10].mxu0  ;;  %v1598_v5 = vpop.f32.mrb[10].mxu1  ;;  %v607_v58 = vmul.f32 %v1543_v31, %v1543_v31 }
 0x10c   : > { %v1600_v6 = vpop.f32.mrb[11].mxu0  ;;  %v1602_v7 = vpop.f32.mrb[11].mxu1  ;;  %v601_v14 = vmul.f32 %v1596_v4, %v1596_v4  ;;  %v608_v59 = vmul.f32 %v1531_v25, %v1531_v25 }
 0x10d   : > { %v629_v8 = vadd.f32 %v628_v3, %v598_v2  ;;  %v560_v9 = vadd.f32 %v559_v1, %v1600_v6  ;;  %v599_v10 = vmul.f32 %v1600_v6, %v1600_v6  ;;  %v609_v2 = vmul.f32 %v1539_v29, %v1539_v29 }
 0x10f   : > { %v561_v12 = vadd.f32 %v1584_v60, %v560_v9  ;;  %v630_v13 = vadd.f32 %v629_v8, %v599_v10  ;;  %v610_v9 = vmul.f32 %v1563_v44, %v1563_v44 }
 0x111   : > { %v631_v15 = vadd.f32 %v630_v13, %v600_v11  ;;  %v1612_v16 = vpop.f32.mrb[12].mxu0  ;;  %v562_v17 = vadd.f32 %v1596_v4, %v561_v12  ;;  %v1615_v18 = vpop.f32.mrb[12].mxu1 }
 0x112   : > { %v1617_v19 = vpop.f32.mrb[13].mxu0  ;;  %v1619_v20 = vpop.f32.mrb[13].mxu1  ;;  %v604_v39 = vmul.f32 %v1612_v16, %v1612_v16 }
 0x113   : > { %v563_v21 = vadd.f32 %v562_v17, %v1617_v19  ;;  %v602_v22 = vmul.f32 %v1617_v19, %v1617_v19  ;;  %v632_v23 = vadd.f32 %v631_v15, %v601_v14  ;;  %v1624_v32 = vpop.f32.mrb[14].mxu0  ;;  %v1626_v33 = vpop.f32.mrb[14].mxu1  ;;  %v611_v14 = vmul.f32 %v1574_v51, %v1574_v51 }
 0x114   : > { %v1628_v34 = vpop.f32.mrb[15].mxu0  ;;  %v1630_v35 = vpop.f32.mrb[15].mxu1  ;;  %v605_v46 = vmul.f32 %v1624_v32, %v1624_v32  ;;  %v612_v15 = vmul.f32 %v1559_v42, %v1559_v42 }
 0x115   : > { %v633_v36 = vadd.f32 %v632_v23, %v602_v22  ;;  %v564_v37 = vadd.f32 %v563_v21, %v1628_v34  ;;  %v603_v38 = vmul.f32 %v1628_v34, %v1628_v34  ;;  %v613_v22 = vmul.f32 %v1570_v49, %v1570_v49 }
 0x117   : > { %v565_v41 = vadd.f32 %v1612_v16, %v564_v37  ;;  %v634_v45 = vadd.f32 %v633_v36, %v603_v38  ;;  %v614_v37 = vmul.f32 %v1591_v0, %v1591_v0 }
 0x119   : > { %v635_v47 = vadd.f32 %v634_v45, %v604_v39  ;;  %v566_v52 = vadd.f32 %v1624_v32, %v565_v41 }
 0x11b   : > { %v567_v54 = vadd.f32 %v566_v52, %v1535_v27  ;;  %v636_v55 = vadd.f32 %v635_v47, %v605_v46  ;;  %v615_v46 = vmul.f32 %v1602_v7, %v1602_v7  ;;  %v616_v47 = vmul.f32 %v1587_v62, %v1587_v62 }
 0x11d   : > { %v637_v56 = vadd.f32 %v636_v55, %v606_v53  ;;  %v568_v57 = vadd.f32 %v567_v54, %v1543_v31  ;;  %v617_v54 = vmul.f32 %v1598_v5, %v1598_v5 }
 0x11f   : > { %v569_v61 = vadd.f32 %v1531_v25, %v568_v57  ;;  %v638_v1 = vadd.f32 %v637_v56, %v607_v58  ;;  %v618_v57 = vmul.f32 %v1619_v20, %v1619_v20 }
 0x121   : > { %v639_v3 = vadd.f32 %v638_v1, %v608_v59  ;;  %v570_v8 = vadd.f32 %v1539_v29, %v569_v61 }
 0x123   : > { %v571_v10 = vadd.f32 %v570_v8, %v1563_v44  ;;  %v640_v11 = vadd.f32 %v639_v3, %v609_v2  ;;  %v619_v2 = vmul.f32 %v1630_v35, %v1630_v35  ;;  %v620_v3 = vmul.f32 %v1615_v18, %v1615_v18 }
 0x125   : > { %v641_v12 = vadd.f32 %v640_v11, %v610_v9  ;;  %v572_v13 = vadd.f32 %v571_v10, %v1574_v51  ;;  %v621_v10 = vmul.f32 %v1626_v33, %v1626_v33 }
 0x127   : > { %v573_v17 = vadd.f32 %v1559_v42, %v572_v13  ;;  %v642_v21 = vadd.f32 %v641_v12, %v611_v14 }
 0x129   : > { %v643_v23 = vadd.f32 %v642_v21, %v612_v15  ;;  %v574_v36 = vadd.f32 %v1570_v49, %v573_v17 }
 0x12b   : > { %v575_v38 = vadd.f32 %v574_v36, %v1591_v0  ;;  %v644_v39 = vadd.f32 %v643_v23, %v613_v22 }
 0x12d   : > { %v645_v41 = vadd.f32 %v644_v39, %v614_v37  ;;  %v576_v45 = vadd.f32 %v575_v38, %v1602_v7 }
 0x12f   : > { %v577_v52 = vadd.f32 %v1587_v62, %v576_v45  ;;  %v646_v53 = vadd.f32 %v645_v41, %v615_v46 }
 0x131   : > { %v647_v55 = vadd.f32 %v646_v53, %v616_v47  ;;  %v578_v56 = vadd.f32 %v1598_v5, %v577_v52 }
 0x133   : > { %v579_v58 = vadd.f32 %v578_v56, %v1619_v20  ;;  %v648_v59 = vadd.f32 %v647_v55, %v617_v54 }
 0x135   : > { %v649_v61 = vadd.f32 %v648_v59, %v618_v57  ;;  %v580_v1 = vadd.f32 %v579_v58, %v1630_v35 }
 0x137   : > { %v581_v8 = vadd.f32 %v1615_v18, %v580_v1  ;;  %v650_v9 = vadd.f32 %v649_v61, %v619_v2 }
 0x139   : > { %v582_v11 = vadd.f32 %v1626_v33, %v581_v8  ;;  %v651_v12 = vadd.f32 %v650_v9, %v620_v3 }
 0x13b   : > { %v583_v13 = vrot.slane %v582_v11, 4  ;;  %v652_v14 = vadd.f32 %v651_v12, %v621_v10 }
 0x13d   : > { %v584_v15 = vadd.f32 %v583_v13, %v582_v11  ;;  %v653_v17 = vrot.slane %v652_v14, 4 }
 0x13f   : > { %v585_v21 = vrot.slane %v584_v15, 2  ;;  %v654_v22 = vadd.f32 %v653_v17, %v652_v14 }
 0x141   : > { %v586_v23 = vadd.f32 %v585_v21, %v584_v15  ;;  %v655_v36 = vrot.slane %v654_v22, 2 }
 0x143   : > { %v587_v37 = vrot.slane %v586_v23, 1  ;;  %v656_v38 = vadd.f32 %v655_v36, %v654_v22 }
 0x145   : > { %v588_v39 = vadd.f32 %v587_v37, %v586_v23  ;;  %v657_v41 = vrot.slane %v656_v38, 1 }
 0x147   : > { %v1689_v45 = vmul.f32 0.00390625, %v588_v39  ;;  %v658_v46 = vadd.f32 %v657_v41, %v656_v38 }
 0x149   : > { %v659_v47 = vmul.f32 0.00390625, %v658_v46  ;;  %v660_v52 = vmul.f32 %v1689_v45, %v1689_v45  ;;  %v663_v53 = vsub.f32 %v1533_v26, %v1689_v45  ;;  %v664_v54 = vsub.f32 %v1541_v30, %v1689_v45 }
 0x14a   : > { %v665_v55 = vsub.f32 %v1529_v24, %v1689_v45  ;;  %v666_v56 = vsub.f32 %v1537_v28, %v1689_v45  ;;  %v667_v57 = vsub.f32 %v1561_v43, %v1689_v45  ;;  %v668_v58 = vsub.f32 %v1572_v50, %v1689_v45 }
 0x14b   : > { %v661_v59 = vsub.f32 %v659_v47, %v660_v52  ;;  %v669_v61 = vsub.f32 %v1556_v40, %v1689_v45  ;;  %v670_v26 = vsub.f32 %v1568_v48, %v1689_v45  ;;  %v671_v30 = vsub.f32 %v1589_v63, %v1689_v45 }
 0x14c   : > { %v672_v24 = vsub.f32 %v1600_v6, %v1689_v45  ;;  %v673_v28 = vsub.f32 %v1584_v60, %v1689_v45  ;;  %v674_v43 = vsub.f32 %v1596_v4, %v1689_v45  ;;  %v675_v50 = vsub.f32 %v1617_v19, %v1689_v45 }
 0x14d   : > { %v662_v1 = vmax.f32 %v661_v59, 0.0  ;;  %v676_v40 = vsub.f32 %v1628_v34, %v1689_v45  ;;  %v677_v48 = vsub.f32 %v1612_v16, %v1689_v45  ;;  %v678_v63 = vsub.f32 %v1624_v32, %v1689_v45 }
 0x14e   : > { %v679_v6 = vsub.f32 %v1535_v27, %v1689_v45  ;;  %v680_v60 = vsub.f32 %v1543_v31, %v1689_v45  ;;  %v681_v4 = vsub.f32 %v1531_v25, %v1689_v45  ;;  %v682_v19 = vsub.f32 %v1539_v29, %v1689_v45 }
 0x14f   : > { %v683_v34 = vsub.f32 %v1563_v44, %v1689_v45  ;;  %v684_v16 = vsub.f32 %v1574_v51, %v1689_v45  ;;  %v685_v32 = vsub.f32 %v1559_v42, %v1689_v45  ;;  %v686_v27 = vsub.f32 %v1570_v49, %v1689_v45 }
 0x150   : > { %v687_v31 = vsub.f32 %v1591_v0, %v1689_v45  ;;  %v688_v25 = vsub.f32 %v1602_v7, %v1689_v45  ;;  %v689_v29 = vsub.f32 %v1587_v62, %v1689_v45  ;;  %v690_v44 = vsub.f32 %v1598_v5, %v1689_v45 }
 0x151   : > { %v691_v51 = vsub.f32 %v1619_v20, %v1689_v45  ;;  %v692_v42 = vsub.f32 %v1630_v35, %v1689_v45  ;;  %v693_v49 = vsub.f32 %v1615_v18, %v1689_v45  ;;  %v694_v0 = vsub.f32 %v1626_v33, %v1689_v45 }
 0x152   : > { %v695_v2 = vadd.f32 1e-05, %v662_v1 }
 0x154   : > { %1436 = vrsqrt.f32 %v695_v2 }
 0x15e   : > { %v1437_v7 = vpop.eup %1436 }
 0x15f   : > { %v697_v3 = vmul.f32 %v1437_v7, %v663_v53  ;;  %v698_v62 = vmul.f32 %v1437_v7, %v664_v54  ;;  %v699_v8 = vmul.f32 %v1437_v7, %v665_v55  ;;  %v700_v9 = vmul.f32 %v1437_v7, %v666_v56 }
 0x160   : > { %v701_v5 = vmul.f32 %v1437_v7, %v667_v57  ;;  %v702_v10 = vmul.f32 %v1437_v7, %v668_v58  ;;  %v703_v11 = vmul.f32 %v1437_v7, %v669_v61  ;;  %v704_v20 = vmul.f32 %v1437_v7, %v670_v26  ;;  %v1151_v57 = vld [vmem:[%s2021_s2] ss:$0 sm:$0xff] }
 0x161   : > { %v705_v12 = vmul.f32 %v1437_v7, %v671_v30  ;;  %v706_v13 = vmul.f32 %v1437_v7, %v672_v24  ;;  %v707_v35 = vmul.f32 %v1437_v7, %v673_v28  ;;  %v708_v14 = vmul.f32 %v1437_v7, %v674_v43 }
 0x162   : > { %v709_v15 = vmul.f32 %v1437_v7, %v675_v50  ;;  %v710_v18 = vmul.f32 %v1437_v7, %v676_v40  ;;  %v711_v17 = vmul.f32 %v1437_v7, %v677_v48  ;;  %v712_v21 = vmul.f32 %v1437_v7, %v678_v63 }
 0x163   : > { %v713_v33 = vmul.f32 %v1437_v7, %v679_v6  ;;  %v714_v22 = vmul.f32 %v1437_v7, %v680_v60  ;;  %v715_v23 = vmul.f32 %v1437_v7, %v681_v4  ;;  %v716_v36 = vmul.f32 %v1437_v7, %v682_v19 }
 0x164   : > { %v717_v37 = vmul.f32 %v1437_v7, %v683_v34  ;;  %v718_v38 = vmul.f32 %v1437_v7, %v684_v16  ;;  %v719_v39 = vmul.f32 %v1437_v7, %v685_v32  ;;  %v720_v41 = vmul.f32 %v1437_v7, %v686_v27 }
 0x165   : > { %v721_v45 = vmul.f32 %v1437_v7, %v687_v31  ;;  %v722_v46 = vmul.f32 %v1437_v7, %v688_v25  ;;  %v723_v47 = vmul.f32 %v1437_v7, %v689_v29  ;;  %v724_v52 = vmul.f32 %v1437_v7, %v690_v44  ;;  %v1152_v44 = vld [vmem:[%s2022_s3] ss:$0 sm:$0xff] }
 0x166   : > { %v725_v53 = vmul.f32 %v1437_v7, %v691_v51  ;;  %v726_v54 = vmul.f32 %v1437_v7, %v692_v42  ;;  %v727_v55 = vmul.f32 %v1437_v7, %v693_v49  ;;  %v728_v56 = vmul.f32 %v1437_v7, %v694_v0 }
 0x167   : > { %v736_v58 = vmul.f32 %v1151_v57, %v697_v3  ;;  %v737_v59 = vmul.f32 %v1151_v57, %v698_v62  ;;  %v738_v61 = vmul.f32 %v1151_v57, %v699_v8  ;;  %v739_v26 = vmul.f32 %v1151_v57, %v700_v9 }
 0x168   : > { %v740_v30 = vmul.f32 %v1151_v57, %v701_v5  ;;  %v741_v24 = vmul.f32 %v1151_v57, %v702_v10  ;;  %v742_v28 = vmul.f32 %v1151_v57, %v703_v11  ;;  %v743_v43 = vmul.f32 %v1151_v57, %v704_v20 }
 0x169   : > { %v744_v50 = vmul.f32 %v1151_v57, %v705_v12  ;;  %v745_v1 = vmul.f32 %v1151_v57, %v706_v13  ;;  %v746_v40 = vmul.f32 %v1151_v57, %v707_v35  ;;  %v747_v48 = vmul.f32 %v1151_v57, %v708_v14 }
 0x16a   : > { %v748_v63 = vmul.f32 %v1151_v57, %v709_v15  ;;  %v749_v6 = vmul.f32 %v1151_v57, %v710_v18  ;;  %v750_v60 = vmul.f32 %v1151_v57, %v711_v17  ;;  %v751_v4 = vmul.f32 %v1151_v57, %v712_v21 }
 0x16b   : > { %v752_v19 = vmul.f32 %v1151_v57, %v713_v33  ;;  %v753_v34 = vmul.f32 %v1151_v57, %v714_v22  ;;  %v754_v16 = vmul.f32 %v1151_v57, %v715_v23  ;;  %v755_v32 = vmul.f32 %v1151_v57, %v716_v36 }
 0x16c   : > { %v756_v27 = vmul.f32 %v1151_v57, %v717_v37  ;;  %v757_v31 = vmul.f32 %v1151_v57, %v718_v38  ;;  %v758_v25 = vmul.f32 %v1151_v57, %v719_v39  ;;  %v759_v29 = vmul.f32 %v1151_v57, %v720_v41 }
 0x16d   : > { %v760_v51 = vmul.f32 %v1151_v57, %v721_v45  ;;  %v761_v42 = vmul.f32 %v1151_v57, %v722_v46  ;;  %v762_v49 = vmul.f32 %v1151_v57, %v723_v47  ;;  %v763_v0 = vmul.f32 %v1151_v57, %v724_v52 }
 0x16e   : > { %v764_v2 = vmul.f32 %v1151_v57, %v725_v53  ;;  %v765_v7 = vmul.f32 %v1151_v57, %v726_v54  ;;  %v766_v3 = vmul.f32 %v1151_v57, %v727_v55  ;;  %v767_v62 = vmul.f32 %v1151_v57, %v728_v56 }
 0x16f   : > { %v1763_v8 = vadd.f32 %v1152_v44, %v736_v58  ;;  %v1765_v9 = vadd.f32 %v1152_v44, %v737_v59  ;;  %v1767_v5 = vadd.f32 %v1152_v44, %v738_v61  ;;  %v1769_v10 = vadd.f32 %v1152_v44, %v739_v26 }
 0x170   : > { %v1771_v11 = vadd.f32 %v1152_v44, %v740_v30  ;;  %v1773_v20 = vadd.f32 %v1152_v44, %v741_v24  ;;  %v1775_v12 = vadd.f32 %v1152_v44, %v742_v28  ;;  %v1777_v13 = vadd.f32 %v1152_v44, %v743_v43 }
 0x171   : > { %v1779_v35 = vadd.f32 %v1152_v44, %v744_v50  ;;  %v1781_v14 = vadd.f32 %v1152_v44, %v745_v1  ;;  %v1783_v15 = vadd.f32 %v1152_v44, %v746_v40  ;;  %v1785_v18 = vadd.f32 %v1152_v44, %v747_v48 }
 0x172   : > { %v1787_v17 = vadd.f32 %v1152_v44, %v748_v63  ;;  %v1789_v21 = vadd.f32 %v1152_v44, %v749_v6  ;;  %v1791_v33 = vadd.f32 %v1152_v44, %v750_v60  ;;  %v1793_v22 = vadd.f32 %v1152_v44, %v751_v4 }
 0x173   : > { %v1795_v23 = vadd.f32 %v1152_v44, %v752_v19  ;;  %v1797_v36 = vadd.f32 %v1152_v44, %v753_v34  ;;  %v1799_v37 = vadd.f32 %v1152_v44, %v754_v16  ;;  %v1801_v38 = vadd.f32 %v1152_v44, %v755_v32 }
 0x174   : > { %v1803_v39 = vadd.f32 %v1152_v44, %v756_v27  ;;  %v1805_v41 = vadd.f32 %v1152_v44, %v757_v31  ;;  %v1807_v45 = vadd.f32 %v1152_v44, %v758_v25  ;;  %v1809_v46 = vadd.f32 %v1152_v44, %v759_v29 }
 0x175   : > { %v1811_v47 = vadd.f32 %v1152_v44, %v760_v51  ;;  %v1813_v52 = vadd.f32 %v1152_v44, %v761_v42  ;;  %v1815_v53 = vadd.f32 %v1152_v44, %v762_v49  ;;  %v1817_v54 = vadd.f32 %v1152_v44, %v763_v0 }
 0x176   : > { %v1819_v55 = vadd.f32 %v1152_v44, %v764_v2  ;;  %v1821_v56 = vadd.f32 %v1152_v44, %v765_v7  ;;  %vm807_vm0 = vcmp.gt.f32.partialorder %v1763_v8, 0.0  ;;  %vm808_vm1 = vcmp.gt.f32.partialorder %v1765_v9, 0.0 }
 0x177   : > { %vm809_vm2 = vcmp.gt.f32.partialorder %v1767_v5, 0.0  ;;  %vm810_vm3 = vcmp.gt.f32.partialorder %v1769_v10, 0.0  ;;  %vm811_vm4 = vcmp.gt.f32.partialorder %v1771_v11, 0.0  ;;  %vm812_vm5 = vcmp.gt.f32.partialorder %v1773_v20, 0.0 }
 0x178   : > { %vm813_vm6 = vcmp.gt.f32.partialorder %v1775_v12, 0.0  ;;  %vm814_vm7 = vcmp.gt.f32.partialorder %v1777_v13, 0.0  ;;  %vm815_vm8 = vcmp.gt.f32.partialorder %v1779_v35, 0.0  ;;  %v1833_v57 = vadd.f32 %v1152_v44, %v766_v3 }
 0x179   : > { %v839_v58 = vmul.f32 0.2, %v1763_v8  ;;  %v840_v59 = vmul.f32 0.2, %v1765_v9  ;;  %v841_v61 = vmul.f32 0.2, %v1767_v5  ;;  %v1842_v26 = vadd.f32 %v1152_v44, %v767_v62 }
 0x17a   : > { %vm822_vm15 = vcmp.gt.f32.partialorder %v1793_v22, 0.0  ;;  %vm823_vm10 = vcmp.gt.f32.partialorder %v1795_v23, 0.0  ;;  %v842_v30 = vmul.f32 0.2, %v1769_v10  ;;  %v843_v24 = vmul.f32 0.2, %v1771_v11 }
 0x17b   : > { %v844_v28 = vmul.f32 0.2, %v1773_v20  ;;  %vm828_vm14 = vcmp.gt.f32.partialorder %v1805_v41, 0.0  ;;  %v845_v43 = vmul.f32 0.2, %v1775_v12  ;;  %v1861_v40 = vsel %vm807_vm0, %v1763_v8, %v839_v58 }
 0x17c   : > { %v846_v50 = vmul.f32 0.2, %v1777_v13  ;;  %v847_v1 = vmul.f32 0.2, %v1779_v35  ;;  %vm832_vm9 = vcmp.gt.f32.partialorder %v1813_v52, 0.0  ;;  %v1873_v60 = vsel %vm808_vm1, %v1765_v9, %v840_v59 }
 0x17d   : > { %v848_v48 = vmul.f32 0.2, %v1781_v14  ;;  %v849_v63 = vmul.f32 0.2, %v1783_v15  ;;  %v850_v6 = vmul.f32 0.2, %v1785_v18  ;;  %v873_v16 = vsel %vm809_vm2, %v1767_v5, %v841_v61 }
 0x17e   : > { %vm834_vm11 = vcmp.gt.f32.partialorder %v1817_v54, 0.0  ;;  %vm835_vm13 = vcmp.gt.f32.partialorder %v1819_v55, 0.0  ;;  %vm836_vm12 = vcmp.gt.f32.partialorder %v1821_v56, 0.0  ;;  %v851_v4 = vmul.f32 0.2, %v1787_v17 }
 0x17f   : > { %v852_v19 = vmul.f32 0.2, %v1789_v21  ;;  %v853_v34 = vmul.f32 0.2, %v1791_v33  ;;  %vm837_vm1 = vcmp.gt.f32.partialorder %v1833_v57, 0.0  ;;  %vm838_vm0 = vcmp.gt.f32.partialorder %v1842_v26, 0.0 }
 0x180   : > { %v854_v32 = vmul.f32 0.2, %v1793_v22  ;;  %v855_v27 = vmul.f32 0.2, %v1795_v23  ;;  %v856_v31 = vmul.f32 0.2, %v1797_v36  ;;  %v874_v25 = vsel %vm810_vm3, %v1769_v10, %v842_v30 }
 0x181   : > { %v857_v29 = vmul.f32 0.2, %v1799_v37  ;;  %v858_v44 = vmul.f32 0.2, %v1801_v38  ;;  %v859_v51 = vmul.f32 0.2, %v1803_v39  ;;  %v875_v42 = vsel %vm811_vm4, %v1771_v11, %v843_v24 }
 0x182   : > { %v860_v49 = vmul.f32 0.2, %v1805_v41  ;;  %v861_v0 = vmul.f32 0.2, %v1807_v45  ;;  %v862_v2 = vmul.f32 0.2, %v1809_v46  ;;  %v876_v7 = vsel %vm812_vm5, %v1773_v20, %v844_v28 }
 0x183   : > { %v863_v3 = vmul.f32 0.2, %v1811_v47  ;;  %v864_v62 = vmul.f32 0.2, %v1813_v52  ;;  %v865_v8 = vmul.f32 0.2, %v1815_v53  ;;  %v877_v9 = vsel %vm813_vm6, %v1775_v12, %v845_v43 }
 0x184   : > { %v866_v5 = vmul.f32 0.2, %v1817_v54  ;;  %v867_v10 = vmul.f32 0.2, %v1819_v55  ;;  %v868_v11 = vmul.f32 0.2, %v1821_v56  ;;  %v878_v20 = vsel %vm814_vm7, %v1777_v13, %v846_v50 }
 0x185   : > { %v869_v58 = vmul.f32 0.2, %v1833_v57  ;;  %v870_v59 = vmul.f32 0.2, %v1842_v26  ;;  %v879_v61 = vsel %vm815_vm8, %v1779_v35, %v847_v1  ;;  %vm2024_vm2 = vcmp.gt.f32.partialorder %v1781_v14, 0.0 }
 0x186   : > { %v880_v12 = vsel %vm2024_vm2, %v1781_v14, %v848_v48  ;;  %vm2025_vm3 = vcmp.gt.f32.partialorder %v1783_v15, 0.0  ;;  %vm2026_vm4 = vcmp.gt.f32.partialorder %v1785_v18, 0.0  ;;  %vm2027_vm5 = vcmp.gt.f32.partialorder %v1787_v17, 0.0 }
 0x187   : > { %v881_v30 = vsel %vm2025_vm3, %v1783_v15, %v849_v63  ;;  %v882_v13 = vsel %vm2026_vm4, %v1785_v18, %v850_v6  ;;  %v883_v24 = vsel %vm2027_vm5, %v1787_v17, %v851_v4  ;;  %vm2028_vm6 = vcmp.gt.f32.partialorder %v1789_v21, 0.0 }
 0x188   : > { %v884_v35 = vsel %vm2028_vm6, %v1789_v21, %v852_v19  ;;  %vm2029_vm7 = vcmp.gt.f32.partialorder %v1791_v33, 0.0  ;;  %v886_v15 = vsel %vm822_vm15, %v1793_v22, %v854_v32  ;;  %v887_v18 = vsel %vm823_vm10, %v1795_v23, %v855_v27 }
 0x189   : > { %v885_v14 = vsel %vm2029_vm7, %v1791_v33, %v853_v34  ;;  %vm2030_vm8 = vcmp.gt.f32.partialorder %v1797_v36, 0.0  ;;  %vm2031_vm2 = vcmp.gt.f32.partialorder %v1799_v37, 0.0  ;;  %vm2032_vm3 = vcmp.gt.f32.partialorder %v1801_v38, 0.0 }
 0x18a   : > { %v888_v17 = vsel %vm2030_vm8, %v1797_v36, %v856_v31  ;;  %v889_v21 = vsel %vm2031_vm2, %v1799_v37, %v857_v29  ;;  %v890_v33 = vsel %vm2032_vm3, %v1801_v38, %v858_v44  ;;  %vm2033_vm4 = vcmp.gt.f32.partialorder %v1803_v39, 0.0 }
 0x18b   : > { %v891_v22 = vsel %vm2033_vm4, %v1803_v39, %v859_v51  ;;  %v892_v23 = vsel %vm828_vm14, %v1805_v41, %v860_v49  ;;  %vm2034_vm10 = vcmp.gt.f32.partialorder %v1807_v45, 0.0  ;;  %vm2035_vm15 = vcmp.gt.f32.partialorder %v1809_v46, 0.0 }
 0x18c   : > { %v893_v36 = vsel %vm2034_vm10, %v1807_v45, %v861_v0  ;;  %v894_v37 = vsel %vm2035_vm15, %v1809_v46, %v862_v2  ;;  %vm2036_vm5 = vcmp.gt.f32.partialorder %v1811_v47, 0.0  ;;  %v896_v39 = vsel %vm832_vm9, %v1813_v52, %v864_v62 }
 0x18d   : > { %v895_v38 = vsel %vm2036_vm5, %v1811_v47, %v863_v3  ;;  %vm2037_vm14 = vcmp.gt.f32.partialorder %v1815_v53, 0.0  ;;  %v898_v45 = vsel %vm834_vm11, %v1817_v54, %v866_v5  ;;  %v899_v46 = vsel %vm835_vm13, %v1819_v55, %v867_v10 }
 0x18e   : > { %v897_v41 = vsel %vm2037_vm14, %v1815_v53, %v865_v8  ;;  %v900_v47 = vsel %vm836_vm12, %v1821_v56, %v868_v11  ;;  %v901_v52 = vsel %vm837_vm1, %v1833_v57, %v869_v58  ;;  %v902_v53 = vsel %vm838_vm0, %v1842_v26, %v870_v59 }
 0x18f   : > { %v1224_v54 = vpack.c.bf16 %v1873_v60, %v1861_v40  ;;  %v1229_v55 = vpack.c.bf16 %v874_v25, %v873_v16  ;;  %v1234_v28 = vpack.c.bf16 %v876_v7, %v875_v42  ;;  %v1239_v43 = vpack.c.bf16 %v878_v20, %v877_v9 }
 0x190   : > { %v1244_v50 = vpack.c.bf16 %v880_v12, %v879_v61  ;;  %v1249_v56 = vpack.c.bf16 %v882_v13, %v881_v30  ;;  %v1254_v57 = vpack.c.bf16 %v884_v35, %v883_v24  ;;  %v1259_v1 = vpack.c.bf16 %v886_v15, %v885_v14 }
 0x191   : > { %1225 = vst [vmem:[%s1978_s19] sm:$0xff] %v1224_v54   ;;  %1301 = vst [vmem:[%s1978_s19 + $0x8] sm:$0xff] %v1229_v55   ;;  %v1264_v48 = vpack.c.bf16 %v888_v17, %v887_v18  ;;  %v1269_v26 = vpack.c.bf16 %v890_v33, %v889_v21  ;;  %v1274_v40 = vpack.c.bf16 %v892_v23, %v891_v22 }
 0x192   : > { %1302 = vst [vmem:[%s1978_s19 + $0x10] sm:$0xff] %v1234_v28   ;;  %1303 = vst [vmem:[%s1978_s19 + $0x18] sm:$0xff] %v1239_v43   ;;  %v1279_v63 = vpack.c.bf16 %v894_v37, %v893_v36  ;;  %v1284_v6 = vpack.c.bf16 %v896_v39, %v895_v38  ;;  %v1289_v60 = vpack.c.bf16 %v898_v45, %v897_v41 }
 0x193   : > { %1304 = vst [vmem:[%s1978_s19 + $0x20] sm:$0xff] %v1244_v50   ;;  %1305 = vst [vmem:[%s1978_s19 + $0x28] sm:$0xff] %v1249_v56   ;;  %v1294_v4 = vpack.c.bf16 %v900_v47, %v899_v46  ;;  %v1299_v19 = vpack.c.bf16 %v902_v53, %v901_v52 }
 0x194   : > { %1306 = vst [vmem:[%s1978_s19 + $0x30] sm:$0xff] %v1254_v57   ;;  %1307 = vst [vmem:[%s1978_s19 + $0x38] sm:$0xff] %v1259_v1  }
 0x195   : > { %1308 = vst [vmem:[%s1978_s19 + $0x40] sm:$0xff] %v1264_v48   ;;  %1309 = vst [vmem:[%s1978_s19 + $0x48] sm:$0xff] %v1269_v26  }
 0x196   : > { %1310 = vst [vmem:[%s1978_s19 + $0x50] sm:$0xff] %v1274_v40   ;;  %1311 = vst [vmem:[%s1978_s19 + $0x58] sm:$0xff] %v1279_v63  }
 0x197   : > { %1312 = vst [vmem:[%s1978_s19 + $0x60] sm:$0xff] %v1284_v6   ;;  %1313 = vst [vmem:[%s1978_s19 + $0x68] sm:$0xff] %v1289_v60  }
 0x198   : > { %1314 = vst [vmem:[%s1978_s19 + $0x70] sm:$0xff] %v1294_v4   ;;  %1315 = vst [vmem:[%s1978_s19 + $0x78] sm:$0xff] %v1299_v19  }
 0x199 PF: > { %s14_s15 = sadd.s32 1, %s1444_s15  }
 0x19a   : > { %p11_p4 = scmp.ge.s32.totalorder %s14_s15, 4  }
 0x19c   :  { %13 = sbr.rel (!%p11_p4) target bundleno = 1 (0x1), region = 66 }

// kernel: discriminator_forward.6
= control target key start
LH: loop header
LB: loop body
LE: loop exit
PB: predicated region body
PF: predicated region fallthrough
CT: control target
= control target key end

     0   :  { %s851_s15 = smov 0   ;;  %s968_s0 = inlined_call_operand.vmem [shape: bf16[2,64,256], index: 0, kind: input, shape index: {}]   ;;  %s969_s1 = inlined_call_operand.vmem [shape: bf16[256,128], index: 1, kind: input, shape index: {}]   ;;  %s970_s2 = inlined_call_operand.vmem [shape: f32[1,128], index: 2, kind: input, shape index: {}]   ;;  %s971_s3 = inlined_call_operand.vmem [shape: f32[1,128], index: 3, kind: input, shape index: {}]   ;;  %s972_s4 = inlined_call_operand.vmem [shape: bf16[2,64,128], index: 4, kind: output, shape index: {}]  }
   0x1 LB: > { %s646_s16 = sadd.s32 4294967295, %s824_s15   ;;  %p650_p0 = scmp.ge.s32.totalorder %s824_s15, 1  ;;  %s824_s15 = sphi %s851_s15, %s14_s15  }
   0x2   : > { %p162_p1 = scmp.lt.s32.totalorder %s824_s15, 3 }
   0x4   : > { %p163_p2 = pnand %p650_p0, %p162_p1 }
   0x5   : > { %v788_v0 = vld [vmem:[%s969_s1 + $0x40] sm:$0xff] (!%p163_p2)   ;;  %v790_v2 = vld [vmem:[%s969_s1 + $0x48] sm:$0xff] (!%p163_p2)   ;;  %p188_p3 = scmp.lt.s32.totalorder (!%p163_p2), %s646_s16, 1  ;;  %v792_v4 = vld [vmem:[%s969_s1 + $0x50] sm:$0xff] (!%p163_p2)  }
   0x6   : > { %166 = sbr.rel (%p163_p2) target bundleno = 322 (0x142), region = 36  ;;  %v789_v1 = vld [vmem:[%s969_s1] sm:$0xff] (!%p163_p2)   ;;  %724 = vmatprep.subr.bf16.mxu0 (!%p163_p2), %v788_v0  ;;  %764 = vmatprep.subr.bf16.mxu1 (!%p163_p2), %v788_v0  ;;  %v791_v3 = vld [vmem:[%s969_s1 + $0x8] sm:$0xff] (!%p163_p2)   ;;  %v793_v5 = vld [vmem:[%s969_s1 + $0x10] sm:$0xff] (!%p163_p2)  }
   0x7   : > { %725 = vmatpush3.bf16.msra.mxu0 (!%p163_p2), %v789_v1  ;;  %772 = vmatpush3.bf16.msra.mxu1 (!%p163_p2), %v789_v1  ;;  %v794_v6 = vld [vmem:[%s969_s1 + $0x58] sm:$0xff] (!%p163_p2)   ;;  %v796_v8 = vld [vmem:[%s969_s1 + $0x60] sm:$0xff] (!%p163_p2)   ;;  %v798_v10 = vld [vmem:[%s969_s1 + $0x68] sm:$0xff] (!%p163_p2)  }
   0x8   : > { %726 = vmatprep.subr.bf16.mxu0 (!%p163_p2), %v790_v2  ;;  %765 = vmatprep.subr.bf16.mxu1 (!%p163_p2), %v790_v2  ;;  %v795_v7 = vld [vmem:[%s969_s1 + $0x18] sm:$0xff] (!%p163_p2)   ;;  %v797_v9 = vld [vmem:[%s969_s1 + $0x20] sm:$0xff] (!%p163_p2)   ;;  %v799_v13 = vld [vmem:[%s969_s1 + $0x28] sm:$0xff] (!%p163_p2)  }
   0x9   : > { %v800_v14 = vld [vmem:[%s969_s1 + $0x70] sm:$0xff] (!%p163_p2)   ;;  %v802_v16 = vld [vmem:[%s969_s1 + $0x78] sm:$0xff] (!%p163_p2)  }
   0xa   : > { %v801_v15 = vld [vmem:[%s969_s1 + $0x30] sm:$0xff] (!%p163_p2)   ;;  %v803_v17 = vld [vmem:[%s969_s1 + $0x38] sm:$0xff] (!%p163_p2)  }
   0xb   : > { %727 = vmatpush3.bf16.msra.mxu0 (!%p163_p2), %v791_v3  ;;  %773 = vmatpush3.bf16.msra.mxu1 (!%p163_p2), %v791_v3 }
   0xc   : > { %728 = vmatprep.subr.bf16.mxu0 (!%p163_p2), %v792_v4  ;;  %766 = vmatprep.subr.bf16.mxu1 (!%p163_p2), %v792_v4 }
   0xd   : > { %s974_s16 = smov (!%p188_p3, %s646_s16), 1 }
   0xe   : > { %s691_s7 = sshll.u32 %s974_s16, 6 }
   0xf   : > { %729 = vmatpush3.bf16.msra.mxu0 %v793_v5  ;;  %774 = vmatpush3.bf16.msra.mxu1 %v793_v5  ;;  %s892_s12 = scalar_lea.vmem %s968_s0, %s691_s7  ;;  %s692_s7 = sshll.u32 %s974_s16, 5 }
  0x10   : > { %730 = vmatprep.subr.bf16.mxu0 %v794_v6  ;;  %767 = vmatprep.subr.bf16.mxu1 %v794_v6  ;;  %v806_v11 = vld [vmem:[%s892_s12 + $0x4] ss:$8 sps:$4 sm:$0xff]   ;;  %v804_v18 = vld [vmem:[%s892_s12] ss:$8 sps:$4 sm:$0xff]   ;;  %v810_v20 = vld [vmem:[%s892_s12 + $0x14] ss:$8 sps:$4 sm:$0xff]   ;;  %s197_s16 = scalar_lea.vmem %s972_s4, %s692_s7 }
  0x11   : > { %v809_v12 = vld [vmem:[%s892_s12 + $0x24] ss:$8 sps:$4 sm:$0xff]   ;;  %407 = vmatprep.mubr.bf16.mxu0 %v806_v11  ;;  %v807_v19 = vld [vmem:[%s892_s12 + $0x20] ss:$8 sps:$4 sm:$0xff]   ;;  %v813_v21 = vld [vmem:[%s892_s12 + $0x34] ss:$8 sps:$4 sm:$0xff]  }
  0x12   : > { %423 = vmatprep.mubr.bf16.mxu1 %v809_v12  ;;  %v812_v22 = vld [vmem:[%s892_s12 + $0x10] ss:$8 sps:$4 sm:$0xff]  }
  0x13   : > { %731 = vmatpush3.bf16.msra.mxu0 %v795_v7  ;;  %775 = vmatpush3.bf16.msra.mxu1 %v795_v7  ;;  %v815_v23 = vld [vmem:[%s892_s12 + $0x30] ss:$8 sps:$4 sm:$0xff]  }
  0x14   : > { %732 = vmatprep.subr.bf16.mxu0 %v796_v8  ;;  %768 = vmatprep.subr.bf16.mxu1 %v796_v8 }
  0x17   : > { %733 = vmatpush3.bf16.msra.mxu0 %v797_v9  ;;  %776 = vmatpush3.bf16.msra.mxu1 %v797_v9 }
  0x18   : > { %734 = vmatprep.subr.bf16.mxu0 %v798_v10  ;;  %769 = vmatprep.subr.bf16.mxu1 %v798_v10 }
  0x1b   : > { %735 = vmatpush3.bf16.msra.mxu0 %v799_v13  ;;  %777 = vmatpush3.bf16.msra.mxu1 %v799_v13 }
  0x1c   : > { %736 = vmatprep.subr.bf16.mxu0 %v800_v14  ;;  %770 = vmatprep.subr.bf16.mxu1 %v800_v14 }
  0x1f   : > { %737 = vmatpush3.bf16.msra.mxu0 %v801_v15  ;;  %778 = vmatpush3.bf16.msra.mxu1 %v801_v15 }
  0x20   : > { %738 = vmatprep.subr.bf16.mxu0 %v802_v16  ;;  %771 = vmatprep.subr.bf16.mxu1 %v802_v16 }
  0x23   : > { %739 = vmatpush3.bf16.msra.mxu0 %v803_v17  ;;  %779 = vmatpush3.bf16.msra.mxu1 %v803_v17 }
  0x26   : > { %408 = vmatmul.mubr.bf16.vlgmr.msra.gmra.mrb[0].mxu0 %v804_v18  ;;  %424 = vmatmul.mubr.bf16.vlgmr.msra.gmra.mrb[0].mxu1 %v807_v19 }
  0x27   : > { %415 = vmatprep.mubr.bf16.mxu0 %v810_v20  ;;  %431 = vmatprep.mubr.bf16.mxu1 %v813_v21 }
  0x2e   : > { %416 = vmatmul.mubr.bf16.gmra.mrb[4].mxu0 %v812_v22  ;;  %432 = vmatmul.mubr.bf16.gmra.mrb[4].mxu1 %v815_v23 }
  0xf9   : > { %v740_v24 = vpop.f32.mrb[0].mxu0  ;;  %v752_v25 = vpop.f32.mrb[0].mxu1 }
  0xfa   : > { %v741_v26 = vpop.f32.mrb[1].mxu0  ;;  %v753_v27 = vpop.f32.mrb[1].mxu1 }
  0xfb   : > { %v923_v28 = vadd.f32 %v741_v26, %v740_v24  ;;  %v743_v29 = vpop.f32.mrb[2].mxu0  ;;  %v925_v30 = vadd.f32 %v753_v27, %v752_v25  ;;  %v755_v31 = vpop.f32.mrb[2].mxu1 }
  0xfc   : > { %v744_v32 = vpop.f32.mrb[3].mxu0  ;;  %v756_v33 = vpop.f32.mrb[3].mxu1 }
  0xfd   : > { %v927_v34 = vadd.f32 %v744_v32, %v743_v29  ;;  %v929_v35 = vadd.f32 %v756_v33, %v755_v31  ;;  %v454_v36 = vmul.f32 %v923_v28, %v923_v28  ;;  %v458_v57 = vmul.f32 %v925_v30, %v925_v30 }
  0xff   : > { %v440_v37 = vadd.f32 %v927_v34, %v923_v28  ;;  %v455_v38 = vmul.f32 %v927_v34, %v927_v34  ;;  %v459_v60 = vmul.f32 %v929_v35, %v929_v35 }
 0x101   : > { %v462_v39 = vadd.f32 %v455_v38, %v454_v36  ;;  %v746_v40 = vpop.f32.mrb[4].mxu0  ;;  %v758_v41 = vpop.f32.mrb[4].mxu1 }
 0x102   : > { %v747_v42 = vpop.f32.mrb[5].mxu0  ;;  %v759_v43 = vpop.f32.mrb[5].mxu1 }
 0x103   : > { %v748_v44 = vadd.f32 %v747_v42, %v746_v40  ;;  %v749_v45 = vpop.f32.mrb[6].mxu0  ;;  %v760_v46 = vadd.f32 %v759_v43, %v758_v41  ;;  %v761_v47 = vpop.f32.mrb[6].mxu1 }
 0x104   : > { %v750_v48 = vpop.f32.mrb[7].mxu0  ;;  %v762_v49 = vpop.f32.mrb[7].mxu1 }
 0x105   : > { %v441_v50 = vadd.f32 %v748_v44, %v440_v37  ;;  %v456_v51 = vmul.f32 %v748_v44, %v748_v44  ;;  %v751_v52 = vadd.f32 %v750_v48, %v749_v45  ;;  %v763_v53 = vadd.f32 %v762_v49, %v761_v47  ;;  %v679_v37 = vld [vmem:[%s970_s2] ss:$0 sm:$0xff] }
 0x106   : > { %v460_v63 = vmul.f32 %v760_v46, %v760_v46 }
 0x107   : > { %v463_v54 = vadd.f32 %v462_v39, %v456_v51  ;;  %v442_v55 = vadd.f32 %v751_v52, %v441_v50  ;;  %v457_v56 = vmul.f32 %v751_v52, %v751_v52  ;;  %v461_v4 = vmul.f32 %v763_v53, %v763_v53 }
 0x109   : > { %v443_v58 = vadd.f32 %v925_v30, %v442_v55  ;;  %v464_v59 = vadd.f32 %v463_v54, %v457_v56 }
 0x10b   : > { %v465_v61 = vadd.f32 %v464_v59, %v458_v57  ;;  %v444_v62 = vadd.f32 %v929_v35, %v443_v58 }
 0x10d   : > { %v445_v0 = vadd.f32 %v760_v46, %v444_v62  ;;  %v466_v1 = vadd.f32 %v465_v61, %v459_v60 }
 0x10f   : > { %v467_v2 = vadd.f32 %v466_v1, %v460_v63  ;;  %v446_v3 = vadd.f32 %v763_v53, %v445_v0 }
 0x111   : > { %v447_v5 = vrot.slane %v446_v3, 4  ;;  %v468_v6 = vadd.f32 %v467_v2, %v461_v4 }
 0x113   : > { %v448_v7 = vadd.f32 %v447_v5, %v446_v3  ;;  %v469_v8 = vrot.slane %v468_v6, 4 }
 0x115   : > { %v449_v9 = vrot.slane %v448_v7, 2  ;;  %v470_v10 = vadd.f32 %v469_v8, %v468_v6 }
 0x117   : > { %v450_v11 = vadd.f32 %v449_v9, %v448_v7  ;;  %v471_v12 = vrot.slane %v470_v10, 2 }
 0x119   : > { %v451_v13 = vrot.slane %v450_v11, 1  ;;  %v472_v14 = vadd.f32 %v471_v12, %v470_v10 }
 0x11b   : > { %v452_v15 = vadd.f32 %v451_v13, %v450_v11  ;;  %v473_v16 = vrot.slane %v472_v14, 1 }
 0x11d   : > { %v453_v17 = vmul.f32 0.015625, %v452_v15  ;;  %v474_v18 = vadd.f32 %v473_v16, %v472_v14 }
 0x11f   : > { %v475_v19 = vmul.f32 0.015625, %v474_v18  ;;  %v476_v20 = vmul.f32 %v453_v17, %v453_v17  ;;  %v479_v21 = vsub.f32 %v923_v28, %v453_v17  ;;  %v480_v22 = vsub.f32 %v927_v34, %v453_v17 }
 0x120   : > { %v481_v23 = vsub.f32 %v748_v44, %v453_v17  ;;  %v482_v24 = vsub.f32 %v751_v52, %v453_v17  ;;  %v483_v25 = vsub.f32 %v925_v30, %v453_v17  ;;  %v484_v26 = vsub.f32 %v929_v35, %v453_v17  ;;  %v680_v35 = vld [vmem:[%s971_s3] ss:$0 sm:$0xff] }
 0x121   : > { %v477_v27 = vsub.f32 %v475_v19, %v476_v20  ;;  %v485_v29 = vsub.f32 %v760_v46, %v453_v17  ;;  %v486_v31 = vsub.f32 %v763_v53, %v453_v17 }
 0x123   : > { %v478_v32 = vmax.f32 %v477_v27, 0.0 }
 0x125   : > { %v487_v33 = vadd.f32 1e-05, %v478_v32 }
 0x127   : > { %816 = vrsqrt.f32 %v487_v33 }
 0x131   : > { %v817_v36 = vpop.eup %816 }
 0x132   : > { %v489_v28 = vmul.f32 %v817_v36, %v479_v21  ;;  %v490_v38 = vmul.f32 %v817_v36, %v480_v22  ;;  %v491_v34 = vmul.f32 %v817_v36, %v481_v23  ;;  %v492_v39 = vmul.f32 %v817_v36, %v482_v24 }
 0x133   : > { %v493_v40 = vmul.f32 %v817_v36, %v483_v25  ;;  %v494_v41 = vmul.f32 %v817_v36, %v484_v26  ;;  %v495_v30 = vmul.f32 %v817_v36, %v485_v29  ;;  %v496_v42 = vmul.f32 %v817_v36, %v486_v31 }
 0x134   : > { %v504_v43 = vmul.f32 %v679_v37, %v489_v28  ;;  %v505_v44 = vmul.f32 %v679_v37, %v490_v38  ;;  %v506_v45 = vmul.f32 %v679_v37, %v491_v34  ;;  %v507_v46 = vmul.f32 %v679_v37, %v492_v39 }
 0x135   : > { %v508_v47 = vmul.f32 %v679_v37, %v493_v40  ;;  %v509_v48 = vmul.f32 %v679_v37, %v494_v41  ;;  %v510_v49 = vmul.f32 %v679_v37, %v495_v30  ;;  %v511_v50 = vmul.f32 %v679_v37, %v496_v42 }
 0x136   : > { %v519_v51 = vadd.f32 %v680_v35, %v504_v43  ;;  %v520_v52 = vadd.f32 %v680_v35, %v505_v44  ;;  %v521_v53 = vadd.f32 %v680_v35, %v506_v45  ;;  %v522_v54 = vadd.f32 %v680_v35, %v507_v46 }
 0x137   : > { %v523_v55 = vadd.f32 %v680_v35, %v508_v47  ;;  %v524_v56 = vadd.f32 %v680_v35, %v509_v48  ;;  %v525_v57 = vadd.f32 %v680_v35, %v510_v49  ;;  %v526_v58 = vadd.f32 %v680_v35, %v511_v50 }
 0x138   : > { %vm527_vm0 = vcmp.gt.f32.partialorder %v519_v51, 0.0  ;;  %vm528_vm1 = vcmp.gt.f32.partialorder %v520_v52, 0.0  ;;  %vm529_vm2 = vcmp.gt.f32.partialorder %v521_v53, 0.0  ;;  %vm530_vm3 = vcmp.gt.f32.partialorder %v522_v54, 0.0 }
 0x139   : > { %vm531_vm4 = vcmp.gt.f32.partialorder %v523_v55, 0.0  ;;  %vm532_vm5 = vcmp.gt.f32.partialorder %v524_v56, 0.0  ;;  %vm533_vm6 = vcmp.gt.f32.partialorder %v525_v57, 0.0  ;;  %vm534_vm7 = vcmp.gt.f32.partialorder %v526_v58, 0.0 }
 0x13a   : > { %v535_v59 = vmul.f32 0.2, %v519_v51  ;;  %v536_v60 = vmul.f32 0.2, %v520_v52  ;;  %v537_v61 = vmul.f32 0.2, %v521_v53 }
 0x13b   : > { %v538_v62 = vmul.f32 0.2, %v522_v54  ;;  %v539_v63 = vmul.f32 0.2, %v523_v55  ;;  %v540_v0 = vmul.f32 0.2, %v524_v56 }
 0x13c   : > { %v541_v1 = vmul.f32 0.2, %v525_v57  ;;  %v542_v2 = vmul.f32 0.2, %v526_v58  ;;  %v543_v3 = vsel %vm527_vm0, %v519_v51, %v535_v59  ;;  %v544_v4 = vsel %vm528_vm1, %v520_v52, %v536_v60 }
 0x13d   : > { %v545_v5 = vsel %vm529_vm2, %v521_v53, %v537_v61  ;;  %v546_v6 = vsel %vm530_vm3, %v522_v54, %v538_v62  ;;  %v547_v7 = vsel %vm531_vm4, %v523_v55, %v539_v63  ;;  %v548_v8 = vsel %vm532_vm5, %v524_v56, %v540_v0 }
 0x13e   : > { %v549_v9 = vsel %vm533_vm6, %v525_v57, %v541_v1  ;;  %v550_v10 = vsel %vm534_vm7, %v526_v58, %v542_v2  ;;  %v704_v11 = vpack.c.bf16 %v544_v4, %v543_v3  ;;  %v709_v12 = vpack.c.bf16 %v546_v6, %v545_v5 }
 0x13f   : > { %v714_v13 = vpack.c.bf16 %v548_v8, %v547_v7  ;;  %v719_v14 = vpack.c.bf16 %v550_v10, %v549_v9 }
 0x140   : > { %705 = vst [vmem:[%s197_s16] sm:$0xff] %v704_v11   ;;  %721 = vst [vmem:[%s197_s16 + $0x8] sm:$0xff] %v709_v12  }
 0x141   : > { %722 = vst [vmem:[%s197_s16 + $0x10] sm:$0xff] %v714_v13   ;;  %723 = vst [vmem:[%s197_s16 + $0x18] sm:$0xff] %v719_v14  }
 0x142 PF: > { %s14_s15 = sadd.s32 1, %s824_s15  }
 0x143   : > { %p11_p4 = scmp.ge.s32.totalorder %s14_s15, 4  }
 0x145   :  { %13 = sbr.rel (!%p11_p4) target bundleno = 1 (0x1), region = 66 }

// kernel: discriminator_forward.7
= control target key start
LH: loop header
LB: loop body
LE: loop exit
PB: predicated region body
PF: predicated region fallthrough
CT: control target
= control target key end

     0   :  { %s916_s23 = smov 0   ;;  %s1049_s0 = inlined_call_operand.vmem [shape: bf16[2,16,512], index: 0, kind: input, shape index: {}]   ;;  %s1050_s1 = inlined_call_operand.vmem [shape: bf16[512,128], index: 1, kind: input, shape index: {}]   ;;  %s1051_s2 = inlined_call_operand.vmem [shape: f32[1,128], index: 2, kind: input, shape index: {}]   ;;  %s1052_s3 = inlined_call_operand.vmem [shape: f32[1,128], index: 3, kind: input, shape index: {}]   ;;  %s1053_s4 = inlined_call_operand.vmem [shape: f32[16,128], index: 4, kind: input, shape index: {}]   ;;  %s1054_s5 = inlined_call_operand.<no memory space> [shape: f32[1,1], index: 5, kind: input, shape index: {}]   ;;  %s1055_s6 = inlined_call_operand.vmem [shape: f32[2,1,1], index: 6, kind: output, shape index: {}]  }
   0x1   :  { %v11_v0 = vstv %s1054_s5 }
   0x2   :  { %12 = vst [vmem:[#allocation2] sm:$0x1] %v11_v0 }
   0x3 LB: > { %s730_s24 = sadd.s32 4294967295, %s876_s23   ;;  %p734_p0 = scmp.ge.s32.totalorder %s876_s23, 1  ;;  %s876_s23 = sphi %s916_s23, %s18_s23  }
   0x4   : > { %p214_p1 = scmp.lt.s32.totalorder %s876_s23, 3 }
   0x6   : > { %p215_p2 = pnand %p734_p0, %p214_p1 }
   0x7   : > { %v830_v1 = vld [vmem:[%s1050_s1 + $0x40] sm:$0xff] (!%p215_p2)   ;;  %v834_v5 = vld [vmem:[%s1050_s1 + $0x48] sm:$0xff] (!%p215_p2)   ;;  %v838_v9 = vld [vmem:[%s1050_s1 + $0x50] sm:$0xff] (!%p215_p2)   ;;  %p242_p3 = scmp.lt.s32.totalorder (!%p215_p2), %s730_s24, 1  ;;  %vm681_vm2 = vcmask (!%p215_p2), 0  }
   0x8   : > { %218 = sbr.rel (%p215_p2) target bundleno = 470 (0x1d6), region = 44  ;;  %v831_v2 = vld [vmem:[%s1050_s1 + $0xc0] sm:$0xff] (!%p215_p2)   ;;  %778 = vmatprep.subr.bf16.mxu0 (!%p215_p2), %v830_v1  ;;  %v835_v6 = vld [vmem:[%s1050_s1 + $0xc8] sm:$0xff] (!%p215_p2)   ;;  %v839_v10 = vld [vmem:[%s1050_s1 + $0xd0] sm:$0xff] (!%p215_p2)  }
   0x9   : > { %v832_v3 = vld [vmem:[%s1050_s1] sm:$0xff] (!%p215_p2)   ;;  %800 = vmatprep.subr.bf16.mxu1 (!%p215_p2), %v831_v2  ;;  %v836_v7 = vld [vmem:[%s1050_s1 + $0x8] sm:$0xff] (!%p215_p2)   ;;  %v840_v11 = vld [vmem:[%s1050_s1 + $0x10] sm:$0xff] (!%p215_p2)  }
   0xa   : > { %v833_v4 = vld [vmem:[%s1050_s1 + $0x80] sm:$0xff] (!%p215_p2)   ;;  %779 = vmatpush3.bf16.msra.mxu0 (!%p215_p2), %v832_v3  ;;  %v837_v8 = vld [vmem:[%s1050_s1 + $0x88] sm:$0xff] (!%p215_p2)   ;;  %v841_v12 = vld [vmem:[%s1050_s1 + $0x90] sm:$0xff] (!%p215_p2)  }
   0xb   : > { %801 = vmatpush3.bf16.msra.mxu1 (!%p215_p2), %v833_v4  ;;  %780 = vmatprep.subr.bf16.mxu0 (!%p215_p2), %v834_v5  ;;  %v842_v13 = vld [vmem:[%s1050_s1 + $0x58] sm:$0xff] (!%p215_p2)   ;;  %v846_v17 = vld [vmem:[%s1050_s1 + $0x60] sm:$0xff] (!%p215_p2)   ;;  %v850_v21 = vld [vmem:[%s1050_s1 + $0x68] sm:$0xff] (!%p215_p2)  }
   0xc   : > { %802 = vmatprep.subr.bf16.mxu1 (!%p215_p2), %v835_v6  ;;  %v843_v14 = vld [vmem:[%s1050_s1 + $0xd8] sm:$0xff] (!%p215_p2)   ;;  %v847_v18 = vld [vmem:[%s1050_s1 + $0xe0] sm:$0xff] (!%p215_p2)   ;;  %v851_v22 = vld [vmem:[%s1050_s1 + $0xe8] sm:$0xff] (!%p215_p2)  }
   0xd   : > { %v844_v15 = vld [vmem:[%s1050_s1 + $0x18] sm:$0xff] (!%p215_p2)   ;;  %v848_v19 = vld [vmem:[%s1050_s1 + $0x20] sm:$0xff] (!%p215_p2)   ;;  %v852_v23 = vld [vmem:[%s1050_s1 + $0x28] sm:$0xff] (!%p215_p2)  }
   0xe   : > { %781 = vmatpush3.bf16.msra.mxu0 (!%p215_p2), %v836_v7  ;;  %v845_v16 = vld [vmem:[%s1050_s1 + $0x98] sm:$0xff] (!%p215_p2)   ;;  %v849_v20 = vld [vmem:[%s1050_s1 + $0xa0] sm:$0xff] (!%p215_p2)   ;;  %v853_v24 = vld [vmem:[%s1050_s1 + $0xa8] sm:$0xff] (!%p215_p2)  }
   0xf   : > { %803 = vmatpush3.bf16.msra.mxu1 %v837_v8  ;;  %782 = vmatprep.subr.bf16.mxu0 %v838_v9  ;;  %s1057_s24 = smov (!%p242_p3, %s730_s24), 1  ;;  %v854_v25 = vld [vmem:[%s1050_s1 + $0x70] sm:$0xff]   ;;  %v858_v29 = vld [vmem:[%s1050_s1 + $0x78] sm:$0xff]  }
  0x10   : > { %804 = vmatprep.subr.bf16.mxu1 %v839_v10  ;;  %v855_v26 = vld [vmem:[%s1050_s1 + $0xf0] sm:$0xff]   ;;  %s777_s8 = sshll.u32 %s1057_s24, 5  ;;  %v859_v30 = vld [vmem:[%s1050_s1 + $0xf8] sm:$0xff]   ;;  %s249_s9 = scalar_lea.vmem %s1055_s6, %s1057_s24 }
  0x11   : > { %v856_v27 = vld [vmem:[%s1050_s1 + $0x30] sm:$0xff]   ;;  %s246_s17 = scalar_lea.vmem %s1049_s0, %s777_s8  ;;  %v860_v31 = vld [vmem:[%s1050_s1 + $0x38] sm:$0xff]  }
  0x12   : > { %783 = vmatpush3.bf16.msra.mxu0 %v840_v11  ;;  %v857_v28 = vld [vmem:[%s1050_s1 + $0xb0] sm:$0xff]   ;;  %v861_v32 = vld [vmem:[%s1050_s1 + $0xb8] sm:$0xff]  }
  0x13   : > { %805 = vmatpush3.bf16.msra.mxu1 %v841_v12  ;;  %784 = vmatprep.subr.bf16.mxu0 %v842_v13  ;;  %v862_v33 = vld [vmem:[%s246_s17] ss:$16 sps:$4 sm:$0xff]   ;;  %v864_v34 = vld [vmem:[%s246_s17 + $0x4] ss:$16 sps:$4 sm:$0xff]   ;;  %v865_v35 = vld [vmem:[%s246_s17 + $0x8] ss:$16 sps:$4 sm:$0xff]  }
  0x14   : > { %806 = vmatprep.subr.bf16.mxu1 %v843_v14  ;;  %v867_v36 = vld [vmem:[%s246_s17 + $0xc] ss:$16 sps:$4 sm:$0xff]   ;;  %563 = vmatprep.mubr.bf16.mxu0 %v864_v34  ;;  %v773_v12 = vld [vmem:[%s1051_s2] ss:$0 sm:$0xff] }
  0x15   : > { %604 = vmatprep.mubr.bf16.mxu1 %v867_v36  ;;  %v679_v36 = vld [vmem:[#allocation2] sm:$0x1] }
  0x16   : > { %785 = vmatpush3.bf16.msra.mxu0 %v844_v15  ;;  %v774_v15 = vld [vmem:[%s1052_s3] ss:$0 sm:$0xff] }
  0x17   : > { %807 = vmatpush3.bf16.msra.mxu1 %v845_v16  ;;  %786 = vmatprep.subr.bf16.mxu0 %v846_v17 }
  0x18   : > { %808 = vmatprep.subr.bf16.mxu1 %v847_v18 }
  0x1a   : > { %787 = vmatpush3.bf16.msra.mxu0 %v848_v19 }
  0x1b   : > { %809 = vmatpush3.bf16.msra.mxu1 %v849_v20  ;;  %788 = vmatprep.subr.bf16.mxu0 %v850_v21  ;;  %v664_v21 = vld [vmem:[%s1053_s4] sm:$0xff] }
  0x1c   : > { %810 = vmatprep.subr.bf16.mxu1 %v851_v22 }
  0x1e   : > { %789 = vmatpush3.bf16.msra.mxu0 %v852_v23 }
  0x1f   : > { %811 = vmatpush3.bf16.msra.mxu1 %v853_v24  ;;  %790 = vmatprep.subr.bf16.mxu0 %v854_v25 }
  0x20   : > { %812 = vmatprep.subr.bf16.mxu1 %v855_v26  ;;  %v665_v26 = vld [vmem:[%s1053_s4 + $0x8] sm:$0xff] }
  0x22   : > { %791 = vmatpush3.bf16.msra.mxu0 %v856_v27 }
  0x23   : > { %813 = vmatpush3.bf16.msra.mxu1 %v857_v28  ;;  %792 = vmatprep.subr.bf16.mxu0 %v858_v29 }
  0x24   : > { %814 = vmatprep.subr.bf16.mxu1 %v859_v30 }
  0x26   : > { %793 = vmatpush3.bf16.msra.mxu0 %v860_v31 }
  0x27   : > { %815 = vmatpush3.bf16.msra.mxu1 %v861_v32 }
  0x29   : > { %564 = vmatmul.mubr.bf16.vlgmr.msra.gmra.mrb[0].mxu0 %v862_v33 }
  0x2a   : > { %605 = vmatmul.mubr.bf16.vlgmr.msra.gmra.mrb[0].mxu1 %v865_v35 }
  0xfc   : > { %v794_v37 = vpop.f32.mrb[0].mxu0 }
  0xfd   : > { %v816_v38 = vpop.f32.mrb[0].mxu1  ;;  %v795_v39 = vpop.f32.mrb[1].mxu0 }
  0xfe   : > { %v796_v40 = vadd.f32 %v795_v39, %v794_v37  ;;  %v817_v41 = vpop.f32.mrb[1].mxu1  ;;  %v797_v42 = vpop.f32.mrb[2].mxu0 }
  0xff   : > { %v818_v43 = vadd.f32 %v817_v41, %v816_v38  ;;  %v819_v44 = vpop.f32.mrb[2].mxu1  ;;  %v798_v45 = vpop.f32.mrb[3].mxu0 }
 0x100   : > { %v799_v46 = vadd.f32 %v798_v45, %v797_v42  ;;  %v820_v47 = vpop.f32.mrb[3].mxu1 }
 0x101   : > { %v607_v48 = vadd.f32 %v818_v43, %v796_v40  ;;  %v821_v49 = vadd.f32 %v820_v47, %v819_v44 }
 0x103   : > { %v610_v50 = vadd.f32 %v821_v49, %v799_v46  ;;  %v621_v51 = vmul.f32 %v607_v48, %v607_v48 }
 0x105   : > { %v613_v52 = vadd.f32 %v610_v50, %v607_v48  ;;  %v622_v53 = vmul.f32 %v610_v50, %v610_v50 }
 0x107   : > { %v614_v54 = vrot.slane %v613_v52, 4  ;;  %v623_v55 = vadd.f32 %v622_v53, %v621_v51 }
 0x109   : > { %v615_v56 = vadd.f32 %v614_v54, %v613_v52  ;;  %v624_v57 = vrot.slane %v623_v55, 4 }
 0x10b   : > { %v616_v58 = vrot.slane %v615_v56, 2  ;;  %v625_v59 = vadd.f32 %v624_v57, %v623_v55 }
 0x10d   : > { %v617_v60 = vadd.f32 %v616_v58, %v615_v56  ;;  %v626_v61 = vrot.slane %v625_v59, 2 }
 0x10f   : > { %v618_v62 = vrot.slane %v617_v60, 1  ;;  %v627_v63 = vadd.f32 %v626_v61, %v625_v59 }
 0x111   : > { %v619_v0 = vadd.f32 %v618_v62, %v617_v60  ;;  %v628_v1 = vrot.slane %v627_v63, 1 }
 0x113   : > { %v620_v2 = vmul.f32 0.0625, %v619_v0  ;;  %v629_v3 = vadd.f32 %v628_v1, %v627_v63 }
 0x115   : > { %v630_v4 = vmul.f32 0.0625, %v629_v3  ;;  %v631_v5 = vmul.f32 %v620_v2, %v620_v2  ;;  %v635_v6 = vsub.f32 %v610_v50, %v620_v2  ;;  %v634_v7 = vsub.f32 %v607_v48, %v620_v2 }
 0x117   : > { %v632_v8 = vsub.f32 %v630_v4, %v631_v5 }
 0x119   : > { %v633_v9 = vmax.f32 %v632_v8, 0.0 }
 0x11b   : > { %v636_v10 = vadd.f32 1e-05, %v633_v9 }
 0x11d   : > { %868 = vrsqrt.f32 %v636_v10 }
 0x127   : > { %v869_v11 = vpop.eup %868 }
 0x128   : > { %v639_v13 = vmul.f32 %v869_v11, %v635_v6  ;;  %v638_v14 = vmul.f32 %v869_v11, %v634_v7 }
 0x12a   : > { %v647_v16 = vmul.f32 %v773_v12, %v638_v14  ;;  %v648_v17 = vmul.f32 %v773_v12, %v639_v13 }
 0x12c   : > { %v656_v18 = vadd.f32 %v774_v15, %v647_v16  ;;  %v657_v19 = vadd.f32 %v774_v15, %v648_v17 }
 0x12e   : > { %vm658_vm0 = vcmp.gt.f32.partialorder %v656_v18, 0.0  ;;  %v660_v20 = vmul.f32 0.2, %v656_v18  ;;  %v661_v22 = vmul.f32 0.2, %v657_v19  ;;  %vm659_vm1 = vcmp.gt.f32.partialorder %v657_v19, 0.0 }
 0x130   : > { %v662_v23 = vsel %vm658_vm0, %v656_v18, %v660_v20  ;;  %v663_v25 = vsel %vm659_vm1, %v657_v19, %v661_v22 }
 0x131   : > { %v666_v24 = vmul.f32 %v664_v21, %v662_v23  ;;  %v667_v27 = vmul.f32 %v665_v26, %v663_v25 }
 0x133   : > { %668 = vadd.xlane.f32.xlu0 %v666_v24 }
 0x137   : > { %670 = vadd.xlane.f32.xlu0 %v667_v27 }
 0x1c0   : > { %v669_v28 = vpop.xlane.xlu0 %668 }
 0x1c4   : > { %v671_v29 = vpop.xlane.xlu0 %670 }
 0x1c5   : > { %v672_v30 = vadd.f32 %v671_v29, %v669_v28 }
 0x1c7   : > { %v673_v31 = vrot.slane %v672_v30, 4 }
 0x1c9   : > { %v674_v32 = vadd.f32 %v673_v31, %v672_v30 }
 0x1cb   : > { %v675_v33 = vrot.slane %v674_v32, 2 }
 0x1cd   : > { %v676_v34 = vadd.f32 %v675_v33, %v674_v32 }
 0x1cf   : > { %v677_v35 = vrot.slane %v676_v34, 1 }
 0x1d1   : > { %v678_v37 = vadd.f32 %v677_v35, %v676_v34 }
 0x1d3   : > { %v680_v38 = vadd.f32 %v679_v36, %v678_v37 }
 0x1d5   : > { %682 = vst.msk [vmem:[%s249_s9] sm:$0x1] %vm681_vm2, %v680_v38 }
 0x1d6 PF: > { %s18_s23 = sadd.s32 1, %s876_s23  }
 0x1d7   : > { %p15_p4 = scmp.ge.s32.totalorder %s18_s23, 4  }
 0x1d9   :  { %17 = sbr.rel (!%p15_p4) target bundleno = 3 (0x3), region = 74 }

</bundles_post_ra>
